<compile_context>
chip_gen: v7x
topology: tpu7x:2x2x1
jax: 0.10.0
libtpu: 0.0.40
codegen_flags: <defaults>
</compile_context>

<pallas_src>
import functools

import jax
import jax.numpy as jnp
from jax import lax
from jax.experimental import pallas as pl
from jax.experimental.pallas import tpu as pltpu

COMPUTE_DTYPE = jnp.bfloat16  # MXU operand dtype; accumulation is always f32.


def _round_up(x, m):
    return (x + m - 1) // m * m


# --------------------------- stride-phase rearrangement ----------------------------

def _split_phases(xp, s):
    """Rearrange a padded NHWC input into its s*s stride phases, stacked along H.

    result[n, p*Hph + i, j, c] == xp[n, i*s + p//s, j*s + p%s, c], so every (kh, kw)
    conv tap becomes a contiguous row window of one phase.  Requires Hp % s == Wp % s == 0.
    """
    Nb, Hp, Wp, C = xp.shape
    if s == 1:
        return xp, Hp, Wp
    Hph, Wph = Hp // s, Wp // s
    ph = xp.reshape(Nb, Hph, s, Wph, s, C).transpose(0, 2, 4, 1, 3, 5)
    return ph.reshape(Nb, s * s * Hph, Wph, C), Hph, Wph


# ------------------------- fused conv (tap reduction) kernel ------------------------

def _make_conv_kernel(k, s, n_row_tiles, TH, OW, Wph, Hph, Cout, fuse_bn, fuse_add):
    RW = TH * Wph  # matmul rows per tile, in the padded-width layout

    def kernel(*refs):
        it = iter(refs)
        x_ref = next(it)                         # (1, ROWS, Cin) bf16, whole image (resident)
        w_ref = next(it)                         # (k, k, Cin, Cout) bf16
        scale_ref = next(it) if fuse_bn else None  # (1, Cout) f32
        bias_ref = next(it) if fuse_bn else None   # (1, Cout) f32
        add_ref = next(it) if fuse_add else None   # (1, TH*OW, Cout)
        o_ref = next(it)                         # (1, TH*OW, Cout)

        # flat-row offset of this row-tile's first output row (static when single tile)
        row0 = 0 if n_row_tiles == 1 else pl.program_id(1) * RW

        acc = jnp.zeros((RW, Cout), jnp.float32)
        for kh in range(k):                      # unrolled reduction over the k*k taps
            for kw in range(k):
                p = (kh % s) * s + (kw % s)      # stride phase
                qh, qw = kh // s, kw // s        # offset inside that phase
                # contiguous sublane-row window; the kw offset is folded into the start.
                start = (p * Hph + qh) * Wph + qw + row0
                xs = x_ref[0, pl.ds(start, RW), :]          # (RW, Cin), no relayout
                acc = acc + jnp.dot(xs, w_ref[kh, kw, :, :],
                                    preferred_element_type=jnp.float32)

        # Drop the (Wph - OW) padded columns once (single relayout of the output tile).
        if OW != Wph:
            out = acc.reshape(TH, Wph, Cout)[:, :OW, :].reshape(TH * OW, Cout)
        else:
            out = acc
        if fuse_bn:      # folded BatchNorm + ReLU epilogue (f32 VPU, hides under MXU)
            out = jnp.maximum(out * scale_ref[...] + bias_ref[...], 0.0)
        if fuse_add:     # fused residual add
            out = out + add_ref[0].astype(jnp.float32)
        o_ref[0] = out.astype(o_ref.dtype)

    return kernel


def conv2d_pallas(x, w, stride, padding, *, scale=None, bias=None, add=None,
                  out_dtype=jnp.float32, compute_dtype=COMPUTE_DTYPE,
                  acc_budget_bytes=2 << 20):
    """NHWC k x k conv (no bias) as a single fused Pallas kernel.

    Grid = (batch, row_tiles).  Optional fused epilogues:
      scale/bias : per-output-channel affine + ReLU (folded BatchNorm2d + ReLU)
      add        : residual tensor (N, OH, OW, Cout) added before the store.
    """
    Nb, H, W, Cin = x.shape
    k, Cout = w.shape[0], w.shape[-1]
    OH = (H + 2 * padding - k) // stride + 1
    OW = (W + 2 * padding - k) // stride + 1

    s = stride
    if k == 1 and s > 1:                 # strided 1x1 conv == subsample, then 1x1
        if padding:
            x = jnp.pad(x, ((0, 0), (padding,) * 2, (padding,) * 2, (0, 0)))
        x = x[:, ::s, ::s, :]
        s, padding = 1, 0

    Hb, Wb = x.shape[1], x.shape[2]
    qmax = (k - 1) // s                  # max in-phase tap offset
    extra_h = s if qmax > 0 else 0       # bottom slack so start+qw slices stay in-bounds
    Hp = _round_up(Hb + 2 * padding + extra_h, s)
    Wp = _round_up(Wb + 2 * padding, s)
    pads = ((0, 0), (padding, Hp - Hb - padding), (padding, Wp - Wb - padding), (0, 0))
    xp = jnp.pad(x, pads) if any(p for pr in pads for p in pr) else x

    xph, Hph, Wph = _split_phases(xp, s)
    ROWS = s * s * Hph * Wph
    # Contiguous flatten (free bitcast in XLA); bf16 cast fuses with the pad under jit.
    x_flat = xph.reshape(Nb, ROWS, Cin).astype(compute_dtype)
    w_cd = w.astype(compute_dtype)

    # ----- row tiling over OH (VMEM-byte aware, review item 2) -----
    cands = [d for d in range(1, OH + 1)
             if OH % d == 0 and (d == OH or (d * OW) % 8 == 0)]
    fitting = [d for d in cands if d * Wph * Cout * 4 <= acc_budget_bytes]
    TH = max(fitting) if fitting else min(cands)
    T = OH // TH

    fuse_bn, fuse_add = scale is not None, add is not None
    kernel = _make_conv_kernel(k, s, T, TH, OW, Wph, Hph, Cout, fuse_bn, fuse_add)

    in_specs = [pl.BlockSpec((1, ROWS, Cin), lambda n, t: (n, 0, 0)),       # image, resident
                pl.BlockSpec((k, k, Cin, Cout), lambda n, t: (0, 0, 0, 0))]  # weight, resident
    inputs = [x_flat, w_cd]
    if fuse_bn:
        cspec = pl.BlockSpec((1, Cout), lambda n, t: (0, 0))
        in_specs += [cspec, cspec]
        inputs += [scale.reshape(1, Cout).astype(jnp.float32),
                   bias.reshape(1, Cout).astype(jnp.float32)]
    if fuse_add:
        in_specs.append(pl.BlockSpec((1, TH * OW, Cout), lambda n, t: (n, t, 0)))
        inputs.append(add.reshape(Nb, OH * OW, Cout))

    # Explicit scoped-VMEM budget (review items 3/4): estimate the real per-step footprint,
    # keep at least the 32 MiB default and never above v7x's 64 MiB physical VMEM.
    out_isz = jnp.dtype(out_dtype).itemsize
    est = (2 * ROWS * Cin * 2 + 2 * k * k * Cin * Cout * 2
           + 2 * TH * OW * Cout * out_isz
           + (2 * TH * OW * Cout * 4 if fuse_add else 0)
           + (4 * Cout * 4 if fuse_bn else 0)
           + 2 * TH * Wph * Cout * 4)
    vmem_limit = int(min(64 << 20, max(32 << 20, 2 * est)))

    y = pl.pallas_call(
        kernel,
        out_shape=jax.ShapeDtypeStruct((Nb, OH * OW, Cout), out_dtype),
        grid=(Nb, T),
        in_specs=in_specs,
        out_specs=pl.BlockSpec((1, TH * OW, Cout), lambda n, t: (n, t, 0)),
        compiler_params=pltpu.CompilerParams(
            dimension_semantics=("parallel", "parallel"),
            vmem_limit_bytes=vmem_limit),
    )(*inputs)
    return y.reshape(Nb, OH, OW, Cout)


# ------------------------------- BasicBlock forward --------------------------------

@functools.partial(jax.jit, static_argnames=("stride", "equal_in_out"))
def basic_block_forward(x, params, stride, equal_in_out):
    """Mirrors BasicBlock.forward (when in != out, torch reassigns x = relu(bn1(x)) so the
    shortcut conv is applied to relu(bn1(x)); the identity residual stays the raw f32 x)."""
    # relu(bn1(x)) in f32; under jit XLA fuses this with the conv halo pad + bf16 cast,
    # so the activation takes exactly one extra pass over HBM (no standalone bn kernel).
    h = jnp.maximum(x * params["bn1_scale"] + params["bn1_bias"], 0.0)
    # conv1 (L0Conv2d, eval-mode gate folded into w1) with bn2+ReLU fused into its epilogue.
    out = conv2d_pallas(h, params["w1"], stride=1, padding=1,
                        scale=params["bn2_scale"], bias=params["bn2_bias"],
                        out_dtype=COMPUTE_DTYPE)
    # residual branch: identity (f32), or convShortcut(relu(bn1(x))).
    residual = x if equal_in_out else conv2d_pallas(
        h, params["w_sc"], stride=stride, padding=0, out_dtype=jnp.float32)
    # conv2 (MAPConv2d) with the residual add fused into its epilogue.
    return conv2d_pallas(out, params["w2"], stride=stride, padding=1,
                         add=residual, out_dtype=jnp.float32)


# --------------------------------- reference (JAX) ----------------------------------

def ref_forward(x, params, stride, equal_in_out):
    def bnrelu(v, s, b):
        return jnp.maximum(v * s + b, 0.0)

    def conv(v, w, st, pad):
        return lax.conv_general_dilated(
            v, w, (st, st), [(pad, pad), (pad, pad)],
            dimension_numbers=("NHWC", "HWIO", "NHWC"))

    h = bnrelu(x, params["bn1_scale"], params["bn1_bias"])
    out = conv(h, params["w1"], 1, 1)
    out = bnrelu(out, params["bn2_scale"], params["bn2_bias"])
    out = conv(out, params["w2"], stride, 1)
    res = x if equal_in_out else conv(h, params["w_sc"], stride, 0)
    return out + res


# -------------------------------- deterministic init --------------------------------

def init_params(key, in_planes, out_planes):
    ks = jax.random.split(key, 12)
    eps = 1e-5

    def bn(kg, kb, km, kv, c):
        gamma = jax.random.uniform(kg, (c,), minval=0.5, maxval=1.5)
        beta = jax.random.normal(kb, (c,)) * 0.1
        rmean = jax.random.normal(km, (c,)) * 0.1
        rvar = jax.random.uniform(kv, (c,), minval=0.5, maxval=1.5)
        scale = gamma / jnp.sqrt(rvar + eps)
        bias = beta - rmean * scale
        return scale.astype(jnp.float32), bias.astype(jnp.float32)

    bn1_scale, bn1_bias = bn(ks[0], ks[1], ks[2], ks[3], in_planes)
    bn2_scale, bn2_bias = bn(ks[4], ks[5], ks[6], ks[7], out_planes)

    w1 = jax.random.normal(ks[8], (3, 3, in_planes, out_planes), jnp.float32) * 0.1
    # deterministic (eval-mode) L0 hard-sigmoid gate per output channel, folded into w1
    qz_loga = jax.random.normal(ks[9], (out_planes,), jnp.float32)
    limit_a, limit_b = -0.1, 1.1
    z = jnp.clip(jax.nn.sigmoid(qz_loga) * (limit_b - limit_a) + limit_a, 0.0, 1.0)
    w1 = w1 * z  # broadcast over Cout (last axis)

    w2 = jax.random.normal(ks[10], (3, 3, out_planes, out_planes), jnp.float32) * 0.1
    params = dict(bn1_scale=bn1_scale, bn1_bias=bn1_bias,
                  bn2_scale=bn2_scale, bn2_bias=bn2_bias, w1=w1, w2=w2)
    if in_planes != out_planes:
        params["w_sc"] = jax.random.normal(
            ks[11], (1, 1, in_planes, out_planes), jnp.float32) * 0.1
    return params


# --------------------------------------- main ---------------------------------------

if __name__ == "__main__":
    key = jax.random.PRNGKey(0)
    kx1, kx2, kx3, kp1, kp2, kw3 = jax.random.split(key, 6)

    # Case 1: in_planes != out_planes, stride 2  (1x1 conv shortcut path)
    x1 = jax.random.normal(kx1, (2, 16, 16, 4), dtype=jnp.float32)   # NHWC
    p1 = init_params(kp1, 4, 8)
    y1 = basic_block_forward(x1, p1, stride=2, equal_in_out=False)
    r1 = ref_forward(x1, p1, 2, False)

    # Case 2: in_planes == out_planes, stride 1  (identity residual path)
    x2 = jax.random.normal(kx2, (2, 16, 16, 8), dtype=jnp.float32)   # NHWC
    p2 = init_params(kp2, 8, 8)
    y2 = basic_block_forward(x2, p2, stride=1, equal_in_out=True)
    r2 = ref_forward(x2, p2, 1, True)

    # Case 3: standalone conv with a tiny accumulator budget to force the multi-row-tile
    # grid path (grid=(2, 4)) and check it against lax.conv.
    x3 = jax.random.normal(kx3, (2, 16, 16, 8), dtype=jnp.float32)
    w3 = jax.random.normal(kw3, (3, 3, 8, 8), jnp.float32) * 0.1
    y3 = conv2d_pallas(x3, w3, stride=1, padding=1, acc_budget_bytes=4096)
    r3 = lax.conv_general_dilated(x3, w3, (1, 1), [(1, 1), (1, 1)],
                                  dimension_numbers=("NHWC", "HWIO", "NHWC"))

    jax.block_until_ready((y1, y2, y3))
    assert y1.shape == (2, 8, 8, 8) and y2.shape == (2, 16, 16, 8)
    # bf16 MXU operands (f32 accumulate) vs. f32 reference -> loosened tolerance.
    assert jnp.allclose(y1, r1, atol=5e-2, rtol=5e-2)
    assert jnp.allclose(y2, r2, atol=5e-2, rtol=5e-2)
    assert jnp.allclose(y3, r3, atol=5e-2, rtol=5e-2)
    print("KERNEL_OK")
</pallas_src>

<mosaic_0001>
module attributes {stable_mosaic.version = 11 : i64} {
  func.func @kernel(%arg0: i32, %arg1: i32, %arg2: memref<1x342x4xbf16, #tpu.memory_space<vmem>>, %arg3: memref<3x3x4x8xbf16, #tpu.memory_space<vmem>>, %arg4: memref<1x8xf32, #tpu.memory_space<vmem>>, %arg5: memref<1x8xf32, #tpu.memory_space<vmem>>, %arg6: memref<1x256x8xbf16, #tpu.memory_space<vmem>>) attributes {dimension_semantics = [#tpu.dimension_semantics<parallel>, #tpu.dimension_semantics<parallel>], iteration_bounds = array<i64: 2, 1>, scalar_prefetch = 0 : i64, scratch_operands = 0 : i64, tpu.core_type = #tpu.core_type<tc>, window_params = [{transform_indices = @transform_0, window_bounds = array<i64: 1, 342, 4>}, {pipeline_mode = #tpu.pipeline_mode<synchronous>, transform_indices = @transform_1, window_bounds = array<i64: 3, 3, 4, 8>}, {pipeline_mode = #tpu.pipeline_mode<synchronous>, transform_indices = @transform_2, window_bounds = array<i64: 1, 8>}, {pipeline_mode = #tpu.pipeline_mode<synchronous>, transform_indices = @transform_3, window_bounds = array<i64: 1, 8>}, {transform_indices = @transform_4, window_bounds = array<i64: 1, 256, 8>}]} {
    %cst = arith.constant 0.000000e+00 : f32
    %0 = vector.broadcast %cst : f32 to vector<288x8xf32>
    %c0 = arith.constant 0 : index
    %c0_0 = arith.constant 0 : index
    %c0_1 = arith.constant 0 : index
    %1 = vector.load %arg2[%c0, %c0_0, %c0_1] : memref<1x342x4xbf16, #tpu.memory_space<vmem>>, vector<1x288x4xbf16>
    %2 = vector.shape_cast %1 : vector<1x288x4xbf16> to vector<288x4xbf16>
    %c0_2 = arith.constant 0 : index
    %c0_3 = arith.constant 0 : index
    %c0_4 = arith.constant 0 : index
    %c0_5 = arith.constant 0 : index
    %3 = vector.load %arg3[%c0_2, %c0_3, %c0_4, %c0_5] : memref<3x3x4x8xbf16, #tpu.memory_space<vmem>>, vector<1x1x4x8xbf16>
    %4 = vector.shape_cast %3 : vector<1x1x4x8xbf16> to vector<4x8xbf16>
    %cst_6 = arith.constant dense<0.000000e+00> : vector<288x8xf32>
    %5 = tpu.matmul %2, %4, %cst_6 {dimension_numbers = #tpu.dot_dimension_numbers<[1], [0], [0], [1], [0, 0, 1, 1], [], []>} : vector<288x4xbf16>, vector<4x8xbf16>, vector<288x8xf32> -> vector<288x8xf32>
    %6 = arith.addf %0, %5 : vector<288x8xf32>
    %c0_7 = arith.constant 0 : index
    %c1 = arith.constant 1 : index
    %c0_8 = arith.constant 0 : index
    %7 = vector.load %arg2[%c0_7, %c1, %c0_8] : memref<1x342x4xbf16, #tpu.memory_space<vmem>>, vector<1x288x4xbf16>
    %8 = vector.shape_cast %7 : vector<1x288x4xbf16> to vector<288x4xbf16>
    %c0_9 = arith.constant 0 : index
    %c1_10 = arith.constant 1 : index
    %c0_11 = arith.constant 0 : index
    %c0_12 = arith.constant 0 : index
    %9 = vector.load %arg3[%c0_9, %c1_10, %c0_11, %c0_12] : memref<3x3x4x8xbf16, #tpu.memory_space<vmem>>, vector<1x1x4x8xbf16>
    %10 = vector.shape_cast %9 : vector<1x1x4x8xbf16> to vector<4x8xbf16>
    %cst_13 = arith.constant dense<0.000000e+00> : vector<288x8xf32>
    %11 = tpu.matmul %8, %10, %cst_13 {dimension_numbers = #tpu.dot_dimension_numbers<[1], [0], [0], [1], [0, 0, 1, 1], [], []>} : vector<288x4xbf16>, vector<4x8xbf16>, vector<288x8xf32> -> vector<288x8xf32>
    %12 = arith.addf %6, %11 : vector<288x8xf32>
    %c0_14 = arith.constant 0 : index
    %c2 = arith.constant 2 : index
    %c0_15 = arith.constant 0 : index
    %13 = vector.load %arg2[%c0_14, %c2, %c0_15] : memref<1x342x4xbf16, #tpu.memory_space<vmem>>, vector<1x288x4xbf16>
    %14 = vector.shape_cast %13 : vector<1x288x4xbf16> to vector<288x4xbf16>
    %c0_16 = arith.constant 0 : index
    %c2_17 = arith.constant 2 : index
    %c0_18 = arith.constant 0 : index
    %c0_19 = arith.constant 0 : index
    %15 = vector.load %arg3[%c0_16, %c2_17, %c0_18, %c0_19] : memref<3x3x4x8xbf16, #tpu.memory_space<vmem>>, vector<1x1x4x8xbf16>
    %16 = vector.shape_cast %15 : vector<1x1x4x8xbf16> to vector<4x8xbf16>
    %cst_20 = arith.constant dense<0.000000e+00> : vector<288x8xf32>
    %17 = tpu.matmul %14, %16, %cst_20 {dimension_numbers = #tpu.dot_dimension_numbers<[1], [0], [0], [1], [0, 0, 1, 1], [], []>} : vector<288x4xbf16>, vector<4x8xbf16>, vector<288x8xf32> -> vector<288x8xf32>
    %18 = arith.addf %12, %17 : vector<288x8xf32>
    %c0_21 = arith.constant 0 : index
    %c18 = arith.constant 18 : index
    %c0_22 = arith.constant 0 : index
    %19 = vector.load %arg2[%c0_21, %c18, %c0_22] : memref<1x342x4xbf16, #tpu.memory_space<vmem>>, vector<1x288x4xbf16>
    %20 = vector.shape_cast %19 : vector<1x288x4xbf16> to vector<288x4xbf16>
    %c1_23 = arith.constant 1 : index
    %c0_24 = arith.constant 0 : index
    %c0_25 = arith.constant 0 : index
    %c0_26 = arith.constant 0 : index
    %21 = vector.load %arg3[%c1_23, %c0_24, %c0_25, %c0_26] : memref<3x3x4x8xbf16, #tpu.memory_space<vmem>>, vector<1x1x4x8xbf16>
    %22 = vector.shape_cast %21 : vector<1x1x4x8xbf16> to vector<4x8xbf16>
    %cst_27 = arith.constant dense<0.000000e+00> : vector<288x8xf32>
    %23 = tpu.matmul %20, %22, %cst_27 {dimension_numbers = #tpu.dot_dimension_numbers<[1], [0], [0], [1], [0, 0, 1, 1], [], []>} : vector<288x4xbf16>, vector<4x8xbf16>, vector<288x8xf32> -> vector<288x8xf32>
    %24 = arith.addf %18, %23 : vector<288x8xf32>
    %c0_28 = arith.constant 0 : index
    %c19 = arith.constant 19 : index
    %c0_29 = arith.constant 0 : index
    %25 = vector.load %arg2[%c0_28, %c19, %c0_29] : memref<1x342x4xbf16, #tpu.memory_space<vmem>>, vector<1x288x4xbf16>
    %26 = vector.shape_cast %25 : vector<1x288x4xbf16> to vector<288x4xbf16>
    %c1_30 = arith.constant 1 : index
    %c1_31 = arith.constant 1 : index
    %c0_32 = arith.constant 0 : index
    %c0_33 = arith.constant 0 : index
    %27 = vector.load %arg3[%c1_30, %c1_31, %c0_32, %c0_33] : memref<3x3x4x8xbf16, #tpu.memory_space<vmem>>, vector<1x1x4x8xbf16>
    %28 = vector.shape_cast %27 : vector<1x1x4x8xbf16> to vector<4x8xbf16>
    %cst_34 = arith.constant dense<0.000000e+00> : vector<288x8xf32>
    %29 = tpu.matmul %26, %28, %cst_34 {dimension_numbers = #tpu.dot_dimension_numbers<[1], [0], [0], [1], [0, 0, 1, 1], [], []>} : vector<288x4xbf16>, vector<4x8xbf16>, vector<288x8xf32> -> vector<288x8xf32>
    %30 = arith.addf %24, %29 : vector<288x8xf32>
    %c0_35 = arith.constant 0 : index
    %c20 = arith.constant 20 : index
    %c0_36 = arith.constant 0 : index
    %31 = vector.load %arg2[%c0_35, %c20, %c0_36] : memref<1x342x4xbf16, #tpu.memory_space<vmem>>, vector<1x288x4xbf16>
    %32 = vector.shape_cast %31 : vector<1x288x4xbf16> to vector<288x4xbf16>
    %c1_37 = arith.constant 1 : index
    %c2_38 = arith.constant 2 : index
    %c0_39 = arith.constant 0 : index
    %c0_40 = arith.constant 0 : index
    %33 = vector.load %arg3[%c1_37, %c2_38, %c0_39, %c0_40] : memref<3x3x4x8xbf16, #tpu.memory_space<vmem>>, vector<1x1x4x8xbf16>
    %34 = vector.shape_cast %33 : vector<1x1x4x8xbf16> to vector<4x8xbf16>
    %cst_41 = arith.constant dense<0.000000e+00> : vector<288x8xf32>
    %35 = tpu.matmul %32, %34, %cst_41 {dimension_numbers = #tpu.dot_dimension_numbers<[1], [0], [0], [1], [0, 0, 1, 1], [], []>} : vector<288x4xbf16>, vector<4x8xbf16>, vector<288x8xf32> -> vector<288x8xf32>
    %36 = arith.addf %30, %35 : vector<288x8xf32>
    %c0_42 = arith.constant 0 : index
    %c36 = arith.constant 36 : index
    %c0_43 = arith.constant 0 : index
    %37 = vector.load %arg2[%c0_42, %c36, %c0_43] : memref<1x342x4xbf16, #tpu.memory_space<vmem>>, vector<1x288x4xbf16>
    %38 = vector.shape_cast %37 : vector<1x288x4xbf16> to vector<288x4xbf16>
    %c2_44 = arith.constant 2 : index
    %c0_45 = arith.constant 0 : index
    %c0_46 = arith.constant 0 : index
    %c0_47 = arith.constant 0 : index
    %39 = vector.load %arg3[%c2_44, %c0_45, %c0_46, %c0_47] : memref<3x3x4x8xbf16, #tpu.memory_space<vmem>>, vector<1x1x4x8xbf16>
    %40 = vector.shape_cast %39 : vector<1x1x4x8xbf16> to vector<4x8xbf16>
    %cst_48 = arith.constant dense<0.000000e+00> : vector<288x8xf32>
    %41 = tpu.matmul %38, %40, %cst_48 {dimension_numbers = #tpu.dot_dimension_numbers<[1], [0], [0], [1], [0, 0, 1, 1], [], []>} : vector<288x4xbf16>, vector<4x8xbf16>, vector<288x8xf32> -> vector<288x8xf32>
    %42 = arith.addf %36, %41 : vector<288x8xf32>
    %c0_49 = arith.constant 0 : index
    %c37 = arith.constant 37 : index
    %c0_50 = arith.constant 0 : index
    %43 = vector.load %arg2[%c0_49, %c37, %c0_50] : memref<1x342x4xbf16, #tpu.memory_space<vmem>>, vector<1x288x4xbf16>
    %44 = vector.shape_cast %43 : vector<1x288x4xbf16> to vector<288x4xbf16>
    %c2_51 = arith.constant 2 : index
    %c1_52 = arith.constant 1 : index
    %c0_53 = arith.constant 0 : index
    %c0_54 = arith.constant 0 : index
    %45 = vector.load %arg3[%c2_51, %c1_52, %c0_53, %c0_54] : memref<3x3x4x8xbf16, #tpu.memory_space<vmem>>, vector<1x1x4x8xbf16>
    %46 = vector.shape_cast %45 : vector<1x1x4x8xbf16> to vector<4x8xbf16>
    %cst_55 = arith.constant dense<0.000000e+00> : vector<288x8xf32>
    %47 = tpu.matmul %44, %46, %cst_55 {dimension_numbers = #tpu.dot_dimension_numbers<[1], [0], [0], [1], [0, 0, 1, 1], [], []>} : vector<288x4xbf16>, vector<4x8xbf16>, vector<288x8xf32> -> vector<288x8xf32>
    %48 = arith.addf %42, %47 : vector<288x8xf32>
    %c0_56 = arith.constant 0 : index
    %c38 = arith.constant 38 : index
    %c0_57 = arith.constant 0 : index
    %49 = vector.load %arg2[%c0_56, %c38, %c0_57] : memref<1x342x4xbf16, #tpu.memory_space<vmem>>, vector<1x288x4xbf16>
    %50 = vector.shape_cast %49 : vector<1x288x4xbf16> to vector<288x4xbf16>
    %c2_58 = arith.constant 2 : index
    %c2_59 = arith.constant 2 : index
    %c0_60 = arith.constant 0 : index
    %c0_61 = arith.constant 0 : index
    %51 = vector.load %arg3[%c2_58, %c2_59, %c0_60, %c0_61] : memref<3x3x4x8xbf16, #tpu.memory_space<vmem>>, vector<1x1x4x8xbf16>
    %52 = vector.shape_cast %51 : vector<1x1x4x8xbf16> to vector<4x8xbf16>
    %cst_62 = arith.constant dense<0.000000e+00> : vector<288x8xf32>
    %53 = tpu.matmul %50, %52, %cst_62 {dimension_numbers = #tpu.dot_dimension_numbers<[1], [0], [0], [1], [0, 0, 1, 1], [], []>} : vector<288x4xbf16>, vector<4x8xbf16>, vector<288x8xf32> -> vector<288x8xf32>
    %54 = arith.addf %48, %53 : vector<288x8xf32>
    %55 = vector.shape_cast %54 : vector<288x8xf32> to vector<16x18x8xf32>
    %56 = vector.extract_strided_slice %55 {offsets = [0, 0, 0], sizes = [16, 16, 8], strides = [1, 1, 1]} : vector<16x18x8xf32> to vector<16x16x8xf32>
    %57 = vector.shape_cast %56 : vector<16x16x8xf32> to vector<256x8xf32>
    %c0_63 = arith.constant 0 : index
    %c0_64 = arith.constant 0 : index
    %58 = vector.load %arg4[%c0_63, %c0_64] : memref<1x8xf32, #tpu.memory_space<vmem>>, vector<1x8xf32>
    %59 = vector.broadcast %58 : vector<1x8xf32> to vector<256x8xf32>
    %60 = arith.mulf %57, %59 : vector<256x8xf32>
    %c0_65 = arith.constant 0 : index
    %c0_66 = arith.constant 0 : index
    %61 = vector.load %arg5[%c0_65, %c0_66] : memref<1x8xf32, #tpu.memory_space<vmem>>, vector<1x8xf32>
    %62 = vector.broadcast %61 : vector<1x8xf32> to vector<256x8xf32>
    %63 = arith.addf %60, %62 : vector<256x8xf32>
    %cst_67 = arith.constant 0.000000e+00 : f32
    %64 = vector.broadcast %cst_67 : f32 to vector<256x8xf32>
    %65 = arith.maximumf %63, %64 : vector<256x8xf32>
    %66 = arith.truncf %65 : vector<256x8xf32> to vector<256x8xbf16>
    %c0_68 = arith.constant 0 : index
    %c0_69 = arith.constant 0 : index
    %c0_70 = arith.constant 0 : index
    %67 = vector.load %arg6[%c0_68, %c0_69, %c0_70] : memref<1x256x8xbf16, #tpu.memory_space<vmem>>, vector<1x256x8xbf16>
    %68 = vector.shape_cast %67 : vector<1x256x8xbf16> to vector<256x8xbf16>
    %69 = vector.shape_cast %66 : vector<256x8xbf16> to vector<1x256x8xbf16>
    tpu.vector_store %arg6[%c0_68, %c0_69, %c0_70], %69 {strides = array<i32>} : memref<1x256x8xbf16, #tpu.memory_space<vmem>>, vector<1x256x8xbf16>,
    return
  }
  func.func @transform_0(%arg0: i32, %arg1: i32) -> (i32, i32, i32) {
    %c0_i32 = arith.constant 0 : i32
    %c0_i32_0 = arith.constant 0 : i32
    %c0_i32_1 = arith.constant 0 : i32
    return %arg0, %c0_i32, %c0_i32_0 : i32, i32, i32
  }
  func.func @transform_1(%arg0: i32, %arg1: i32) -> (i32, i32, i32, i32) {
    %c0_i32 = arith.constant 0 : i32
    %c0_i32_0 = arith.constant 0 : i32
    %c0_i32_1 = arith.constant 0 : i32
    %c0_i32_2 = arith.constant 0 : i32
    %c0_i32_3 = arith.constant 0 : i32
    return %c0_i32, %c0_i32_0, %c0_i32_1, %c0_i32_2 : i32, i32, i32, i32
  }
  func.func @transform_2(%arg0: i32, %arg1: i32) -> (i32, i32) {
    %c0_i32 = arith.constant 0 : i32
    %c0_i32_0 = arith.constant 0 : i32
    %c0_i32_1 = arith.constant 0 : i32
    return %c0_i32, %c0_i32_0 : i32, i32
  }
  func.func @transform_3(%arg0: i32, %arg1: i32) -> (i32, i32) {
    %c0_i32 = arith.constant 0 : i32
    %c0_i32_0 = arith.constant 0 : i32
    %c0_i32_1 = arith.constant 0 : i32
    return %c0_i32, %c0_i32_0 : i32, i32
  }
  func.func @transform_4(%arg0: i32, %arg1: i32) -> (i32, i32, i32) {
    %c0_i32 = arith.constant 0 : i32
    %c0_i32_0 = arith.constant 0 : i32
    return %arg0, %arg1, %c0_i32 : i32, i32, i32
  }
}

module attributes {stable_mosaic.version = 11 : i64} {
  func.func @kernel(%arg0: i32, %arg1: i32, %arg2: memref<1x64x4xbf16, #tpu.memory_space<vmem>>, %arg3: memref<1x1x4x8xbf16, #tpu.memory_space<vmem>>, %arg4: memref<1x64x8xf32, #tpu.memory_space<vmem>>) attributes {dimension_semantics = [#tpu.dimension_semantics<parallel>, #tpu.dimension_semantics<parallel>], iteration_bounds = array<i64: 2, 1>, scalar_prefetch = 0 : i64, scratch_operands = 0 : i64, tpu.core_type = #tpu.core_type<tc>, window_params = [{transform_indices = @transform_0, window_bounds = array<i64: 1, 64, 4>}, {pipeline_mode = #tpu.pipeline_mode<synchronous>, transform_indices = @transform_1, window_bounds = array<i64: 1, 1, 4, 8>}, {transform_indices = @transform_2, window_bounds = array<i64: 1, 64, 8>}]} {
    %cst = arith.constant 0.000000e+00 : f32
    %0 = vector.broadcast %cst : f32 to vector<64x8xf32>
    %c0 = arith.constant 0 : index
    %c0_0 = arith.constant 0 : index
    %c0_1 = arith.constant 0 : index
    %1 = vector.load %arg2[%c0, %c0_0, %c0_1] : memref<1x64x4xbf16, #tpu.memory_space<vmem>>, vector<1x64x4xbf16>
    %2 = vector.shape_cast %1 : vector<1x64x4xbf16> to vector<64x4xbf16>
    %c0_2 = arith.constant 0 : index
    %c0_3 = arith.constant 0 : index
    %c0_4 = arith.constant 0 : index
    %c0_5 = arith.constant 0 : index
    %3 = vector.load %arg3[%c0_2, %c0_3, %c0_4, %c0_5] : memref<1x1x4x8xbf16, #tpu.memory_space<vmem>>, vector<1x1x4x8xbf16>
    %4 = vector.shape_cast %3 : vector<1x1x4x8xbf16> to vector<4x8xbf16>
    %cst_6 = arith.constant dense<0.000000e+00> : vector<64x8xf32>
    %5 = tpu.matmul %2, %4, %cst_6 {dimension_numbers = #tpu.dot_dimension_numbers<[1], [0], [0], [1], [0, 0, 1, 1], [], []>} : vector<64x4xbf16>, vector<4x8xbf16>, vector<64x8xf32> -> vector<64x8xf32>
    %6 = arith.addf %0, %5 : vector<64x8xf32>
    %c0_7 = arith.constant 0 : index
    %c0_8 = arith.constant 0 : index
    %c0_9 = arith.constant 0 : index
    %7 = vector.load %arg4[%c0_7, %c0_8, %c0_9] : memref<1x64x8xf32, #tpu.memory_space<vmem>>, vector<1x64x8xf32>
    %8 = vector.shape_cast %7 : vector<1x64x8xf32> to vector<64x8xf32>
    %9 = vector.shape_cast %6 : vector<64x8xf32> to vector<1x64x8xf32>
    tpu.vector_store %arg4[%c0_7, %c0_8, %c0_9], %9 {strides = array<i32>} : memref<1x64x8xf32, #tpu.memory_space<vmem>>, vector<1x64x8xf32>,
    return
  }
  func.func @transform_0(%arg0: i32, %arg1: i32) -> (i32, i32, i32) {
    %c0_i32 = arith.constant 0 : i32
    %c0_i32_0 = arith.constant 0 : i32
    %c0_i32_1 = arith.constant 0 : i32
    return %arg0, %c0_i32, %c0_i32_0 : i32, i32, i32
  }
  func.func @transform_1(%arg0: i32, %arg1: i32) -> (i32, i32, i32, i32) {
    %c0_i32 = arith.constant 0 : i32
    %c0_i32_0 = arith.constant 0 : i32
    %c0_i32_1 = arith.constant 0 : i32
    %c0_i32_2 = arith.constant 0 : i32
    %c0_i32_3 = arith.constant 0 : i32
    return %c0_i32, %c0_i32_0, %c0_i32_1, %c0_i32_2 : i32, i32, i32, i32
  }
  func.func @transform_2(%arg0: i32, %arg1: i32) -> (i32, i32, i32) {
    %c0_i32 = arith.constant 0 : i32
    %c0_i32_0 = arith.constant 0 : i32
    return %arg0, %arg1, %c0_i32 : i32, i32, i32
  }
}

module attributes {stable_mosaic.version = 11 : i64} {
  func.func @kernel(%arg0: i32, %arg1: i32, %arg2: memref<1x360x8xbf16, #tpu.memory_space<vmem>>, %arg3: memref<3x3x8x8xbf16, #tpu.memory_space<vmem>>, %arg4: memref<1x64x8xf32, #tpu.memory_space<vmem>>, %arg5: memref<1x64x8xf32, #tpu.memory_space<vmem>>) attributes {dimension_semantics = [#tpu.dimension_semantics<parallel>, #tpu.dimension_semantics<parallel>], iteration_bounds = array<i64: 2, 1>, scalar_prefetch = 0 : i64, scratch_operands = 0 : i64, tpu.core_type = #tpu.core_type<tc>, window_params = [{transform_indices = @transform_0, window_bounds = array<i64: 1, 360, 8>}, {pipeline_mode = #tpu.pipeline_mode<synchronous>, transform_indices = @transform_1, window_bounds = array<i64: 3, 3, 8, 8>}, {transform_indices = @transform_2, window_bounds = array<i64: 1, 64, 8>}, {transform_indices = @transform_3, window_bounds = array<i64: 1, 64, 8>}]} {
    %cst = arith.constant 0.000000e+00 : f32
    %0 = vector.broadcast %cst : f32 to vector<72x8xf32>
    %c0 = arith.constant 0 : index
    %c0_0 = arith.constant 0 : index
    %c0_1 = arith.constant 0 : index
    %1 = vector.load %arg2[%c0, %c0_0, %c0_1] : memref<1x360x8xbf16, #tpu.memory_space<vmem>>, vector<1x72x8xbf16>
    %2 = vector.shape_cast %1 : vector<1x72x8xbf16> to vector<72x8xbf16>
    %c0_2 = arith.constant 0 : index
    %c0_3 = arith.constant 0 : index
    %c0_4 = arith.constant 0 : index
    %c0_5 = arith.constant 0 : index
    %3 = vector.load %arg3[%c0_2, %c0_3, %c0_4, %c0_5] : memref<3x3x8x8xbf16, #tpu.memory_space<vmem>>, vector<1x1x8x8xbf16>
    %4 = vector.shape_cast %3 : vector<1x1x8x8xbf16> to vector<8x8xbf16>
    %cst_6 = arith.constant dense<0.000000e+00> : vector<72x8xf32>
    %5 = tpu.matmul %2, %4, %cst_6 {dimension_numbers = #tpu.dot_dimension_numbers<[1], [0], [0], [1], [0, 0, 1, 1], [], []>} : vector<72x8xbf16>, vector<8x8xbf16>, vector<72x8xf32> -> vector<72x8xf32>
    %6 = arith.addf %0, %5 : vector<72x8xf32>
    %c0_7 = arith.constant 0 : index
    %c90 = arith.constant 90 : index
    %c0_8 = arith.constant 0 : index
    %7 = vector.load %arg2[%c0_7, %c90, %c0_8] : memref<1x360x8xbf16, #tpu.memory_space<vmem>>, vector<1x72x8xbf16>
    %8 = vector.shape_cast %7 : vector<1x72x8xbf16> to vector<72x8xbf16>
    %c0_9 = arith.constant 0 : index
    %c1 = arith.constant 1 : index
    %c0_10 = arith.constant 0 : index
    %c0_11 = arith.constant 0 : index
    %9 = vector.load %arg3[%c0_9, %c1, %c0_10, %c0_11] : memref<3x3x8x8xbf16, #tpu.memory_space<vmem>>, vector<1x1x8x8xbf16>
    %10 = vector.shape_cast %9 : vector<1x1x8x8xbf16> to vector<8x8xbf16>
    %cst_12 = arith.constant dense<0.000000e+00> : vector<72x8xf32>
    %11 = tpu.matmul %8, %10, %cst_12 {dimension_numbers = #tpu.dot_dimension_numbers<[1], [0], [0], [1], [0, 0, 1, 1], [], []>} : vector<72x8xbf16>, vector<8x8xbf16>, vector<72x8xf32> -> vector<72x8xf32>
    %12 = arith.addf %6, %11 : vector<72x8xf32>
    %c0_13 = arith.constant 0 : index
    %c1_14 = arith.constant 1 : index
    %c0_15 = arith.constant 0 : index
    %13 = vector.load %arg2[%c0_13, %c1_14, %c0_15] : memref<1x360x8xbf16, #tpu.memory_space<vmem>>, vector<1x72x8xbf16>
    %14 = vector.shape_cast %13 : vector<1x72x8xbf16> to vector<72x8xbf16>
    %c0_16 = arith.constant 0 : index
    %c2 = arith.constant 2 : index
    %c0_17 = arith.constant 0 : index
    %c0_18 = arith.constant 0 : index
    %15 = vector.load %arg3[%c0_16, %c2, %c0_17, %c0_18] : memref<3x3x8x8xbf16, #tpu.memory_space<vmem>>, vector<1x1x8x8xbf16>
    %16 = vector.shape_cast %15 : vector<1x1x8x8xbf16> to vector<8x8xbf16>
    %cst_19 = arith.constant dense<0.000000e+00> : vector<72x8xf32>
    %17 = tpu.matmul %14, %16, %cst_19 {dimension_numbers = #tpu.dot_dimension_numbers<[1], [0], [0], [1], [0, 0, 1, 1], [], []>} : vector<72x8xbf16>, vector<8x8xbf16>, vector<72x8xf32> -> vector<72x8xf32>
    %18 = arith.addf %12, %17 : vector<72x8xf32>
    %c0_20 = arith.constant 0 : index
    %c180 = arith.constant 180 : index
    %c0_21 = arith.constant 0 : index
    %19 = vector.load %arg2[%c0_20, %c180, %c0_21] : memref<1x360x8xbf16, #tpu.memory_space<vmem>>, vector<1x72x8xbf16>
    %20 = vector.shape_cast %19 : vector<1x72x8xbf16> to vector<72x8xbf16>
    %c1_22 = arith.constant 1 : index
    %c0_23 = arith.constant 0 : index
    %c0_24 = arith.constant 0 : index
    %c0_25 = arith.constant 0 : index
    %21 = vector.load %arg3[%c1_22, %c0_23, %c0_24, %c0_25] : memref<3x3x8x8xbf16, #tpu.memory_space<vmem>>, vector<1x1x8x8xbf16>
    %22 = vector.shape_cast %21 : vector<1x1x8x8xbf16> to vector<8x8xbf16>
    %cst_26 = arith.constant dense<0.000000e+00> : vector<72x8xf32>
    %23 = tpu.matmul %20, %22, %cst_26 {dimension_numbers = #tpu.dot_dimension_numbers<[1], [0], [0], [1], [0, 0, 1, 1], [], []>} : vector<72x8xbf16>, vector<8x8xbf16>, vector<72x8xf32> -> vector<72x8xf32>
    %24 = arith.addf %18, %23 : vector<72x8xf32>
    %c0_27 = arith.constant 0 : index
    %c270 = arith.constant 270 : index
    %c0_28 = arith.constant 0 : index
    %25 = vector.load %arg2[%c0_27, %c270, %c0_28] : memref<1x360x8xbf16, #tpu.memory_space<vmem>>, vector<1x72x8xbf16>
    %26 = vector.shape_cast %25 : vector<1x72x8xbf16> to vector<72x8xbf16>
    %c1_29 = arith.constant 1 : index
    %c1_30 = arith.constant 1 : index
    %c0_31 = arith.constant 0 : index
    %c0_32 = arith.constant 0 : index
    %27 = vector.load %arg3[%c1_29, %c1_30, %c0_31, %c0_32] : memref<3x3x8x8xbf16, #tpu.memory_space<vmem>>, vector<1x1x8x8xbf16>
    %28 = vector.shape_cast %27 : vector<1x1x8x8xbf16> to vector<8x8xbf16>
    %cst_33 = arith.constant dense<0.000000e+00> : vector<72x8xf32>
    %29 = tpu.matmul %26, %28, %cst_33 {dimension_numbers = #tpu.dot_dimension_numbers<[1], [0], [0], [1], [0, 0, 1, 1], [], []>} : vector<72x8xbf16>, vector<8x8xbf16>, vector<72x8xf32> -> vector<72x8xf32>
    %30 = arith.addf %24, %29 : vector<72x8xf32>
    %c0_34 = arith.constant 0 : index
    %c181 = arith.constant 181 : index
    %c0_35 = arith.constant 0 : index
    %31 = vector.load %arg2[%c0_34, %c181, %c0_35] : memref<1x360x8xbf16, #tpu.memory_space<vmem>>, vector<1x72x8xbf16>
    %32 = vector.shape_cast %31 : vector<1x72x8xbf16> to vector<72x8xbf16>
    %c1_36 = arith.constant 1 : index
    %c2_37 = arith.constant 2 : index
    %c0_38 = arith.constant 0 : index
    %c0_39 = arith.constant 0 : index
    %33 = vector.load %arg3[%c1_36, %c2_37, %c0_38, %c0_39] : memref<3x3x8x8xbf16, #tpu.memory_space<vmem>>, vector<1x1x8x8xbf16>
    %34 = vector.shape_cast %33 : vector<1x1x8x8xbf16> to vector<8x8xbf16>
    %cst_40 = arith.constant dense<0.000000e+00> : vector<72x8xf32>
    %35 = tpu.matmul %32, %34, %cst_40 {dimension_numbers = #tpu.dot_dimension_numbers<[1], [0], [0], [1], [0, 0, 1, 1], [], []>} : vector<72x8xbf16>, vector<8x8xbf16>, vector<72x8xf32> -> vector<72x8xf32>
    %36 = arith.addf %30, %35 : vector<72x8xf32>
    %c0_41 = arith.constant 0 : index
    %c9 = arith.constant 9 : index
    %c0_42 = arith.constant 0 : index
    %37 = vector.load %arg2[%c0_41, %c9, %c0_42] : memref<1x360x8xbf16, #tpu.memory_space<vmem>>, vector<1x72x8xbf16>
    %38 = vector.shape_cast %37 : vector<1x72x8xbf16> to vector<72x8xbf16>
    %c2_43 = arith.constant 2 : index
    %c0_44 = arith.constant 0 : index
    %c0_45 = arith.constant 0 : index
    %c0_46 = arith.constant 0 : index
    %39 = vector.load %arg3[%c2_43, %c0_44, %c0_45, %c0_46] : memref<3x3x8x8xbf16, #tpu.memory_space<vmem>>, vector<1x1x8x8xbf16>
    %40 = vector.shape_cast %39 : vector<1x1x8x8xbf16> to vector<8x8xbf16>
    %cst_47 = arith.constant dense<0.000000e+00> : vector<72x8xf32>
    %41 = tpu.matmul %38, %40, %cst_47 {dimension_numbers = #tpu.dot_dimension_numbers<[1], [0], [0], [1], [0, 0, 1, 1], [], []>} : vector<72x8xbf16>, vector<8x8xbf16>, vector<72x8xf32> -> vector<72x8xf32>
    %42 = arith.addf %36, %41 : vector<72x8xf32>
    %c0_48 = arith.constant 0 : index
    %c99 = arith.constant 99 : index
    %c0_49 = arith.constant 0 : index
    %43 = vector.load %arg2[%c0_48, %c99, %c0_49] : memref<1x360x8xbf16, #tpu.memory_space<vmem>>, vector<1x72x8xbf16>
    %44 = vector.shape_cast %43 : vector<1x72x8xbf16> to vector<72x8xbf16>
    %c2_50 = arith.constant 2 : index
    %c1_51 = arith.constant 1 : index
    %c0_52 = arith.constant 0 : index
    %c0_53 = arith.constant 0 : index
    %45 = vector.load %arg3[%c2_50, %c1_51, %c0_52, %c0_53] : memref<3x3x8x8xbf16, #tpu.memory_space<vmem>>, vector<1x1x8x8xbf16>
    %46 = vector.shape_cast %45 : vector<1x1x8x8xbf16> to vector<8x8xbf16>
    %cst_54 = arith.constant dense<0.000000e+00> : vector<72x8xf32>
    %47 = tpu.matmul %44, %46, %cst_54 {dimension_numbers = #tpu.dot_dimension_numbers<[1], [0], [0], [1], [0, 0, 1, 1], [], []>} : vector<72x8xbf16>, vector<8x8xbf16>, vector<72x8xf32> -> vector<72x8xf32>
    %48 = arith.addf %42, %47 : vector<72x8xf32>
    %c0_55 = arith.constant 0 : index
    %c10 = arith.constant 10 : index
    %c0_56 = arith.constant 0 : index
    %49 = vector.load %arg2[%c0_55, %c10, %c0_56] : memref<1x360x8xbf16, #tpu.memory_space<vmem>>, vector<1x72x8xbf16>
    %50 = vector.shape_cast %49 : vector<1x72x8xbf16> to vector<72x8xbf16>
    %c2_57 = arith.constant 2 : index
    %c2_58 = arith.constant 2 : index
    %c0_59 = arith.constant 0 : index
    %c0_60 = arith.constant 0 : index
    %51 = vector.load %arg3[%c2_57, %c2_58, %c0_59, %c0_60] : memref<3x3x8x8xbf16, #tpu.memory_space<vmem>>, vector<1x1x8x8xbf16>
    %52 = vector.shape_cast %51 : vector<1x1x8x8xbf16> to vector<8x8xbf16>
    %cst_61 = arith.constant dense<0.000000e+00> : vector<72x8xf32>
    %53 = tpu.matmul %50, %52, %cst_61 {dimension_numbers = #tpu.dot_dimension_numbers<[1], [0], [0], [1], [0, 0, 1, 1], [], []>} : vector<72x8xbf16>, vector<8x8xbf16>, vector<72x8xf32> -> vector<72x8xf32>
    %54 = arith.addf %48, %53 : vector<72x8xf32>
    %55 = vector.shape_cast %54 : vector<72x8xf32> to vector<8x9x8xf32>
    %56 = vector.extract_strided_slice %55 {offsets = [0, 0, 0], sizes = [8, 8, 8], strides = [1, 1, 1]} : vector<8x9x8xf32> to vector<8x8x8xf32>
    %57 = vector.shape_cast %56 : vector<8x8x8xf32> to vector<64x8xf32>
    %c0_62 = arith.constant 0 : index
    %c0_63 = arith.constant 0 : index
    %c0_64 = arith.constant 0 : index
    %58 = vector.load %arg4[%c0_62, %c0_63, %c0_64] : memref<1x64x8xf32, #tpu.memory_space<vmem>>, vector<1x64x8xf32>
    %59 = vector.shape_cast %58 : vector<1x64x8xf32> to vector<64x8xf32>
    %60 = arith.addf %57, %59 : vector<64x8xf32>
    %c0_65 = arith.constant 0 : index
    %c0_66 = arith.constant 0 : index
    %c0_67 = arith.constant 0 : index
    %61 = vector.load %arg5[%c0_65, %c0_66, %c0_67] : memref<1x64x8xf32, #tpu.memory_space<vmem>>, vector<1x64x8xf32>
    %62 = vector.shape_cast %61 : vector<1x64x8xf32> to vector<64x8xf32>
    %63 = vector.shape_cast %60 : vector<64x8xf32> to vector<1x64x8xf32>
    tpu.vector_store %arg5[%c0_65, %c0_66, %c0_67], %63 {strides = array<i32>} : memref<1x64x8xf32, #tpu.memory_space<vmem>>, vector<1x64x8xf32>,
    return
  }
  func.func @transform_0(%arg0: i32, %arg1: i32) -> (i32, i32, i32) {
    %c0_i32 = arith.constant 0 : i32
    %c0_i32_0 = arith.constant 0 : i32
    %c0_i32_1 = arith.constant 0 : i32
    return %arg0, %c0_i32, %c0_i32_0 : i32, i32, i32
  }
  func.func @transform_1(%arg0: i32, %arg1: i32) -> (i32, i32, i32, i32) {
    %c0_i32 = arith.constant 0 : i32
    %c0_i32_0 = arith.constant 0 : i32
    %c0_i32_1 = arith.constant 0 : i32
    %c0_i32_2 = arith.constant 0 : i32
    %c0_i32_3 = arith.constant 0 : i32
    return %c0_i32, %c0_i32_0, %c0_i32_1, %c0_i32_2 : i32, i32, i32, i32
  }
  func.func @transform_2(%arg0: i32, %arg1: i32) -> (i32, i32, i32) {
    %c0_i32 = arith.constant 0 : i32
    %c0_i32_0 = arith.constant 0 : i32
    return %arg0, %arg1, %c0_i32 : i32, i32, i32
  }
  func.func @transform_3(%arg0: i32, %arg1: i32) -> (i32, i32, i32) {
    %c0_i32 = arith.constant 0 : i32
    %c0_i32_0 = arith.constant 0 : i32
    return %arg0, %arg1, %c0_i32 : i32, i32, i32
  }
}

</mosaic_0001>

<bundles_post_ra>
// kernel: basic_block_forward.4
= control target key start
LH: loop header
LB: loop body
LE: loop exit
PB: predicated region body
PF: predicated region fallthrough
CT: control target
= control target key end

     0   :  { %s476_s9 = smov 0   ;;  %s478_s10 = smov 0   ;;  %s520_s0 = inlined_call_operand.vmem [shape: bf16[2,64,4], index: 0, kind: input, shape index: {}]   ;;  %s521_s1 = inlined_call_operand.vmem [shape: bf16[1,1,4,8], index: 1, kind: input, shape index: {}]   ;;  %s522_s2 = inlined_call_operand.vmem [shape: f32[2,64,8], index: 2, kind: output, shape index: {}]  }
   0x1   :  { %s480_s11 = smov 0  }
   0x2 LB: > { %s24_s12 = sadd.s32 1, %s455_s10  ;;  %p373_p0 = scmp.ge.s32.totalorder %s459_s11, 1  ;;  %s459_s11 = sphi %s480_s11, %s12_s11   ;;  %s455_s10 = sphi %s478_s10, %s524_s10   ;;  %s451_s9 = sphi %s476_s9, %s523_s9  }
   0x3   : > { %p26_p1 = scmp.ge.s32.totalorder %s24_s12, 2  ;;  %p126_p2 = scmp.lt.s32.totalorder %s459_s11, 3 }
   0x5   : > { %s526_s12 = smov (%p26_p1, %s24_s12), 0  ;;  %p127_p3 = pnand %p373_p0, %p126_p2 }
   0x6   : > { %v176_v0 = vld [vmem:[%s521_s1] sm:$0x3] (!%p127_p3)  ;;  %vm210_vm0 = vcmask (!%p127_p3), 1041408   ;;  %p152_p4 = scmp.lt.s32.totalorder (!%p127_p3), %s451_s9, 1  ;;  %vm197_vm1 = vcmask (!%p127_p3), 31744   ;;  %vm279_vm2 = vcmask (!%p127_p3), 64512  }
   0x7   : > { %130 = sbr.rel (%p127_p3) target bundleno = 235 (0xeb), region = 28  ;;  %407 = vmatprep.subr.msk.bf16.mxu0 (!%p127_p3), %vm210_vm0, %v176_v0  ;;  %408 = vmatprep.subr.msk.bf16.mxu1 (!%p127_p3), %vm210_vm0, %v176_v0  ;;  %v212_v1 = vsel (!%p127_p3), %vm210_vm0, %v176_v0, 0 }
   0x8   : > { %396 = vmatpush3.bf16.msra.mxu0 (!%p127_p3), %v212_v1  ;;  %406 = vmatpush3.bf16.msra.mxu1 (!%p127_p3), %v212_v1 }
   0xe   : > { %s528_s9 = smov (!%p152_p4, %s451_s9), 1 }
   0xf   : > { %s388_s15 = sshll.u32 %s528_s9, 5  ;;  %s389_s19 = sshll.u32 %s528_s9, 6 }
  0x10   : > { %s156_s18 = scalar_lea.vmem %s520_s0, %s388_s15  ;;  %s165_s22 = scalar_lea.vmem %s522_s2, %s389_s19 }
  0x11   : > { %v433_v2 = vld [vmem:[%s156_s18] sm:$0xff]   ;;  %v434_v3 = vld [vmem:[%s156_s18 + $0x10] sm:$0xff]   ;;  %v435_v4 = vld [vmem:[%s156_s18 + $0x8] sm:$0xff]  }
  0x12   : > { %397 = vmatprep.mubr.msk.bf16.mxu0 %vm197_vm1, %v433_v2  ;;  %401 = vmatprep.mubr.msk.bf16.mxu1 %vm197_vm1, %v434_v3  ;;  %v436_v5 = vld [vmem:[%s156_s18 + $0x18] sm:$0xff]  }
  0x13   : > { %398 = vmatmul.mubr.msk.bf16.vlgmr.msra.gmra.mrb[0].mxu0 %vm197_vm1, %v435_v4  ;;  %402 = vmatmul.mubr.msk.bf16.vlgmr.msra.gmra.mrb[0].mxu1 %vm197_vm1, %v436_v5 }
  0xe6   : > { %v399_v6 = vpop.f32.mrb[0].mxu0  ;;  %v403_v7 = vpop.f32.mrb[0].mxu1 }
  0xe7   : > { %282 = vst.msk [vmem:[%s165_s22 + $0x10] sm:$0xff] %vm279_vm2, %v399_v6  ;;  %v248_v8 = vpop.f32.mrb[1].mxu0  ;;  %286 = vst.msk [vmem:[%s165_s22 + $0x30] sm:$0xff] %vm279_vm2, %v403_v7  ;;  %v264_v9 = vpop.f32.mrb[1].mxu1 }
  0xe8   : > { %280 = vst.msk [vmem:[%s165_s22] sm:$0xff] %vm279_vm2, %v248_v8  ;;  %v400_v10 = vpop.f32.mrb[2].mxu0  ;;  %284 = vst.msk [vmem:[%s165_s22 + $0x20] sm:$0xff] %vm279_vm2, %v264_v9  ;;  %v404_v11 = vpop.f32.mrb[2].mxu1 }
  0xe9   : > { %283 = vst.msk [vmem:[%s165_s22 + $0x18] sm:$0xff] %vm279_vm2, %v400_v10  ;;  %v251_v12 = vpop.f32.mrb[3].mxu0  ;;  %287 = vst.msk [vmem:[%s165_s22 + $0x38] sm:$0xff] %vm279_vm2, %v404_v11  ;;  %v267_v13 = vpop.f32.mrb[3].mxu1 }
  0xea   : > { %281 = vst.msk [vmem:[%s165_s22 + $0x8] sm:$0xff] %vm279_vm2, %v251_v12  ;;  %285 = vst.msk [vmem:[%s165_s22 + $0x28] sm:$0xff] %vm279_vm2, %v267_v13 }
  0xeb PF: > { %s12_s11 = sadd.s32 1, %s459_s11   ;;  %s523_s9 = smov %s455_s10 }
  0xec   : > { %p9_p5 = scmp.ge.s32.totalorder %s12_s11, 4   ;;  %s524_s10 = smov %s526_s12 }
  0xee   :  { %11 = sbr.rel (!%p9_p5) target bundleno = 2 (0x2), region = 58 }

// kernel: basic_block_forward.3
= control target key start
LH: loop header
LB: loop body
LE: loop exit
PB: predicated region body
PF: predicated region fallthrough
CT: control target
= control target key end

     0   :  { %s7093_s15 = smov 0   ;;  %s7095_s16 = smov 0   ;;  %s8684_s0 = inlined_call_operand.vmem [shape: bf16[2,342,4], index: 0, kind: input, shape index: {}]   ;;  %s8685_s1 = inlined_call_operand.vmem [shape: bf16[3,3,4,8], index: 1, kind: input, shape index: {}]   ;;  %s8686_s2 = inlined_call_operand.vmem [shape: f32[1,8], index: 2, kind: input, shape index: {}]   ;;  %s8687_s3 = inlined_call_operand.vmem [shape: f32[1,8], index: 3, kind: input, shape index: {}]   ;;  %s8688_s4 = inlined_call_operand.vmem [shape: bf16[2,256,8], index: 4, kind: output, shape index: {}]  }
   0x1   :  { %s7097_s17 = smov 0  }
   0x2 LB: > { %s26_s18 = sadd.s32 1, %s7061_s16  ;;  %p5826_p0 = scmp.ge.s32.totalorder %s7065_s17, 1  ;;  %s7065_s17 = sphi %s7097_s17, %s14_s17   ;;  %s7061_s16 = sphi %s7095_s16, %s8718_s16   ;;  %s7057_s15 = sphi %s7093_s15, %s8717_s15  }
   0x3   : > { %p28_p1 = scmp.ge.s32.totalorder %s26_s18, 2  ;;  %p176_p2 = scmp.lt.s32.totalorder %s7065_s17, 3 }
   0x5   : > { %s8720_s18 = smov (%p28_p1, %s26_s18), 0  ;;  %p177_p3 = pnand %p5826_p0, %p176_p2 }
   0x7   : > { %180 = sbr.rel (%p177_p3) target bundleno = 709 (0x2c5), region = 36 }
   0xe   : > { %vm559_vm0 = vcmask 1041408   ;;  %v5944_v0 = vld [vmem:[%s8685_s1 + $0x8] sm:$0x3]  ;;  %v5830_v1 = vld [vmem:[%s8685_s1 + $0x2] sm:$0x3]  ;;  %p206_p4 = scmp.lt.s32.totalorder %s7057_s15, 1 }
   0xf   : > { %6938 = vmatprep.subr.msk.bf16.mxu0 %vm559_vm0, %v5944_v0  ;;  %6934 = vmatprep.subr.msk.bf16.mxu1 %vm559_vm0, %v5830_v1  ;;  %v7120_v2 = vsel %vm559_vm0, %v5944_v0, 0  ;;  %v561_v3 = vsel %vm559_vm0, %v5830_v1, 0  ;;  %v5964_v4 = vld [vmem:[%s8685_s1 + $0xa] sm:$0x3]  ;;  %v258_v5 = vld [vmem:[%s8685_s1] sm:$0x3] }
  0x10   : > { %6455 = vmatpush3.bf16.msra.mxu0 %v7120_v2  ;;  %6303 = vmatpush3.bf16.msra.mxu1 %v561_v3  ;;  %s8722_s15 = smov (!%p206_p4, %s7057_s15), 1  ;;  %vm355_vm1 = vsmask.f32 7424  ;;  %vm504_vm2 = vcmask 31744   ;;  %v7141_v6 = vsel %vm559_vm0, %v5964_v4, 0  ;;  %v777_v12 = vsel %vm559_vm0, %v258_v5, 0 }
  0x11   : > { %6940 = vmatprep.subr.msk.bf16.mxu0 %vm559_vm0, %v5964_v4  ;;  %s6944_s27 = smul.u32 172, %s8722_s15  ;;  %6935 = vmatprep.subr.msk.bf16.mxu1 %vm559_vm0, %v258_v5  ;;  %vm1715_vm3 = vsmask.f32 6400  ;;  %v7189_v39 = vld [vmem:[%s8685_s1 + $0x4] sm:$0x3]  ;;  %vm2162_vm4 = vcmask 1045504  }
  0x12   : > { %v7223_v1 = vld [vmem:[%s8685_s1 + $0xc] sm:$0x3]  ;;  %vm962_vm5 = vcmask 1046528   ;;  %vm2915_vm6 = vsmask.f32 5376  ;;  %vm3362_vm7 = vcmask 1044480  }
  0x13   : > { %s7138_s30 = scalar_lea.vmem %s8684_s0, %s6944_s27  ;;  %vm5708_vm8 = vcmask 60416   ;;  %s6098_s25 = sshll.u32 %s8722_s15, 7 }
  0x14   : > { %v222_v7 = vld [vmem:[%s7138_s30] sm:$0xf]  ;;  %v7145_v8 = vld [vmem:[%s7138_s30 + $0x4] sm:$0xf]  ;;  %v7151_v10 = vld [vmem:[%s7138_s30 + $0x8] sm:$0xff]   ;;  %s8046_s27 = scalar_lea.vmem %s8688_s4, %s6098_s25 }
  0x15   : > { %v7148_v9 = vcombine.low %v222_v7, %v7145_v8  ;;  %v1270_v11 = vld [vmem:[%s7138_s30 + $0x8] sm:$0xe]  ;;  %v7156_v13 = vld [vmem:[%s7138_s30 + $0xc] sm:$0xf]  ;;  %v364_v16 = vshll.u32 %v7151_v10, 16  ;;  %v368_v17 = vshrl.u32 %v7151_v10, 16 }
  0x16   : > { %v7163_v18 = vld [vmem:[%s7138_s30 + $0x10] sm:$0xff]   ;;  %v7169_v20 = vcombine.low %v1270_v11, %v7156_v13  ;;  %v7177_v28 = vld [vmem:[%s7138_s30 + $0x18] sm:$0xff]   ;;  %v7183_v34 = vld [vmem:[%s7138_s30 + $0x20] sm:$0xff]  }
  0x17   : > { %v357_v14 = vshrl.u32 %v7148_v9, 16  ;;  %v359_v15 = vshll.u32 %v7148_v9, 16  ;;  %v7166_v19 = vld [vmem:[%s7138_s30 + $0x10] sm:$0xff]   ;;  %v366_v22 = vrot.slane %v364_v16, 1  ;;  %v1725_v23 = vshrl.u32 %v7163_v18, 16  ;;  %v7180_v33 = vld [vmem:[%s7138_s30 + $0x18] sm:$0xff]  }
  0x18   : > { %v1728_v24 = vshll.u32 %v7163_v18, 16  ;;  %v1717_v25 = vshrl.u32 %v7169_v20, 16  ;;  %v1720_v26 = vshll.u32 %v7169_v20, 16  ;;  %v372_v27 = vshll.u32 %v7166_v19, 16  ;;  %v7198_v48 = vld [vmem:[%s7138_s30 + $0x20] sm:$0xff]   ;;  %v7201_v49 = vld [vmem:[%s7138_s30 + $0x28] sm:$0xff]  }
  0x19   : > { %v361_v21 = vrot.slane %v359_v15, 1  ;;  %v370_v30 = vor.u32 %v368_v17, %v366_v22  ;;  %v1727_v31 = vrot.slane %v1725_v23, 1  ;;  %v1734_v38 = vshrl.u32 %v7177_v28, 16  ;;  %v7207_v54 = vld [vmem:[%s7138_s30 + $0x28] sm:$0xff]   ;;  %v7213_v59 = vld [vmem:[%s7138_s30 + $0x30] sm:$0xff]   ;;  %v7237_v23 = vld [vmem:[%s7138_s30 + $0x38] sm:$0xff]  }
  0x1a   : > { %v1730_v32 = vrot.slane %v1728_v24, 2  ;;  %v1719_v35 = vrot.slane %v1717_v25, 1  ;;  %v1722_v36 = vrot.slane %v1720_v26, 2  ;;  %v374_v37 = vrot.slane %v372_v27, 1  ;;  %v7218_v0 = vld [vmem:[%s7138_s30 + $0x30] sm:$0xff]  }
  0x1b   : > { %v362_v29 = vor.u32 %v361_v21, %v357_v14  ;;  %v1737_v42 = vshll.u32 %v7177_v28, 16  ;;  %v376_v43 = vshrl.u32 %v7166_v19, 16  ;;  %v1736_v46 = vrot.slane %v1734_v38, 1 }
  0x1c   : > { %v1731_v41 = vor.u32 %v1730_v32, %v1727_v31  ;;  %v1723_v44 = vor.u32 %v1722_v36, %v1719_v35  ;;  %v375_v45 = vsel %vm355_vm1, %v370_v30, %v374_v37  ;;  %v380_v47 = vshll.u32 %v7180_v33, 16  ;;  %v7246_v35 = vld [vmem:[%s7138_s30 + $0x38] sm:$0xff]  }
  0x1d   : > { %v367_v40 = vsel %vm355_vm1, %v362_v29, %v366_v22  ;;  %v1739_v50 = vrot.slane %v1737_v42, 2  ;;  %v378_v51 = vor.u32 %v376_v43, %v374_v37  ;;  %v1743_v52 = vshrl.u32 %v7183_v34, 16 }
  0x1e   : > { %6304 = vmatprep.mubr.msk.bf16.mxu1 %vm504_vm2, %v367_v40  ;;  %v1746_v53 = vshll.u32 %v7183_v34, 16  ;;  %v1732_v55 = vsel %vm1715_vm3, %v1723_v44, %v1731_v41  ;;  %v382_v56 = vrot.slane %v380_v47, 1  ;;  %v384_v57 = vshrl.u32 %v7180_v33, 16  ;;  %v7257_v44 = vld [vmem:[%s7138_s30 + $0x40] sm:$0xff]  }
  0x1f   : > { %6305 = vmatmul.mubr.msk.bf16.vlgmr.msra.gmra.mrb[0].mxu1 %vm504_vm2, %v375_v45  ;;  %v388_v58 = vshll.u32 %v7198_v48, 16  ;;  %6456 = vmatprep.mubr.msk.bf16.mxu0 %vm504_vm2, %v1732_v55  ;;  %v1740_v60 = vor.u32 %v1739_v50, %v1736_v46  ;;  %v1745_v61 = vrot.slane %v1743_v52, 1  ;;  %v1752_v63 = vshrl.u32 %v7201_v49, 16 }
  0x20   : > { %6341 = vmatpush3.bf16.msra.mxu1 %v777_v12  ;;  %v1748_v62 = vrot.slane %v1746_v53, 2  ;;  %v383_v3 = vsel %vm355_vm1, %v378_v51, %v382_v56  ;;  %v386_v4 = vor.u32 %v384_v57, %v382_v56  ;;  %v1755_v7 = vshll.u32 %v7201_v49, 16  ;;  %v7262_v51 = vld [vmem:[%s7138_s30 + $0x40] sm:$0xff]  }
  0x21   : > { %6936 = vmatprep.subr.msk.bf16.mxu1 %vm559_vm0, %v7189_v39  ;;  %v390_v5 = vrot.slane %v388_v58, 1  ;;  %v1741_v11 = vsel %vm1715_vm3, %v1731_v41, %v1740_v60  ;;  %6308 = vmatprep.mubr.msk.bf16.mxu1 %vm504_vm2, %v383_v3  ;;  %v1754_v14 = vrot.slane %v1752_v63, 1  ;;  %v392_v15 = vshrl.u32 %v7198_v48, 16  ;;  %v7273_v63 = vld [vmem:[%s7138_s30 + $0x48] sm:$0xff]  }
  0x22   : > { %v1749_v12 = vor.u32 %v1748_v62, %v1745_v61  ;;  %6457 = vmatmul.mubr.msk.bf16.vlgmr.msra.gmra.mrb[0].mxu0 %vm504_vm2, %v1741_v11  ;;  %v1757_v17 = vrot.slane %v1755_v7, 2  ;;  %v396_v21 = vshll.u32 %v7207_v54, 16  ;;  %v1761_v22 = vshrl.u32 %v7213_v59, 16  ;;  %v7270_v62 = vld [vmem:[%s7138_s30 + $0x48] sm:$0xff]  }
  0x23   : > { %v391_v16 = vsel %vm355_vm1, %v386_v4, %v390_v5  ;;  %6493 = vmatpush3.bf16.msra.mxu0 %v7141_v6  ;;  %v394_v25 = vor.u32 %v392_v15, %v390_v5  ;;  %v1764_v26 = vshll.u32 %v7213_v59, 16  ;;  %v400_v27 = vshrl.u32 %v7207_v54, 16 }
  0x24   : > { %v1750_v24 = vsel %vm1715_vm3, %v1740_v60, %v1749_v12  ;;  %v1758_v29 = vor.u32 %v1757_v17, %v1754_v14  ;;  %v398_v30 = vrot.slane %v396_v21, 1  ;;  %v1763_v31 = vrot.slane %v1761_v22, 1  ;;  %6941 = vmatprep.subr.msk.bf16.mxu0 %vm559_vm0, %v7223_v1  ;;  %v7282_v14 = vld [vmem:[%s7138_s30 + $0x50] sm:$0xff]  }
  0x25   : > { %6460 = vmatprep.mubr.msk.bf16.mxu0 %vm504_vm2, %v1750_v24  ;;  %v404_v32 = vshll.u32 %v7218_v0, 16  ;;  %v1766_v6 = vrot.slane %v1764_v26, 2  ;;  %v1770_v36 = vshrl.u32 %v7237_v23, 16  ;;  %v1773_v37 = vshll.u32 %v7237_v23, 16 }
  0x26   : > { %v408_v38 = vshrl.u32 %v7218_v0, 16  ;;  %v1759_v40 = vsel %vm1715_vm3, %v1749_v12, %v1758_v29  ;;  %v399_v41 = vsel %vm355_vm1, %v394_v25, %v398_v30  ;;  %v402_v42 = vor.u32 %v400_v27, %v398_v30  ;;  %v7290_v25 = vld [vmem:[%s7138_s30 + $0x50] sm:$0xff]  }
  0x27   : > { %6309 = vmatmul.mubr.msk.bf16.gmra.mrb[4].mxu1 %vm504_vm2, %v391_v16  ;;  %v406_v43 = vrot.slane %v404_v32, 1  ;;  %v1767_v45 = vor.u32 %v1766_v6, %v1763_v31  ;;  %v1772_v46 = vrot.slane %v1770_v36, 1  ;;  %v1775_v47 = vrot.slane %v1773_v37, 2 }
  0x28   : > { %6312 = vmatprep.mubr.msk.bf16.mxu1 %vm504_vm2, %v399_v41  ;;  %v412_v50 = vshll.u32 %v7246_v35, 16  ;;  %v1779_v55 = vshrl.u32 %v7257_v44, 16  ;;  %v1782_v56 = vshll.u32 %v7257_v44, 16  ;;  %v416_v61 = vshrl.u32 %v7246_v35, 16  ;;  %v7300_v41 = vld [vmem:[%s7138_s30 + $0x58] sm:$0xff]  }
  0x29   : > { %v407_v52 = vsel %vm355_vm1, %v402_v42, %v406_v43  ;;  %v410_v53 = vor.u32 %v408_v38, %v406_v43  ;;  %v1768_v57 = vsel %vm1715_vm3, %v1758_v29, %v1767_v45  ;;  %v1776_v58 = vor.u32 %v1775_v47, %v1772_v46  ;;  %v7295_v29 = vld [vmem:[%s7138_s30 + $0x58] sm:$0xff]  }
  0x2a   : > { %v414_v60 = vrot.slane %v412_v50, 1  ;;  %6461 = vmatmul.mubr.msk.bf16.gmra.mrb[4].mxu0 %vm504_vm2, %v1759_v40  ;;  %v1781_v3 = vrot.slane %v1779_v55, 1  ;;  %v1784_v4 = vrot.slane %v1782_v56, 2  ;;  %v420_v5 = vshll.u32 %v7262_v51, 16 }
  0x2b   : > { %v424_v7 = vshrl.u32 %v7262_v51, 16  ;;  %6464 = vmatprep.mubr.msk.bf16.mxu0 %vm504_vm2, %v1768_v57  ;;  %v1788_v12 = vshrl.u32 %v7270_v62, 16  ;;  %v1791_v16 = vshll.u32 %v7270_v62, 16  ;;  %v428_v17 = vshll.u32 %v7273_v63, 16  ;;  %v2156_v57 = vld [vmem:[%s7138_s30 + $0x8] sm:$0xc] }
  0x2c   : > { %v415_v11 = vsel %vm355_vm1, %v410_v53, %v414_v60  ;;  %v1785_v15 = vor.u32 %v1784_v4, %v1781_v3  ;;  %v422_v21 = vrot.slane %v420_v5, 1  ;;  %v1797_v22 = vshrl.u32 %v7282_v14, 16 }
  0x2d   : > { %v1800_v24 = vshll.u32 %v7282_v14, 16  ;;  %v1777_v26 = vsel %vm1715_vm3, %v1767_v45, %v1776_v58  ;;  %v418_v27 = vor.u32 %v416_v61, %v414_v60  ;;  %v1790_v30 = vrot.slane %v1788_v12, 1 }
  0x2e   : > { %v1793_v31 = vrot.slane %v1791_v16, 2  ;;  %v426_v32 = vor.u32 %v424_v7, %v422_v21  ;;  %v430_v6 = vrot.slane %v428_v17, 1  ;;  %v1786_v36 = vsel %vm1715_vm3, %v1776_v58, %v1785_v15  ;;  %v7314_v58 = vld [vmem:[%s7138_s30 + $0x60] sm:$0xff]  }
  0x2f   : > { %6313 = vmatmul.mubr.msk.bf16.gmra.mrb[8].mxu1 %vm504_vm2, %v407_v52  ;;  %v1799_v37 = vrot.slane %v1797_v22, 1  ;;  %v1802_v38 = vrot.slane %v1800_v24, 2  ;;  %v436_v40 = vshll.u32 %v7290_v25, 16  ;;  %v423_v42 = vsel %vm355_vm1, %v418_v27, %v422_v21 }
  0x30   : > { %6316 = vmatprep.mubr.msk.bf16.mxu1 %vm504_vm2, %v415_v11  ;;  %v432_v43 = vshrl.u32 %v7273_v63, 16  ;;  %v1806_v45 = vshrl.u32 %v7295_v29, 16  ;;  %v1809_v46 = vshll.u32 %v7295_v29, 16  ;;  %v1794_v47 = vor.u32 %v1793_v31, %v1790_v30  ;;  %v7319_v11 = vld [vmem:[%s7138_s30 + $0x68] sm:$0xff]  }
  0x31   : > { %v431_v50 = vsel %vm355_vm1, %v426_v32, %v430_v6  ;;  %v440_v52 = vshrl.u32 %v7290_v25, 16  ;;  %v444_v53 = vshll.u32 %v7300_v41, 16  ;;  %v1803_v55 = vor.u32 %v1802_v38, %v1799_v37  ;;  %v7336_v32 = vld [vmem:[%s7138_s30 + $0x70] sm:$0xff]  }
  0x32   : > { %6465 = vmatmul.mubr.msk.bf16.gmra.mrb[8].mxu0 %vm504_vm2, %v1777_v26  ;;  %v438_v56 = vrot.slane %v436_v40, 1  ;;  %v434_v60 = vor.u32 %v432_v43, %v430_v6  ;;  %v1808_v61 = vrot.slane %v1806_v45, 1  ;;  %v1811_v3 = vrot.slane %v1809_v46, 2  ;;  %v7342_v40 = vld [vmem:[%s7138_s30 + $0x78] sm:$0xff]  }
  0x33   : > { %6468 = vmatprep.mubr.msk.bf16.mxu0 %vm504_vm2, %v1786_v36  ;;  %v1795_v4 = vsel %vm1715_vm3, %v1785_v15, %v1794_v47  ;;  %v446_v7 = vrot.slane %v444_v53, 1  ;;  %v1804_v12 = vsel %vm1715_vm3, %v1794_v47, %v1803_v55  ;;  %v5965_v16 = vcombine.low %v2156_v57, %v7156_v13 }
  0x34   : > { %v442_v5 = vor.u32 %v440_v52, %v438_v56  ;;  %v452_v17 = vshll.u32 %v7314_v58, 16  ;;  %v439_v21 = vsel %vm355_vm1, %v434_v60, %v438_v56  ;;  %v448_v22 = vshrl.u32 %v7300_v41, 16  ;;  %v7357_v56 = vld [vmem:[%s7138_s30 + $0x80] sm:$0xff]  }
  0x35   : > { %v7328_v15 = vor.u32 %v1811_v3, %v1808_v61  ;;  %v456_v26 = vshrl.u32 %v7314_v58, 16  ;;  %v460_v27 = vshll.u32 %v7319_v11, 16  ;;  %v2163_v13 = vrot.slane %v5965_v16, 2 }
  0x36   : > { %v447_v24 = vsel %vm355_vm1, %v442_v5, %v446_v7  ;;  %v2164_v30 = vrot.slane %v7163_v18, 2  ;;  %v454_v31 = vrot.slane %v452_v17, 1  ;;  %v450_v6 = vor.u32 %v448_v22, %v446_v7 }
  0x37   : > { %6317 = vmatmul.mubr.msk.bf16.gmra.mrb[12].mxu1 %vm504_vm2, %v423_v42  ;;  %v1813_v36 = vsel %vm1715_vm3, %v1803_v55, %v7328_v15  ;;  %v462_v38 = vrot.slane %v460_v27, 1  ;;  %v468_v18 = vshll.u32 %v7336_v32, 16  ;;  %v2166_v45 = vrot.slane %v7177_v28, 2  ;;  %v7387_v27 = vld [vmem:[%s7138_s30 + $0x90] ss:$0 sps:$4 sm:$0x11]  }
  0x38   : > { %6320 = vmatprep.mubr.msk.bf16.mxu1 %vm504_vm2, %v431_v50  ;;  %v458_v37 = vor.u32 %v456_v26, %v454_v31  ;;  %v2165_v42 = vsel %vm2162_vm4, %v2163_v13, %v2164_v30  ;;  %v455_v43 = vsel %vm355_vm1, %v450_v6, %v454_v31  ;;  %v464_v46 = vshrl.u32 %v7319_v11, 16 }
  0x39   : > { %v472_v50 = vshrl.u32 %v7336_v32, 16  ;;  %v476_v52 = vshll.u32 %v7342_v40, 16  ;;  %v2168_v53 = vrot.slane %v7183_v34, 2  ;;  %v470_v55 = vrot.slane %v468_v18, 1  ;;  %v7370_v34 = vld [vmem:[%s8685_s1 + $0xe] sm:$0x3] }
  0x3a   : > { %6469 = vmatmul.mubr.msk.bf16.gmra.mrb[12].mxu0 %vm504_vm2, %v1795_v4  ;;  %v463_v47 = vsel %vm355_vm1, %v458_v37, %v462_v38  ;;  %v2694_v28 = vsel %vm559_vm0, %v7223_v1, 0  ;;  %v466_v57 = vor.u32 %v464_v46, %v462_v38  ;;  %v2167_v60 = vsel %vm2162_vm4, %v2164_v30, %v2166_v45  ;;  %v7364_v4 = vld [vmem:[%s7138_s30 + $0x88] sm:$0xff]  }
  0x3b   : > { %6472 = vmatprep.mubr.msk.bf16.mxu0 %vm504_vm2, %v1804_v12  ;;  %v474_v61 = vor.u32 %v472_v50, %v470_v55  ;;  %v478_v3 = vrot.slane %v476_v52, 1  ;;  %v2169_v5 = vsel %vm2162_vm4, %v2166_v45, %v2168_v53  ;;  %v484_v7 = vshll.u32 %v7357_v56, 16 }
  0x3c   : > { %v471_v1 = vsel %vm355_vm1, %v466_v57, %v470_v55  ;;  %v2170_v12 = vrot.slane %v7201_v49, 2  ;;  %v480_v16 = vshrl.u32 %v7342_v40, 16  ;;  %v492_v22 = vshll.u32 %v7364_v4, 16  ;;  %v7414_v55 = vld [vmem:[%s7138_s30 + $0x60] sm:$0xff]   ;;  %v7433_v57 = vld [vmem:[%s7138_s30 + $0x68] sm:$0xff]  }
  0x3d   : > { %v479_v17 = vsel %vm355_vm1, %v474_v61, %v478_v3  ;;  %v486_v26 = vrot.slane %v484_v7, 1  ;;  %v500_v37 = vshll.u32 %v7387_v27, 16  ;;  %v2174_v38 = vrot.slane %v7237_v23, 2  ;;  %v7451_v7 = vld [vmem:[%s7138_s30 + $0x78] sm:$0xff]  }
  0x3e   : > { %v482_v49 = vor.u32 %v480_v16, %v478_v3  ;;  %v2171_v13 = vsel %vm2162_vm4, %v2168_v53, %v2170_v12  ;;  %v494_v31 = vrot.slane %v492_v22, 1  ;;  %v2176_v18 = vrot.slane %v7257_v44, 2  ;;  %v7467_v22 = vld [vmem:[%s7138_s30 + $0x88] sm:$0xff]  }
  0x3f   : > { %6321 = vmatmul.mubr.msk.bf16.gmra.mrb[16].mxu1 %vm504_vm2, %v439_v21  ;;  %v488_v21 = vshrl.u32 %v7357_v56, 16  ;;  %v502_v45 = vrot.slane %v500_v37, 1  ;;  %v2178_v23 = vrot.slane %v7270_v62, 2  ;;  %v2180_v44 = vrot.slane %v7282_v14, 2 }
  0x40   : > { %6324 = vmatprep.mubr.msk.bf16.mxu1 %vm504_vm2, %v447_v24  ;;  %v2172_v24 = vrot.slane %v7213_v59, 2  ;;  %v487_v59 = vsel %vm355_vm1, %v482_v49, %v486_v26  ;;  %v2182_v62 = vrot.slane %v7295_v29, 2  ;;  %v1055_v14 = vsel %vm559_vm0, %v7189_v39, 0 }
  0x41   : > { %v490_v30 = vor.u32 %v488_v21, %v486_v26  ;;  %v2179_v52 = vsel %vm2162_vm4, %v2176_v18, %v2178_v23  ;;  %v2181_v53 = vsel %vm2162_vm4, %v2178_v23, %v2180_v44  ;;  %v2186_v61 = vrot.slane %v7433_v57, 2  ;;  %v7471_v26 = vld [vmem:[%s7138_s30 + $0x90] sm:$0xff]  }
  0x42   : > { %6473 = vmatmul.mubr.msk.bf16.gmra.mrb[16].mxu0 %vm504_vm2, %v1813_v36  ;;  %v2173_v6 = vsel %vm2162_vm4, %v2170_v12, %v2172_v24  ;;  %v496_v36 = vshrl.u32 %v7364_v4, 16  ;;  %v2175_v46 = vsel %vm2162_vm4, %v2172_v24, %v2174_v38  ;;  %v2183_v29 = vsel %vm2162_vm4, %v2180_v44, %v2182_v62  ;;  %v7455_v12 = vld [vmem:[%s7138_s30 + $0x80] sm:$0xff]  }
  0x43   : > { %6494 = vmatprep.mubr.msk.bf16.mxu0 %vm504_vm2, %v2165_v42  ;;  %v495_v42 = vsel %vm355_vm1, %v490_v30, %v494_v31  ;;  %v2190_v16 = vrot.slane %v7451_v7, 2  ;;  %v2194_v49 = vrot.slane %v7467_v22, 2  ;;  %v2470_v30 = vld [vmem:[%s7138_s30 + $0x10] sm:$0xc] }
  0x47   : > { %6325 = vmatmul.mubr.msk.bf16.gmra.mrb[20].mxu1 %vm504_vm2, %v455_v43  ;;  %v498_v43 = vor.u32 %v496_v36, %v494_v31  ;;  %v7481_v31 = vld [vmem:[%s7138_s30 + $0x14] sm:$0xf] }
  0x48   : > { %6328 = vmatprep.mubr.msk.bf16.mxu1 %vm504_vm2, %v463_v47  ;;  %v2177_v47 = vsel %vm2162_vm4, %v2174_v38, %v2176_v18  ;;  %v7491_v37 = vcombine.low %v2470_v30, %v7481_v31  ;;  %v7494_v38 = vld [vmem:[%s7138_s30 + $0x18] sm:$0xff]  }
  0x49   : > { %v503_v50 = vsel %vm355_vm1, %v498_v43, %v502_v45  ;;  %v2603_v43 = vrot.slane %v7494_v38, 2 }
  0x4a   : > { %6495 = vmatmul.mubr.msk.bf16.vlgmr.msra.gmra.mrb[0].mxu0 %vm504_vm2, %v2167_v60  ;;  %v7439_v60 = vld [vmem:[%s7138_s30 + $0x70] sm:$0xff]   ;;  %v2602_v18 = vrot.slane %v7491_v37, 2 }
  0x4b   : > { %6531 = vmatpush3.bf16.msra.mxu0 %v2694_v28  ;;  %6498 = vmatprep.mubr.msk.bf16.mxu0 %vm504_vm2, %v2169_v5  ;;  %v2184_v28 = vrot.slane %v7414_v55, 2  ;;  %v2188_v3 = vrot.slane %v7439_v60, 2 }
  0x4c   : > { %6942 = vmatprep.subr.msk.bf16.mxu0 %vm559_vm0, %v7370_v34 }
  0x4d   : > { %v2185_v39 = vsel %vm2162_vm4, %v2182_v62, %v2184_v28  ;;  %v2187_v5 = vsel %vm2162_vm4, %v2184_v28, %v2186_v61  ;;  %v2191_v21 = vsel %vm2162_vm4, %v2188_v3, %v2190_v16  ;;  %v3141_v62 = vsel %vm559_vm0, %v7370_v34, 0  ;;  %v7529_v28 = vld [vmem:[%s7138_s30 + $0x38] sm:$0xff]  }
  0x4f   : > { %6329 = vmatmul.mubr.msk.bf16.gmra.mrb[24].mxu1 %vm504_vm2, %v471_v1  ;;  %v2189_v1 = vsel %vm2162_vm4, %v2186_v61, %v2188_v3  ;;  %v2611_v61 = vrot.slane %v7529_v28, 2  ;;  %v7548_v3 = vld [vmem:[%s7138_s30 + $0x40] sm:$0xff]  }
  0x50   : > { %6332 = vmatprep.mubr.msk.bf16.mxu1 %vm504_vm2, %v479_v17  ;;  %v2192_v17 = vrot.slane %v7455_v12, 2 }
  0x52   : > { %6499 = vmatmul.mubr.msk.bf16.gmra.mrb[4].mxu0 %vm504_vm2, %v2171_v13  ;;  %v2193_v24 = vsel %vm2162_vm4, %v2190_v16, %v2192_v17  ;;  %v2196_v13 = vrot.slane %v7471_v26, 2  ;;  %v956_v16 = vld [vmem:[%s7138_s30] sm:$0xe] }
  0x53   : > { %6502 = vmatprep.mubr.msk.bf16.mxu0 %vm504_vm2, %v2173_v6  ;;  %v2195_v6 = vsel %vm2162_vm4, %v2192_v17, %v2194_v49  ;;  %v2613_v17 = vrot.slane %v7548_v3, 2 }
  0x54   : > { %v2197_v36 = vsel %vm2162_vm4, %v2194_v49, %v2196_v13 }
  0x55   : > { %v2614_v49 = vsel %vm2162_vm4, %v2611_v61, %v2613_v17 }
  0x57   : > { %6333 = vmatmul.mubr.msk.bf16.gmra.mrb[28].mxu1 %vm504_vm2, %v487_v59  ;;  %v7487_v59 = vld [vmem:[%s7138_s30 + $0x98] ss:$0 sps:$4 sm:$0x33]  }
  0x58   : > { %6336 = vmatprep.mubr.msk.bf16.mxu1 %vm504_vm2, %v495_v42  ;;  %v2198_v42 = vrot.slane %v7487_v59, 2 }
  0x5a   : > { %6503 = vmatmul.mubr.msk.bf16.gmra.mrb[8].mxu0 %vm504_vm2, %v2175_v46  ;;  %v2199_v45 = vsel %vm2162_vm4, %v2196_v13, %v2198_v42  ;;  %v7507_v46 = vld [vmem:[%s7138_s30 + $0x20] sm:$0xff]   ;;  %v7566_v13 = vld [vmem:[%s7138_s30 + $0x50] sm:$0xff]  }
  0x5b   : > { %6506 = vmatprep.mubr.msk.bf16.mxu0 %vm504_vm2, %v2177_v47  ;;  %v2604_v47 = vsel %vm2162_vm4, %v2602_v18, %v2603_v43  ;;  %v2605_v23 = vrot.slane %v7507_v46, 2  ;;  %v2617_v42 = vrot.slane %v7566_v13, 2 }
  0x5f   : > { %6337 = vmatmul.mubr.msk.bf16.gmra.mrb[32].mxu1 %vm504_vm2, %v503_v50  ;;  %v7511_v50 = vld [vmem:[%s7138_s30 + $0x28] sm:$0xff]  }
  0x60   : > { %6342 = vmatprep.mubr.msk.bf16.mxu1 %vm504_vm2, %v7148_v9  ;;  %v7425_v9 = vld [vmem:[%s8685_s1 + $0x6] sm:$0x3]  ;;  %v2607_v44 = vrot.slane %v7511_v50, 2 }
  0x62   : > { %6507 = vmatmul.mubr.msk.bf16.gmra.mrb[12].mxu0 %vm504_vm2, %v2179_v52  ;;  %v2606_v52 = vsel %vm2162_vm4, %v2603_v43, %v2605_v23 }
  0x63   : > { %6510 = vmatprep.mubr.msk.bf16.mxu0 %vm504_vm2, %v2181_v53  ;;  %v7523_v53 = vld [vmem:[%s7138_s30 + $0x30] sm:$0xff]  }
  0x67   : > { %6343 = vmatmul.mubr.msk.bf16.vlgmr.msra.gmra.mrb[0].mxu1 %vm504_vm2, %v7151_v10 }
  0x68   : > { %6346 = vmatprep.mubr.msk.bf16.mxu1 %vm504_vm2, %v7166_v19  ;;  %6379 = vmatpush3.bf16.msra.mxu1 %v1055_v14  ;;  %v2608_v14 = vsel %vm2162_vm4, %v2605_v23, %v2607_v44  ;;  %v968_v23 = vrot.slane %v7180_v33, 1 }
  0x69   : > { %6937 = vmatprep.subr.msk.bf16.mxu1 %vm559_vm0, %v7425_v9 }
  0x6a   : > { %6511 = vmatmul.mubr.msk.bf16.gmra.mrb[16].mxu0 %vm504_vm2, %v2183_v29  ;;  %v7534_v29 = vld [vmem:[%s8685_s1 + $0x10] sm:$0x3] }
  0x6b   : > { %6514 = vmatprep.mubr.msk.bf16.mxu0 %vm504_vm2, %v2185_v39  ;;  %v2609_v39 = vrot.slane %v7523_v53, 2 }
  0x6d   : > { %v2610_v34 = vsel %vm2162_vm4, %v2607_v44, %v2609_v39 }
  0x6f   : > { %6347 = vmatmul.mubr.msk.bf16.gmra.mrb[4].mxu1 %vm504_vm2, %v7180_v33 }
  0x70   : > { %6350 = vmatprep.mubr.msk.bf16.mxu1 %vm504_vm2, %v7198_v48 }
  0x72   : > { %6515 = vmatmul.mubr.msk.bf16.gmra.mrb[20].mxu0 %vm504_vm2, %v2187_v5  ;;  %v2612_v5 = vsel %vm2162_vm4, %v2609_v39, %v2611_v61  ;;  %v1494_v39 = vsel %vm559_vm0, %v7425_v9, 0  ;;  %v970_v61 = vrot.slane %v7198_v48, 1  ;;  %v7032_v9 = vld [vmem:[%s8685_s1 + $0x8] sm:$0x3] }
  0x73   : > { %6518 = vmatprep.mubr.msk.bf16.mxu0 %vm504_vm2, %v2189_v1  ;;  %v7552_v1 = vld [vmem:[%s7138_s30 + $0x48] sm:$0xff]  }
  0x74   : > { %v971_v48 = vsel %vm962_vm5, %v968_v23, %v970_v61 }
  0x77   : > { %6351 = vmatmul.mubr.msk.bf16.gmra.mrb[8].mxu1 %vm504_vm2, %v7207_v54 }
  0x78   : > { %6354 = vmatprep.mubr.msk.bf16.mxu1 %vm504_vm2, %v7218_v0 }
  0x7a   : > { %6519 = vmatmul.mubr.msk.bf16.gmra.mrb[24].mxu0 %vm504_vm2, %v2191_v21  ;;  %v5887_v21 = vcombine.low %v956_v16, %v7145_v8  ;;  %v7571_v8 = vld [vmem:[%s7138_s30 + $0x58] sm:$0xff]   ;;  %v972_v16 = vrot.slane %v7207_v54, 1 }
  0x7b   : > { %6522 = vmatprep.mubr.msk.bf16.mxu0 %vm504_vm2, %v2193_v24  ;;  %v2615_v24 = vrot.slane %v7552_v1, 2  ;;  %v2619_v43 = vrot.slane %v7571_v8, 2 }
  0x7c   : > { %v963_v30 = vrot.slane %v5887_v21, 1  ;;  %v7613_v21 = vld [vmem:[%s7138_s30 + $0x78] sm:$0xff]   ;;  %v973_v54 = vsel %vm962_vm5, %v970_v61, %v972_v16 }
  0x7d   : > { %v2620_v44 = vsel %vm2162_vm4, %v2617_v42, %v2619_v43 }
  0x7f   : > { %6355 = vmatmul.mubr.msk.bf16.gmra.mrb[12].mxu1 %vm504_vm2, %v7246_v35 }
  0x80   : > { %6358 = vmatprep.mubr.msk.bf16.mxu1 %vm504_vm2, %v7262_v51 }
  0x82   : > { %6523 = vmatmul.mubr.msk.bf16.gmra.mrb[28].mxu0 %vm504_vm2, %v2195_v6  ;;  %v964_v6 = vrot.slane %v7151_v10, 1  ;;  %v966_v10 = vrot.slane %v7166_v19, 1 }
  0x83   : > { %6526 = vmatprep.mubr.msk.bf16.mxu0 %vm504_vm2, %v2197_v36  ;;  %v2616_v36 = vsel %vm2162_vm4, %v2613_v17, %v2615_v24 }
  0x84   : > { %v965_v18 = vsel %vm962_vm5, %v963_v30, %v964_v6  ;;  %v974_v30 = vrot.slane %v7218_v0, 1 }
  0x87   : > { %6359 = vmatmul.mubr.msk.bf16.gmra.mrb[16].mxu1 %vm504_vm2, %v7273_v63 }
  0x88   : > { %6362 = vmatprep.mubr.msk.bf16.mxu1 %vm504_vm2, %v7290_v25 }
  0x8a   : > { %6527 = vmatmul.mubr.msk.bf16.gmra.mrb[32].mxu0 %vm504_vm2, %v2199_v45  ;;  %v2618_v45 = vsel %vm2162_vm4, %v2615_v24, %v2617_v42  ;;  %v976_v42 = vrot.slane %v7246_v35, 1  ;;  %v978_v35 = vrot.slane %v7262_v51, 1 }
  0x8b   : > { %6532 = vmatprep.mubr.msk.bf16.mxu0 %vm504_vm2, %v2604_v47  ;;  %v7584_v47 = vld [vmem:[%s7138_s30 + $0x60] sm:$0xff]  }
  0x8c   : > { %v2621_v19 = vrot.slane %v7584_v47, 2 }
  0x8f   : > { %6363 = vmatmul.mubr.msk.bf16.gmra.mrb[20].mxu1 %vm504_vm2, %v7300_v41 }
  0x90   : > { %6366 = vmatprep.mubr.msk.bf16.mxu1 %vm504_vm2, %v7314_v58 }
  0x92   : > { %6533 = vmatmul.mubr.msk.bf16.vlgmr.msra.gmra.mrb[0].mxu0 %vm504_vm2, %v2606_v52  ;;  %v7589_v52 = vld [vmem:[%s7138_s30 + $0x68] sm:$0xff]  }
  0x93   : > { %6569 = vmatpush3.bf16.msra.mxu0 %v3141_v62  ;;  %6536 = vmatprep.mubr.msk.bf16.mxu0 %vm504_vm2, %v2608_v14  ;;  %v967_v62 = vsel %vm962_vm5, %v964_v6, %v966_v10  ;;  %v969_v14 = vsel %vm962_vm5, %v966_v10, %v968_v23  ;;  %v2623_v33 = vrot.slane %v7589_v52, 2  ;;  %v975_v10 = vsel %vm962_vm5, %v972_v16, %v974_v30 }
  0x94   : > { %6943 = vmatprep.subr.msk.bf16.mxu0 %vm559_vm0, %v7534_v29  ;;  %v2917_v16 = vshrl.u32 %v7491_v37, 16 }
  0x95   : > { %v2624_v17 = vsel %vm2162_vm4, %v2621_v19, %v2623_v33 }
  0x97   : > { %6367 = vmatmul.mubr.msk.bf16.gmra.mrb[24].mxu1 %vm504_vm2, %v7319_v11 }
  0x98   : > { %6370 = vmatprep.mubr.msk.bf16.mxu1 %vm504_vm2, %v7336_v32 }
  0x9a   : > { %6537 = vmatmul.mubr.msk.bf16.gmra.mrb[4].mxu0 %vm504_vm2, %v2610_v34  ;;  %v2622_v34 = vsel %vm2162_vm4, %v2619_v43, %v2621_v19  ;;  %v7631_v43 = vld [vmem:[%s7138_s30 + $0x88] sm:$0xff]   ;;  %v980_v19 = vrot.slane %v7273_v63, 1  ;;  %v2920_v63 = vshll.u32 %v7491_v37, 16 }
  0x9b   : > { %6540 = vmatprep.mubr.msk.bf16.mxu0 %vm504_vm2, %v2612_v5  ;;  %v7604_v5 = vld [vmem:[%s7138_s30 + $0x70] sm:$0xff]   ;;  %v2631_v23 = vrot.slane %v7631_v43, 2 }
  0x9c   : > { %v2625_v24 = vrot.slane %v7604_v5, 2  ;;  %v981_v51 = vsel %vm962_vm5, %v978_v35, %v980_v19 }
  0x9e   : > { %v2626_v6 = vsel %vm2162_vm4, %v2623_v33, %v2625_v24  ;;  %v979_v33 = vsel %vm962_vm5, %v976_v42, %v978_v35 }
  0x9f   : > { %6371 = vmatmul.mubr.msk.bf16.gmra.mrb[28].mxu1 %vm504_vm2, %v7342_v40 }
  0xa0   : > { %6374 = vmatprep.mubr.msk.bf16.mxu1 %vm504_vm2, %v7357_v56 }
  0xa2   : > { %6541 = vmatmul.mubr.msk.bf16.gmra.mrb[8].mxu0 %vm504_vm2, %v2614_v49  ;;  %v2627_v49 = vrot.slane %v7613_v21, 2 }
  0xa3   : > { %6544 = vmatprep.mubr.msk.bf16.mxu0 %vm504_vm2, %v2616_v36  ;;  %v7626_v36 = vld [vmem:[%s7138_s30 + $0x80] sm:$0xff]  }
  0xa4   : > { %v2629_v0 = vrot.slane %v7626_v36, 2 }
  0xa7   : > { %6375 = vmatmul.mubr.msk.bf16.gmra.mrb[32].mxu1 %vm504_vm2, %v7364_v4 }
  0xa8   : > { %6380 = vmatprep.mubr.msk.bf16.mxu1 %vm504_vm2, %v965_v18  ;;  %v2628_v18 = vsel %vm2162_vm4, %v2625_v24, %v2627_v49 }
  0xaa   : > { %6545 = vmatmul.mubr.msk.bf16.gmra.mrb[12].mxu0 %vm504_vm2, %v2618_v45  ;;  %v977_v45 = vsel %vm962_vm5, %v974_v30, %v976_v42  ;;  %v984_v30 = vrot.slane %v7300_v41, 1  ;;  %v2922_v42 = vrot.slane %v2920_v63, 3  ;;  %v2943_v41 = vshrl.u32 %v7511_v50, 16 }
  0xab   : > { %6548 = vmatprep.mubr.msk.bf16.mxu0 %vm504_vm2, %v2620_v44  ;;  %v2630_v44 = vsel %vm2162_vm4, %v2627_v49, %v2629_v0  ;;  %v7028_v49 = vld [vmem:[%s7138_s30 + $0xa0] ss:$0 sps:$4 sm:$0x33]  }
  0xaf   : > { %6381 = vmatmul.mubr.msk.bf16.vlgmr.msra.gmra.mrb[0].mxu1 %vm504_vm2, %v967_v62  ;;  %v7644_v62 = vld [vmem:[%s7138_s30 + $0x90] sm:$0xff]  }
  0xb0   : > { %6384 = vmatprep.mubr.msk.bf16.mxu1 %vm504_vm2, %v969_v14  ;;  %6417 = vmatpush3.bf16.msra.mxu1 %v1494_v39  ;;  %v7648_v14 = vld [vmem:[%s7138_s30 + $0x98] sm:$0xff]   ;;  %v2632_v39 = vsel %vm2162_vm4, %v2629_v0, %v2631_v23  ;;  %v2633_v61 = vrot.slane %v7644_v62, 2  ;;  %v2637_v0 = vrot.slane %v7028_v49, 2 }
  0xb1   : > { %6939 = vmatprep.subr.msk.bf16.mxu1 %vm559_vm0, %v7032_v9  ;;  %v2925_v9 = vshrl.u32 %v7494_v38, 16 }
  0xb2   : > { %6549 = vmatmul.mubr.msk.bf16.gmra.mrb[16].mxu0 %vm504_vm2, %v2622_v34  ;;  %v2635_v34 = vrot.slane %v7648_v14, 2  ;;  %v2634_v24 = vsel %vm2162_vm4, %v2631_v23, %v2633_v61  ;;  %v2937_v23 = vshll.u32 %v7507_v46, 16 }
  0xb3   : > { %6552 = vmatprep.mubr.msk.bf16.mxu0 %vm504_vm2, %v2624_v17  ;;  %v2928_v17 = vshll.u32 %v7494_v38, 16  ;;  %v2927_v37 = vrot.slane %v2925_v9, 2  ;;  %v2945_v9 = vrot.slane %v2943_v41, 2  ;;  %v2970_v41 = vshrl.u32 %v7548_v3, 16 }
  0xb7   : > { %6385 = vmatmul.mubr.msk.bf16.gmra.mrb[4].mxu1 %vm504_vm2, %v971_v48  ;;  %v982_v48 = vrot.slane %v7290_v25, 1 }
  0xb8   : > { %6388 = vmatprep.mubr.msk.bf16.mxu1 %vm504_vm2, %v973_v54  ;;  %v2636_v54 = vsel %vm2162_vm4, %v2633_v61, %v2635_v34 }
  0xb9   : > { %v985_v25 = vsel %vm962_vm5, %v982_v48, %v984_v30 }
  0xba   : > { %6553 = vmatmul.mubr.msk.bf16.gmra.mrb[20].mxu0 %vm504_vm2, %v2626_v6  ;;  %v2919_v6 = vrot.slane %v2917_v16, 2  ;;  %v988_v16 = vrot.slane %v7319_v11, 1  ;;  %v2961_v11 = vshrl.u32 %v7529_v28, 16 }
  0xbb   : > { %6556 = vmatprep.mubr.msk.bf16.mxu0 %vm504_vm2, %v2628_v18  ;;  %v2930_v18 = vrot.slane %v2928_v17, 3 }
  0xbc   : > { %v2923_v35 = vor.u32 %v2922_v42, %v2919_v6  ;;  %v2964_v6 = vshll.u32 %v7529_v28, 16 }
  0xbf   : > { %6389 = vmatmul.mubr.msk.bf16.gmra.mrb[8].mxu1 %vm504_vm2, %v975_v10  ;;  %v983_v10 = vsel %vm962_vm5, %v980_v19, %v982_v48  ;;  %v986_v19 = vrot.slane %v7314_v58, 1  ;;  %v2952_v58 = vshrl.u32 %v7523_v53, 16 }
  0xc0   : > { %6392 = vmatprep.mubr.msk.bf16.mxu1 %vm504_vm2, %v977_v45  ;;  %v2934_v45 = vshrl.u32 %v7507_v46, 16 }
  0xc1   : > { %v987_v48 = vsel %vm962_vm5, %v984_v30, %v986_v19  ;;  %v990_v30 = vrot.slane %v7336_v32, 1  ;;  %v2973_v32 = vshll.u32 %v7548_v3, 16 }
  0xc2   : > { %6557 = vmatmul.mubr.msk.bf16.gmra.mrb[24].mxu0 %vm504_vm2, %v2630_v44  ;;  %v2931_v44 = vor.u32 %v2930_v18, %v2927_v37  ;;  %v2936_v61 = vrot.slane %v2934_v45, 2  ;;  %v2954_v37 = vrot.slane %v2952_v58, 2  ;;  %v2963_v45 = vrot.slane %v2961_v11, 2 }
  0xc3   : > { %6560 = vmatprep.mubr.msk.bf16.mxu0 %vm504_vm2, %v2632_v39  ;;  %v2946_v39 = vshll.u32 %v7511_v50, 16  ;;  %v2988_v58 = vshrl.u32 %v7566_v13, 16  ;;  %v3000_v11 = vshll.u32 %v7571_v8, 16 }
  0xc4   : > { %v2932_v63 = vsel %vm2915_vm6, %v2923_v35, %v2931_v44  ;;  %v991_v35 = vsel %vm962_vm5, %v988_v16, %v990_v30 }
  0xc5   : > { %v2948_v17 = vrot.slane %v2946_v39, 3 }
  0xc7   : > { %6393 = vmatmul.mubr.msk.bf16.gmra.mrb[12].mxu1 %vm504_vm2, %v979_v33  ;;  %v2638_v33 = vsel %vm2162_vm4, %v2635_v34, %v2637_v0  ;;  %v2955_v34 = vshll.u32 %v7523_v53, 16  ;;  %v2949_v49 = vor.u32 %v2948_v17, %v2945_v9  ;;  %v3455_v0 = vsel %vm559_vm0, %v7534_v29, 0 }
  0xc8   : > { %6396 = vmatprep.mubr.msk.bf16.mxu1 %vm504_vm2, %v981_v51  ;;  %v2939_v51 = vrot.slane %v2937_v23, 3  ;;  %v2966_v23 = vrot.slane %v2964_v6, 3  ;;  %v2979_v29 = vshrl.u32 %v7552_v1, 16 }
  0xc9   : > { %v2957_v18 = vrot.slane %v2955_v34, 3  ;;  %v2991_v34 = vshll.u32 %v7566_v13, 16 }
  0xca   : > { %6561 = vmatmul.mubr.msk.bf16.gmra.mrb[28].mxu0 %vm504_vm2, %v2634_v24  ;;  %v2940_v24 = vor.u32 %v2939_v51, %v2936_v61  ;;  %v2967_v39 = vor.u32 %v2966_v23, %v2963_v45  ;;  %v2972_v61 = vrot.slane %v2970_v41, 2  ;;  %v2975_v51 = vrot.slane %v2973_v32, 3 }
  0xcb   : > { %6564 = vmatprep.mubr.msk.bf16.mxu0 %vm504_vm2, %v2636_v54  ;;  %v989_v54 = vsel %vm962_vm5, %v986_v19, %v988_v16  ;;  %v2982_v19 = vshll.u32 %v7552_v1, 16  ;;  %v2981_v17 = vrot.slane %v2979_v29, 2  ;;  %v3002_v23 = vrot.slane %v3000_v11, 3  ;;  %v7034_v29 = vld [vmem:[%s7138_s30 + $0x18] sm:$0xff]  }
  0xcc   : > { %v2941_v42 = vsel %vm2915_vm6, %v2931_v44, %v2940_v24  ;;  %v2958_v44 = vor.u32 %v2957_v18, %v2954_v37  ;;  %v2993_v37 = vrot.slane %v2991_v34, 3  ;;  %v1402_v18 = vrot.slane %v7169_v20, 1 }
  0xcd   : > { %v3006_v32 = vshrl.u32 %v7584_v47, 16  ;;  %v3009_v20 = vshll.u32 %v7584_v47, 16  ;;  %v3027_v34 = vshll.u32 %v7604_v5, 16  ;;  %v3036_v11 = vshll.u32 %v7613_v21, 16 }
  0xce   : > { %v2959_v16 = vsel %vm2915_vm6, %v2949_v49, %v2958_v44  ;;  %v2968_v9 = vsel %vm2915_vm6, %v2958_v44, %v2967_v39 }
  0xcf   : > { %6397 = vmatmul.mubr.msk.bf16.gmra.mrb[16].mxu1 %vm504_vm2, %v983_v10  ;;  %v992_v10 = vrot.slane %v7342_v40, 1 }
  0xd0   : > { %6400 = vmatprep.mubr.msk.bf16.mxu1 %vm504_vm2, %v985_v25  ;;  %v2950_v25 = vsel %vm2915_vm6, %v2940_v24, %v2949_v49 }
  0xd1   : > { %v993_v40 = vsel %vm962_vm5, %v990_v30, %v992_v10  ;;  %v998_v30 = vrot.slane %v7387_v27, 1 }
  0xd2   : > { %6565 = vmatmul.mubr.msk.bf16.gmra.mrb[32].mxu0 %vm504_vm2, %v2638_v33  ;;  %v994_v33 = vrot.slane %v7357_v56, 1 }
  0xd3   : > { %6570 = vmatprep.mubr.msk.bf16.mxu0 %vm504_vm2, %v2932_v63  ;;  %v996_v63 = vrot.slane %v7364_v4, 1  ;;  %v2997_v4 = vshrl.u32 %v7571_v8, 16 }
  0xd4   : > { %v995_v24 = vsel %vm962_vm5, %v992_v10, %v994_v33  ;;  %v7033_v10 = vld [vmem:[%s7138_s30 + $0x10] sm:$0xff]  }
  0xd5   : > { %v997_v56 = vsel %vm962_vm5, %v994_v33, %v996_v63  ;;  %v2999_v45 = vrot.slane %v2997_v4, 2  ;;  %v3033_v4 = vshrl.u32 %v7613_v21, 16 }
  0xd7   : > { %6401 = vmatmul.mubr.msk.bf16.gmra.mrb[20].mxu1 %vm504_vm2, %v987_v48  ;;  %v2984_v48 = vrot.slane %v2982_v19, 3  ;;  %v3003_v44 = vor.u32 %v3002_v23, %v2999_v45  ;;  %v1405_v19 = vrot.slane %v7034_v29, 1  ;;  %v3035_v45 = vrot.slane %v3033_v4, 2 }
  0xd8   : > { %6404 = vmatprep.mubr.msk.bf16.mxu1 %vm504_vm2, %v989_v54  ;;  %v2976_v54 = vor.u32 %v2975_v51, %v2972_v61  ;;  %v3008_v61 = vrot.slane %v3006_v32, 2  ;;  %v3011_v51 = vrot.slane %v3009_v20, 3  ;;  %v3038_v23 = vrot.slane %v3036_v11, 3  ;;  %v7040_v11 = vld [vmem:[%s7138_s30 + $0x48] sm:$0xff]  }
  0xd9   : > { %v2985_v49 = vor.u32 %v2984_v48, %v2981_v17  ;;  %v3045_v32 = vshll.u32 %v7626_v36, 16  ;;  %v3072_v4 = vshll.u32 %v7648_v14, 16 }
  0xda   : > { %6571 = vmatmul.mubr.msk.bf16.vlgmr.msra.gmra.mrb[0].mxu0 %vm504_vm2, %v2941_v42  ;;  %v2977_v6 = vsel %vm2915_vm6, %v2967_v39, %v2976_v54  ;;  %v2990_v42 = vrot.slane %v2988_v58, 2  ;;  %v3018_v39 = vshll.u32 %v7589_v52, 16  ;;  %v3024_v58 = vshrl.u32 %v7604_v5, 16 }
  0xdb   : > { %6607 = vmatpush3.bf16.msra.mxu0 %v3455_v0  ;;  %6574 = vmatprep.mubr.msk.bf16.mxu0 %vm504_vm2, %v2950_v25  ;;  %v1403_v0 = vrot.slane %v7033_v10, 1  ;;  %v2986_v25 = vsel %vm2915_vm6, %v2976_v54, %v2985_v49  ;;  %v3012_v54 = vor.u32 %v3011_v51, %v3008_v61  ;;  %v7037_v10 = vld [vmem:[%s7138_s30 + $0x30] sm:$0xff]   ;;  %v3039_v20 = vor.u32 %v3038_v23, %v3035_v45  ;;  %v7039_v51 = vld [vmem:[%s7138_s30 + $0x40] sm:$0xff]  }
  0xdc   : > { %v2994_v41 = vor.u32 %v2993_v37, %v2990_v42  ;;  %v3020_v48 = vrot.slane %v3018_v39, 3  ;;  %v3026_v37 = vrot.slane %v3024_v58, 2  ;;  %v7038_v39 = vld [vmem:[%s7138_s30 + $0x38] sm:$0xff]   ;;  %v3047_v61 = vrot.slane %v3045_v32, 3 }
  0xdd   : > { %v1404_v27 = vsel %vm962_vm5, %v1402_v18, %v1403_v0  ;;  %v3013_v42 = vsel %vm2915_vm6, %v3003_v44, %v3012_v54  ;;  %v3029_v18 = vrot.slane %v3027_v34, 3  ;;  %v1413_v29 = vrot.slane %v7038_v39, 1 }
  0xde   : > { %v2995_v33 = vsel %vm2915_vm6, %v2985_v49, %v2994_v41  ;;  %v3063_v58 = vshll.u32 %v7644_v62, 16  ;;  %v3074_v23 = vrot.slane %v3072_v4, 3  ;;  %v3368_v4 = vrot.slane %v7511_v50, 3 }
  0xdf   : > { %6405 = vmatmul.mubr.msk.bf16.gmra.mrb[24].mxu1 %vm504_vm2, %v991_v35  ;;  %v999_v35 = vsel %vm962_vm5, %v996_v63, %v998_v30  ;;  %v3370_v50 = vrot.slane %v7523_v53, 3 }
  0xe0   : > { %6408 = vmatprep.mubr.msk.bf16.mxu1 %vm504_vm2, %v993_v40  ;;  %v3015_v40 = vshrl.u32 %v7589_v52, 16 }
  0xe2   : > { %6575 = vmatmul.mubr.msk.bf16.gmra.mrb[4].mxu0 %vm504_vm2, %v2959_v16  ;;  %v7035_v16 = vld [vmem:[%s7138_s30 + $0x20] sm:$0xff]   ;;  %v3017_v17 = vrot.slane %v3015_v40, 2  ;;  %v3054_v40 = vshll.u32 %v7631_v43, 16 }
  0xe3   : > { %6578 = vmatprep.mubr.msk.bf16.mxu0 %vm504_vm2, %v2968_v9  ;;  %v1407_v63 = vrot.slane %v7035_v16, 1  ;;  %v3004_v9 = vsel %vm2915_vm6, %v2994_v41, %v3003_v44  ;;  %v3030_v41 = vor.u32 %v3029_v18, %v3026_v37  ;;  %v3051_v44 = vshrl.u32 %v7631_v43, 16  ;;  %v7041_v18 = vld [vmem:[%s7138_s30 + $0x50] sm:$0xff]  }
  0xe4   : > { %v3021_v49 = vor.u32 %v3020_v48, %v3017_v17  ;;  %v1415_v16 = vrot.slane %v7039_v51, 1  ;;  %v3056_v17 = vrot.slane %v3054_v40, 3  ;;  %v3065_v37 = vrot.slane %v3063_v58, 3  ;;  %v7042_v40 = vld [vmem:[%s7138_s30 + $0x58] sm:$0xff]  }
  0xe5   : > { %v1421_v39 = vrot.slane %v7042_v40, 1  ;;  %v1824_v40 = vshrl.u32 %v7433_v57, 16 }
  0xe7   : > { %6409 = vmatmul.mubr.msk.bf16.gmra.mrb[28].mxu1 %vm504_vm2, %v995_v24  ;;  %v1406_v24 = vsel %vm962_vm5, %v1403_v0, %v1405_v19  ;;  %v1411_v0 = vrot.slane %v7037_v10, 1  ;;  %v1419_v10 = vrot.slane %v7041_v18, 1  ;;  %v3372_v18 = vrot.slane %v7529_v28, 3 }
  0xe8   : > { %6412 = vmatprep.mubr.msk.bf16.mxu1 %vm504_vm2, %v997_v56  ;;  %v1408_v56 = vsel %vm962_vm5, %v1405_v19, %v1407_v63  ;;  %v3031_v19 = vsel %vm2915_vm6, %v3021_v49, %v3030_v41 }
  0xe9   : > { %v1414_v48 = vsel %vm962_vm5, %v1411_v0, %v1413_v29  ;;  %v3373_v53 = vsel %vm3362_vm7, %v3370_v50, %v3372_v18 }
  0xea   : > { %6579 = vmatmul.mubr.msk.bf16.gmra.mrb[8].mxu0 %vm504_vm2, %v2977_v6  ;;  %v7036_v6 = vld [vmem:[%s7138_s30 + $0x28] sm:$0xff]  }
  0xeb   : > { %6582 = vmatprep.mubr.msk.bf16.mxu0 %vm504_vm2, %v2986_v25  ;;  %v1409_v30 = vrot.slane %v7036_v6, 1  ;;  %v3022_v25 = vsel %vm2915_vm6, %v3012_v54, %v3021_v49  ;;  %v1416_v54 = vsel %vm962_vm5, %v1413_v29, %v1415_v16  ;;  %v3069_v49 = vshrl.u32 %v7648_v14, 16 }
  0xec   : > { %v1417_v6 = vrot.slane %v7040_v11, 1  ;;  %v1429_v11 = vrot.slane %v7451_v7, 1 }
  0xed   : > { %v3071_v45 = vrot.slane %v3069_v49, 2 }
  0xef   : > { %6413 = vmatmul.mubr.msk.bf16.gmra.mrb[32].mxu1 %vm504_vm2, %v999_v35  ;;  %v1410_v35 = vsel %vm962_vm5, %v1407_v63, %v1409_v30  ;;  %v3040_v63 = vsel %vm2915_vm6, %v3030_v41, %v3039_v20 }
  0xf0   : > { %6418 = vmatprep.mubr.msk.bf16.mxu1 %vm504_vm2, %v1404_v27  ;;  %v3042_v27 = vshrl.u32 %v7626_v36, 16 }
  0xf2   : > { %6583 = vmatmul.mubr.msk.bf16.gmra.mrb[12].mxu0 %vm504_vm2, %v2995_v33  ;;  %v3044_v33 = vrot.slane %v3042_v27, 2 }
  0xf3   : > { %6586 = vmatprep.mubr.msk.bf16.mxu0 %vm504_vm2, %v3004_v9  ;;  %v3053_v9 = vrot.slane %v3051_v44, 2  ;;  %v3356_v44 = vld [vmem:[%s7138_s30 + $0x10] sm:$0x8] }
  0xf5   : > { %v3057_v34 = vor.u32 %v3056_v17, %v3053_v9 }
  0xf7   : > { %6419 = vmatmul.mubr.msk.bf16.vlgmr.msra.gmra.mrb[0].mxu1 %vm504_vm2, %v1406_v24  ;;  %v3048_v24 = vor.u32 %v3047_v61, %v3044_v33  ;;  %v1423_v61 = vrot.slane %v7414_v55, 1 }
  0xf8   : > { %6422 = vmatprep.mubr.msk.bf16.mxu1 %vm504_vm2, %v1408_v56  ;;  %6645 = vmatpush3.bf16.msra.mxu1 %v7120_v2  ;;  %v1412_v2 = vsel %vm962_vm5, %v1409_v30, %v1411_v0  ;;  %v3060_v56 = vshrl.u32 %v7644_v62, 16  ;;  %v7784_v0 = vld [vmem:[%s7138_s30 + $0xa0] ss:$0 sps:$4 sm:$0x77]  }
  0xf9   : > { %v3049_v30 = vsel %vm2915_vm6, %v3039_v20, %v3048_v24  ;;  %v3078_v27 = vshrl.u32 %v7784_v0, 16  ;;  %v3081_v32 = vshll.u32 %v7784_v0, 16  ;;  %v3075_v20 = vor.u32 %v3074_v23, %v3071_v45 }
  0xfa   : > { %6587 = vmatmul.mubr.msk.bf16.gmra.mrb[16].mxu0 %vm504_vm2, %v3013_v42  ;;  %v3062_v42 = vrot.slane %v3060_v56, 2  ;;  %v1424_v17 = vsel %vm962_vm5, %v1421_v39, %v1423_v61  ;;  %v1427_v56 = vrot.slane %v7439_v60, 1  ;;  %v1435_v45 = vrot.slane %v7471_v26, 1 }
  0xfb   : > { %6590 = vmatprep.mubr.msk.bf16.mxu0 %vm504_vm2, %v3022_v25  ;;  %v3058_v25 = vsel %vm2915_vm6, %v3048_v24, %v3057_v34  ;;  %v3083_v33 = vrot.slane %v3081_v32, 3  ;;  %v3364_v24 = vrot.slane %v7494_v38, 3  ;;  %v3366_v38 = vrot.slane %v7507_v46, 3 }
  0xfc   : > { %v3066_v41 = vor.u32 %v3065_v37, %v3062_v42  ;;  %v1430_v46 = vsel %vm962_vm5, %v1427_v56, %v1429_v11  ;;  %v1815_v23 = vshrl.u32 %v7414_v55, 16 }
  0xfd   : > { %v3369_v42 = vsel %vm3362_vm7, %v3366_v38, %v3368_v4 }
  0xfe   : > { %v3067_v29 = vsel %vm2915_vm6, %v3057_v34, %v3066_v41  ;;  %v3076_v51 = vsel %vm2915_vm6, %v3066_v41, %v3075_v20  ;;  %v7031_v41 = vld [vmem:[%s7138_s30 + $0x98] ss:$0 sps:$4 sm:$0x11]   ;;  %v1817_v32 = vrot.slane %v1815_v23, 1 }
  0xff   : > { %6423 = vmatmul.mubr.msk.bf16.gmra.mrb[4].mxu1 %vm504_vm2, %v1410_v35  ;;  %v1418_v35 = vsel %vm962_vm5, %v1415_v16, %v1417_v6  ;;  %v6043_v16 = vcombine.low %v3356_v44, %v7481_v31  ;;  %v3376_v44 = vrot.slane %v7552_v1, 3 }
 0x100   : > { %6426 = vmatprep.mubr.msk.bf16.mxu1 %vm504_vm2, %v1412_v2  ;;  %v1420_v2 = vsel %vm962_vm5, %v1417_v6, %v1419_v10  ;;  %v3367_v6 = vsel %vm3362_vm7, %v3364_v24, %v3366_v38 }
 0x102   : > { %6591 = vmatmul.mubr.msk.bf16.gmra.mrb[20].mxu0 %vm504_vm2, %v3031_v19  ;;  %v3080_v19 = vrot.slane %v3078_v27, 2 }
 0x103   : > { %6594 = vmatprep.mubr.msk.bf16.mxu0 %vm504_vm2, %v3040_v63  ;;  %v1422_v63 = vsel %vm962_vm5, %v1419_v10, %v1421_v39  ;;  %v1433_v10 = vrot.slane %v7467_v22, 1  ;;  %v1827_v39 = vshll.u32 %v7433_v57, 16 }
 0x104   : > { %v3084_v9 = vor.u32 %v3083_v33, %v3080_v19  ;;  %v1836_v33 = vshll.u32 %v7439_v60, 16 }
 0x105   : > { %v1436_v27 = vsel %vm962_vm5, %v1433_v10, %v1435_v45 }
 0x106   : > { %v3085_v31 = vsel %vm2915_vm6, %v3075_v20, %v3084_v9 }
 0x107   : > { %6427 = vmatmul.mubr.msk.bf16.gmra.mrb[8].mxu1 %vm504_vm2, %v1414_v48  ;;  %v3363_v48 = vrot.slane %v6043_v16, 3  ;;  %v1829_v16 = vrot.slane %v1827_v39, 2 }
 0x108   : > { %6430 = vmatprep.mubr.msk.bf16.mxu1 %vm504_vm2, %v1416_v54  ;;  %v1425_v54 = vrot.slane %v7433_v57, 1 }
 0x109   : > { %v3365_v58 = vsel %vm3362_vm7, %v3363_v48, %v3364_v24  ;;  %v3380_v48 = vrot.slane %v7571_v8, 3  ;;  %v1842_v24 = vshrl.u32 %v7451_v7, 16 }
 0x10a   : > { %6595 = vmatmul.mubr.msk.bf16.gmra.mrb[24].mxu0 %vm504_vm2, %v3049_v30  ;;  %v1426_v34 = vsel %vm962_vm5, %v1423_v61, %v1425_v54  ;;  %v1428_v49 = vsel %vm962_vm5, %v1425_v54, %v1427_v56  ;;  %v1431_v30 = vrot.slane %v7455_v12, 1  ;;  %v1845_v54 = vshll.u32 %v7451_v7, 16 }
 0x10b   : > { %6598 = vmatprep.mubr.msk.bf16.mxu0 %vm504_vm2, %v3058_v25  ;;  %v3371_v25 = vsel %vm3362_vm7, %v3368_v4, %v3370_v50 }
 0x10c   : > { %v1432_v37 = vsel %vm962_vm5, %v1429_v11, %v1431_v30  ;;  %v1434_v28 = vsel %vm962_vm5, %v1431_v30, %v1433_v10  ;;  %v1847_v38 = vrot.slane %v1845_v54, 2  ;;  %v1860_v30 = vshrl.u32 %v7467_v22, 16 }
 0x10e   : > { %v1862_v10 = vrot.slane %v1860_v30, 1 }
 0x10f   : > { %6431 = vmatmul.mubr.msk.bf16.gmra.mrb[12].mxu1 %vm504_vm2, %v1418_v35  ;;  %v1818_v35 = vshll.u32 %v7414_v55, 16  ;;  %v1437_v55 = vrot.slane %v7031_v41, 1  ;;  %v1881_v41 = vshll.u32 %v7487_v59, 16 }
 0x110   : > { %6434 = vmatprep.mubr.msk.bf16.mxu1 %vm504_vm2, %v1420_v2  ;;  %v3374_v2 = vrot.slane %v7548_v3, 3  ;;  %v1833_v3 = vshrl.u32 %v7439_v60, 16 }
 0x111   : > { %v1820_v20 = vrot.slane %v1818_v35, 2  ;;  %v1438_v1 = vsel %vm962_vm5, %v1435_v45, %v1437_v55  ;;  %v3386_v45 = vrot.slane %v7604_v5, 3 }
 0x112   : > { %6599 = vmatmul.mubr.msk.bf16.gmra.mrb[28].mxu0 %vm504_vm2, %v3067_v29  ;;  %v3375_v29 = vsel %vm3362_vm7, %v3372_v18, %v3374_v2  ;;  %v3377_v61 = vsel %vm3362_vm7, %v3374_v2, %v3376_v44  ;;  %v1835_v9 = vrot.slane %v1833_v3, 1  ;;  %v3396_v3 = vrot.slane %v7648_v14, 3 }
 0x113   : > { %6602 = vmatprep.mubr.msk.bf16.mxu0 %vm504_vm2, %v3076_v51  ;;  %v1821_v19 = vor.u32 %v1820_v20, %v1817_v32  ;;  %v1826_v51 = vrot.slane %v1824_v40, 1  ;;  %v3392_v40 = vrot.slane %v7631_v43, 3 }
 0x115   : > { %v1822_v57 = vsel %vm1715_vm3, %v7328_v15, %v1821_v19  ;;  %v1830_v60 = vor.u32 %v1829_v16, %v1826_v51  ;;  %v1854_v15 = vshll.u32 %v7455_v12, 16 }
 0x117   : > { %6435 = vmatmul.mubr.msk.bf16.gmra.mrb[16].mxu1 %vm504_vm2, %v1422_v63  ;;  %v3378_v63 = vrot.slane %v7566_v13, 3  ;;  %v1851_v13 = vshrl.u32 %v7455_v12, 16  ;;  %v1831_v8 = vsel %vm1715_vm3, %v1821_v19, %v1830_v60  ;;  %v1856_v11 = vrot.slane %v1854_v15, 2 }
 0x118   : > { %6438 = vmatprep.mubr.msk.bf16.mxu1 %vm504_vm2, %v1424_v17  ;;  %v1838_v17 = vrot.slane %v1836_v33, 2  ;;  %v7067_v15 = vmov 1983009808  }
 0x119   : > { %v1853_v4 = vrot.slane %v1851_v13, 1 }
 0x11a   : > { %6603 = vmatmul.mubr.msk.bf16.gmra.mrb[32].mxu0 %vm504_vm2, %v3085_v31  ;;  %v3379_v31 = vsel %vm3362_vm7, %v3376_v44, %v3378_v63  ;;  %v1839_v56 = vor.u32 %v1838_v17, %v1835_v9  ;;  %v3390_v44 = vrot.slane %v7626_v36, 3  ;;  %v3394_v36 = vrot.slane %v7644_v62, 3 }
 0x11b   : > { %6608 = vmatprep.mubr.msk.bf16.mxu0 %vm504_vm2, %v3365_v58  ;;  %v3381_v58 = vsel %vm3362_vm7, %v3378_v63, %v3380_v48  ;;  %v1857_v50 = vor.u32 %v1856_v11, %v1853_v4 }
 0x11c   : > { %v1840_v7 = vsel %vm1715_vm3, %v1830_v60, %v1839_v56  ;;  %v3395_v43 = vsel %vm3362_vm7, %v3392_v40, %v3394_v36  ;;  %v3397_v33 = vsel %vm3362_vm7, %v3394_v36, %v3396_v3 }
 0x11f   : > { %6439 = vmatmul.mubr.msk.bf16.gmra.mrb[20].mxu1 %vm504_vm2, %v1426_v34  ;;  %v1844_v34 = vrot.slane %v1842_v24, 1 }
 0x120   : > { %6442 = vmatprep.mubr.msk.bf16.mxu1 %vm504_vm2, %v1428_v49  ;;  %v3382_v49 = vrot.slane %v7584_v47, 3  ;;  %v1869_v47 = vshrl.u32 %v7471_v26, 16 }
 0x121   : > { %v1848_v12 = vor.u32 %v1847_v38, %v1844_v34 }
 0x122   : > { %6609 = vmatmul.mubr.msk.bf16.vlgmr.msra.gmra.mrb[0].mxu0 %vm504_vm2, %v3367_v6  ;;  %v3384_v6 = vrot.slane %v7589_v52, 3  ;;  %v1871_v23 = vrot.slane %v1869_v47, 1 }
 0x123   : > { %6612 = vmatprep.mubr.msk.bf16.mxu0 %vm504_vm2, %v3369_v42  ;;  %v1863_v42 = vshll.u32 %v7467_v22, 16  ;;  %v1849_v52 = vsel %vm1715_vm3, %v1839_v56, %v1848_v12  ;;  %v1858_v22 = vsel %vm1715_vm3, %v1848_v12, %v1857_v50  ;;  %v6063_v12 = vld [vmem:[%s8687_s3] ss:$0 sm:$0xff] }
 0x124   : > { %v3385_v18 = vsel %vm3362_vm7, %v3382_v49, %v3384_v6  ;;  %v3387_v2 = vsel %vm3362_vm7, %v3384_v6, %v3386_v45  ;;  %v6062_v6 = vld [vmem:[%s8686_s2] ss:$0 sm:$0xff] }
 0x127   : > { %6443 = vmatmul.mubr.msk.bf16.gmra.mrb[24].mxu1 %vm504_vm2, %v1430_v46  ;;  %v3383_v46 = vsel %vm3362_vm7, %v3380_v48, %v3382_v49 }
 0x128   : > { %6446 = vmatprep.mubr.msk.bf16.mxu1 %vm504_vm2, %v1432_v37  ;;  %v1872_v37 = vshll.u32 %v7471_v26, 16 }
 0x12a   : > { %6613 = vmatmul.mubr.msk.bf16.gmra.mrb[4].mxu0 %vm504_vm2, %v3371_v25  ;;  %v1865_v25 = vrot.slane %v1863_v42, 2  ;;  %v1874_v35 = vrot.slane %v1872_v37, 2  ;;  %v4444_v42 = vcombine.high %v6062_v6, %v6062_v6 }
 0x12b   : > { %6616 = vmatprep.mubr.msk.bf16.mxu0 %vm504_vm2, %v3373_v53  ;;  %v3388_v53 = vrot.slane %v7613_v21, 3  ;;  %v1883_v21 = vrot.slane %v1881_v41, 2 }
 0x12c   : > { %v1866_v26 = vor.u32 %v1865_v25, %v1862_v10 }
 0x12d   : > { %v3389_v5 = vsel %vm3362_vm7, %v3386_v45, %v3388_v53  ;;  %v3391_v39 = vsel %vm3362_vm7, %v3388_v53, %v3390_v44 }
 0x12e   : > { %v1867_v32 = vsel %vm1715_vm3, %v1857_v50, %v1866_v26 }
 0x12f   : > { %6447 = vmatmul.mubr.msk.bf16.gmra.mrb[28].mxu1 %vm504_vm2, %v1434_v28  ;;  %v1878_v28 = vshrl.u32 %v7487_v59, 16 }
 0x130   : > { %6450 = vmatprep.mubr.msk.bf16.mxu1 %vm504_vm2, %v1436_v27  ;;  %v1875_v27 = vor.u32 %v1874_v35, %v1871_v23 }
 0x131   : > { %v1880_v20 = vrot.slane %v1878_v28, 1 }
 0x132   : > { %6617 = vmatmul.mubr.msk.bf16.gmra.mrb[8].mxu0 %vm504_vm2, %v3375_v29  ;;  %v1876_v55 = vsel %vm1715_vm3, %v1866_v26, %v1875_v27  ;;  %v3393_v29 = vsel %vm3362_vm7, %v3390_v44, %v3392_v40 }
 0x133   : > { %6620 = vmatprep.mubr.msk.bf16.mxu0 %vm504_vm2, %v3377_v61  ;;  %v1884_v59 = vor.u32 %v1883_v21, %v1880_v20  ;;  %v3398_v61 = vrot.slane %v7784_v0, 3 }
 0x135   : > { %v1885_v19 = vsel %vm1715_vm3, %v1875_v27, %v1884_v59 }
 0x137   : > { %6451 = vmatmul.mubr.msk.bf16.gmra.mrb[32].mxu1 %vm504_vm2, %v1438_v1  ;;  %v3399_v1 = vsel %vm3362_vm7, %v3396_v3, %v3398_v61 }
 0x138   : > { %6476 = vmatprep.mubr.msk.bf16.mxu1 %vm504_vm2, %v1822_v57 }
 0x13a   : > { %6621 = vmatmul.mubr.msk.bf16.gmra.mrb[12].mxu0 %vm504_vm2, %v3379_v31 }
 0x13b   : > { %6624 = vmatprep.mubr.msk.bf16.mxu0 %vm504_vm2, %v3381_v58  ;;  %v3708_v58 = vunpack.c.l.s4 %v7067_v15 }
 0x13d   : > { %v3709_v4 = vunpack.c.0.s8 %v3708_v58 }
 0x13f   : > { %6477 = vmatmul.mubr.msk.bf16.vlgmr.msra.gmra.mrb[20].mxu1 %vm504_vm2, %v1831_v8  ;;  %v3710_v8 = vlaneseq }
 0x140   : > { %6480 = vmatprep.mubr.msk.bf16.mxu1 %vm504_vm2, %v1840_v7 }
 0x141   : > { %v3711_v11 = vshrl.u32 %v3710_v8, 7 }
 0x142   : > { %6625 = vmatmul.mubr.msk.bf16.gmra.mrb[16].mxu0 %vm504_vm2, %v3383_v46  ;;  %v4599_v46 = vcombine.high %v6063_v12, %v6063_v12 }
 0x143   : > { %6628 = vmatprep.mubr.msk.bf16.mxu0 %vm504_vm2, %v3385_v18  ;;  %v7955_v30 = vsub.s32 %v3709_v4, %v3711_v11 }
 0x145   : > { %v7958_v50 = vrot.slane %v6062_v6, %v7955_v30  ;;  %v7961_v47 = vrot.slane %v4444_v42, %v7955_v30  ;;  %v7964_v37 = vrot.slane %v6063_v12, %v7955_v30 }
 0x147   : > { %6481 = vmatmul.mubr.msk.bf16.gmra.mrb[24].mxu1 %vm504_vm2, %v1849_v52  ;;  %v7967_v52 = vrot.slane %v4599_v46, %v7955_v30  ;;  %v7971_v45 = vcombine.high %v7958_v50, %v7958_v50  ;;  %v7975_v23 = vcombine.high %v7961_v47, %v7961_v47  ;;  %v7980_v28 = vcombine.high %v7964_v37, %v7964_v37 }
 0x148   : > { %6484 = vmatprep.mubr.msk.bf16.mxu1 %vm504_vm2, %v1858_v22 }
 0x14a   : > { %6629 = vmatmul.mubr.msk.bf16.gmra.mrb[20].mxu0 %vm504_vm2, %v3387_v2 }
 0x14b   : > { %6632 = vmatprep.mubr.msk.bf16.mxu0 %vm504_vm2, %v3389_v5 }
 0x14f   : > { %6485 = vmatmul.mubr.msk.bf16.gmra.mrb[28].mxu1 %vm504_vm2, %v1867_v32  ;;  %v7985_v32 = vcombine.high %v7967_v52, %v7967_v52 }
 0x150   : > { %6488 = vmatprep.mubr.msk.bf16.mxu1 %vm504_vm2, %v1876_v55 }
 0x152   : > { %6633 = vmatmul.mubr.msk.bf16.gmra.mrb[24].mxu0 %vm504_vm2, %v3391_v39 }
 0x153   : > { %6636 = vmatprep.mubr.msk.bf16.mxu0 %vm504_vm2, %v3393_v29 }
 0x157   : > { %6489 = vmatmul.mubr.msk.bf16.gmra.mrb[32].mxu1 %vm504_vm2, %v1885_v19 }
 0x15a   : > { %6637 = vmatmul.mubr.msk.bf16.gmra.mrb[28].mxu0 %vm504_vm2, %v3395_v43 }
 0x15b   : > { %6640 = vmatprep.mubr.msk.bf16.mxu0 %vm504_vm2, %v3397_v33 }
 0x162   : > { %6641 = vmatmul.mubr.msk.bf16.gmra.mrb[32].mxu0 %vm504_vm2, %v3399_v1 }
 0x1ca   : > { %v6420_v51 = vpop.f32.mrb[0].mxu1 }
 0x1cb   : > { %v1530_v62 = vpop.f32.mrb[1].mxu1 }
 0x1cc   : > { %v6421_v16 = vpop.f32.mrb[2].mxu1 }
 0x1cd   : > { %v1533_v14 = vpop.f32.mrb[3].mxu1 }
 0x1d2   : > { %v7917_v63 = vpop.f32.mrb[4].mxu1 }
 0x1d3   : > { %v7919_v57 = vpop.f32.mrb[5].mxu1 }
 0x1d4   : > { %v7921_v9 = vpop.f32.mrb[6].mxu1 }
 0x1d5   : > { %v7923_v17 = vpop.f32.mrb[7].mxu1 }
 0x1da   : > { %v7925_v48 = vpop.f32.mrb[8].mxu1 }
 0x1db   : > { %v7927_v60 = vpop.f32.mrb[9].mxu1 }
 0x1dc   : > { %v7929_v0 = vpop.f32.mrb[10].mxu1 }
 0x1dd   : > { %v7931_v24 = vpop.f32.mrb[11].mxu1 }
 0x1e2   : > { %v7933_v54 = vpop.f32.mrb[12].mxu1 }
 0x1e3   : > { %v7935_v31 = vpop.f32.mrb[13].mxu1 }
 0x1e4   : > { %v7937_v56 = vpop.f32.mrb[14].mxu1 }
 0x1e5   : > { %v7939_v13 = vpop.f32.mrb[15].mxu1 }
 0x1ea   : > { %v7941_v34 = vpop.f32.mrb[16].mxu1 }
 0x1eb   : > { %v7943_v38 = vpop.f32.mrb[17].mxu1 }
 0x1ec   : > { %v7945_v49 = vpop.f32.mrb[18].mxu1 }
 0x1ed   : > { %v7947_v7 = vpop.f32.mrb[19].mxu1 }
 0x1f5   : > { %v6610_v18 = vpop.f32.mrb[0].mxu0 }
 0x1f6   : > { %v6646_v10 = vadd.f32 %v6610_v18, %v6420_v51  ;;  %v3491_v25 = vpop.f32.mrb[1].mxu0 }
 0x1f7   : > { %v6647_v22 = vadd.f32 %v3491_v25, %v1530_v62  ;;  %v6611_v35 = vpop.f32.mrb[2].mxu0 }
 0x1f8   : > { %v3740_v53 = vcombine.high %v6646_v10, %v6646_v10  ;;  %v3747_v26 = vrot.slane %v6646_v10, %v7955_v30  ;;  %v6648_v41 = vadd.f32 %v6611_v35, %v6421_v16  ;;  %v3494_v2 = vpop.f32.mrb[3].mxu0 }
 0x1f9   : > { %v3706_v27 = vcombine.high %v6647_v22, %v6647_v22  ;;  %v3713_v5 = vrot.slane %v6647_v22, %v7955_v30  ;;  %v6649_v20 = vadd.f32 %v3494_v2, %v1533_v14 }
 0x1fa   : > { %v3754_v21 = vrot.slane %v3740_v53, %v7955_v30  ;;  %v3755_v44 = vcombine.high %v3747_v26, %v3747_v26  ;;  %v3757_v55 = vcombine.high %v6648_v41, %v6648_v41  ;;  %v3764_v40 = vrot.slane %v6648_v41, %v7955_v30 }
 0x1fb   : > { %v3720_v59 = vrot.slane %v3706_v27, %v7955_v30  ;;  %v3721_v39 = vcombine.high %v3713_v5, %v3713_v5  ;;  %v4465_v29 = vmul.f32 %v7958_v50, %v3713_v5  ;;  %v3723_v19 = vcombine.high %v6649_v20, %v6649_v20 }
 0x1fc   : > { %v3756_v36 = vcombine.high %v3754_v21, %v3754_v21  ;;  %v4473_v3 = vmul.f32 %v7958_v50, %v3755_v44  ;;  %v4474_v43 = vmul.f32 %v7971_v45, %v3754_v21  ;;  %v3771_v33 = vrot.slane %v3757_v55, %v7955_v30 }
 0x1fd   : > { %v3722_v61 = vcombine.high %v3720_v59, %v3720_v59  ;;  %v4466_v1 = vmul.f32 %v7971_v45, %v3721_v39  ;;  %v4467_v51 = vmul.f32 %v7961_v47, %v3720_v59  ;;  %v4620_v62 = vadd.f32 %v7964_v37, %v4465_v29  ;;  %v6614_v16 = vpop.f32.mrb[4].mxu0 }
 0x1fe   : > { %v4475_v14 = vmul.f32 %v7961_v47, %v3756_v36  ;;  %v4628_v15 = vadd.f32 %v7964_v37, %v4473_v3  ;;  %v4629_v58 = vadd.f32 %v7980_v28, %v4474_v43  ;;  %v3772_v8 = vcombine.high %v3764_v40, %v3764_v40  ;;  %v8000_v4 = vpop.f32.mrb[5].mxu0 }
 0x1ff   : > { %v4468_v11 = vmul.f32 %v7975_v23, %v3722_v61  ;;  %v4621_v6 = vadd.f32 %v7980_v28, %v4466_v1  ;;  %v4622_v12 = vadd.f32 %v7967_v52, %v4467_v51  ;;  %v4748_v42 = vmax.f32 %v4620_v62, 0.0  ;;  %v8005_v46 = vpop.f32.mrb[6].mxu0 }
 0x200   : > { %v4630_v18 = vadd.f32 %v7967_v52, %v4475_v14  ;;  %v4756_v10 = vmax.f32 %v4628_v15, 0.0  ;;  %v4757_v25 = vmax.f32 %v4629_v58, 0.0  ;;  %v3773_v22 = vcombine.high %v3771_v33, %v3771_v33  ;;  %v8008_v35 = vpop.f32.mrb[7].mxu0 }
 0x201   : > { %v4623_v53 = vadd.f32 %v7985_v32, %v4468_v11  ;;  %v4749_v26 = vmax.f32 %v4621_v6, 0.0  ;;  %v4750_v41 = vmax.f32 %v4622_v12, 0.0  ;;  %v4476_v2 = vmul.f32 %v7975_v23, %v3764_v40 }
 0x202   : > { %v5038_v27 = vcombine.low %v4756_v10, %v4757_v25  ;;  %v4477_v5 = vmul.f32 %v7958_v50, %v3772_v8  ;;  %v4478_v21 = vmul.f32 %v7971_v45, %v3771_v33  ;;  %v4479_v44 = vmul.f32 %v7961_v47, %v3773_v22 }
 0x203   : > { %v4751_v55 = vmax.f32 %v4623_v53, 0.0  ;;  %v5004_v59 = vcombine.low %v4748_v42, %v4749_v26  ;;  %v4631_v39 = vadd.f32 %v7985_v32, %v4476_v2  ;;  %v4758_v29 = vmax.f32 %v4630_v18, 0.0 }
 0x204   : > { %v5046_v36 = vrot.slane %v5038_v27, %v7955_v30  ;;  %v4632_v3 = vadd.f32 %v7964_v37, %v4477_v5  ;;  %v4633_v40 = vadd.f32 %v7980_v28, %v4478_v21  ;;  %v8020_v43 = vadd.f32 %v7967_v52, %v4479_v44 }
 0x205   : > { %v5005_v61 = vcombine.low %v4750_v41, %v4751_v55  ;;  %v5012_v33 = vrot.slane %v5004_v59, %v7955_v30  ;;  %v4759_v1 = vmax.f32 %v4631_v39, 0.0  ;;  %v3730_v51 = vrot.slane %v6649_v20, %v7955_v30  ;;  %v8024_v62 = vpop.f32.mrb[8].mxu0 }
 0x206   : > { %v4760_v14 = vmax.f32 %v4632_v3, 0.0  ;;  %v4761_v15 = vmax.f32 %v4633_v40, 0.0  ;;  %v3737_v58 = vrot.slane %v3723_v19, %v7955_v30  ;;  %v6650_v8 = vadd.f32 %v6614_v16, %v7917_v63  ;;  %v8028_v11 = vpop.f32.mrb[9].mxu0 }
 0x207   : > { %v5019_v6 = vrot.slane %v5005_v61, %v7955_v30  ;;  %v5039_v12 = vcombine.low %v4758_v29, %v4759_v1  ;;  %v3738_v42 = vcombine.high %v3730_v51, %v3730_v51  ;;  %v4469_v18 = vmul.f32 %v7958_v50, %v3730_v51  ;;  %v8033_v10 = vpop.f32.mrb[10].mxu0 }
 0x208   : > { %v8035_v20 = vcombine.low %v4760_v14, %v4761_v15  ;;  %v3739_v25 = vcombine.high %v3737_v58, %v3737_v58  ;;  %v4471_v22 = vmul.f32 %v7961_v47, %v3737_v58  ;;  %v3807_v53 = vcombine.high %v6650_v8, %v6650_v8  ;;  %v8038_v19 = vpop.f32.mrb[11].mxu0 }
 0x209   : > { %v5020_v63 = vcombine.low %v5012_v33, %v5019_v6  ;;  %v5053_v16 = vrot.slane %v5039_v12, %v7955_v30  ;;  %v4470_v26 = vmul.f32 %v7971_v45, %v3738_v42  ;;  %v4624_v41 = vadd.f32 %v7964_v37, %v4469_v18 }
 0x20a   : > { %v5063_v2 = vrot.slane %v8035_v20, %v7955_v30  ;;  %v4472_v27 = vmul.f32 %v7975_v23, %v3739_v25  ;;  %v4626_v5 = vadd.f32 %v7967_v52, %v4471_v22  ;;  %v3814_v21 = vrot.slane %v6650_v8, %v7955_v30 }
 0x20b   : > { %v6099_v44 = vpack.c.bf16 %v5020_v63, %v5020_v63  ;;  %v5054_v55 = vcombine.low %v5046_v36, %v5053_v16  ;;  %v4625_v59 = vadd.f32 %v7980_v28, %v4470_v26  ;;  %v4752_v39 = vmax.f32 %v4624_v41, 0.0 }
 0x20c   : > { %v4627_v29 = vadd.f32 %v7985_v32, %v4472_v27  ;;  %v4754_v3 = vmax.f32 %v4626_v5, 0.0  ;;  %v3821_v40 = vrot.slane %v3807_v53, %v7955_v30  ;;  %v3822_v61 = vcombine.high %v3814_v21, %v3814_v21 }
 0x20d   : > { %5709 = vst.msk [vmem:[%s8046_s27] sm:$0xf] %vm5708_vm8, %v6099_v44  ;;  %v6101_v33 = vpack.c.bf16 %v5054_v55, %v5054_v55  ;;  %v4753_v1 = vmax.f32 %v4625_v59, 0.0  ;;  %v4487_v51 = vmul.f32 %v7961_v47, %v3814_v21  ;;  %v6651_v14 = vadd.f32 %v8000_v4, %v7919_v57  ;;  %v8061_v36 = vpop.f32.mrb[12].mxu0 }
 0x20e   : > { %v4755_v15 = vmax.f32 %v4627_v29, 0.0  ;;  %v3823_v58 = vcombine.high %v3821_v40, %v3821_v40  ;;  %v4488_v8 = vmul.f32 %v7975_v23, %v3822_v61  ;;  %v4762_v6 = vmax.f32 %v8020_v43, 0.0  ;;  %v8065_v12 = vpop.f32.mrb[13].mxu0 }
 0x20f   : > { %5711 = vst.msk [vmem:[%s8046_s27 + $0x8] sm:$0xf] %vm5708_vm8, %v6101_v33  ;;  %v5021_v42 = vcombine.low %v4752_v39, %v4753_v1  ;;  %v4642_v18 = vadd.f32 %v7967_v52, %v4487_v51  ;;  %v3774_v25 = vcombine.high %v6651_v14, %v6651_v14  ;;  %v3781_v22 = vrot.slane %v6651_v14, %v7955_v30  ;;  %v8071_v53 = vpop.f32.mrb[14].mxu0 }
 0x210   : > { %v5022_v57 = vcombine.low %v4754_v3, %v4755_v15  ;;  %v4489_v4 = vmul.f32 %v7958_v50, %v3823_v58  ;;  %v4643_v63 = vadd.f32 %v7985_v32, %v4488_v8  ;;  %v6652_v43 = vadd.f32 %v8005_v46, %v7921_v9  ;;  %v8077_v16 = vpop.f32.mrb[15].mxu0 }
 0x211   : > { %v5029_v41 = vrot.slane %v5021_v42, %v7955_v30  ;;  %v4770_v27 = vmax.f32 %v4642_v18, 0.0  ;;  %v3788_v5 = vrot.slane %v3774_v25, %v7955_v30  ;;  %v4480_v21 = vmul.f32 %v7975_v23, %v3781_v22 }
 0x212   : > { %v8079_v26 = vpop.f32.mrb[20].mxu1  ;;  %v5036_v55 = vrot.slane %v5022_v57, %v7955_v30  ;;  %v4644_v59 = vadd.f32 %v7964_v37, %v4489_v4  ;;  %v4771_v39 = vmax.f32 %v4643_v63, 0.0  ;;  %v3824_v29 = vcombine.high %v6652_v43, %v6652_v43 }
 0x213   : > { %v8084_v44 = vpop.f32.mrb[21].mxu1  ;;  %v3789_v46 = vcombine.high %v3788_v5, %v3788_v5  ;;  %v4481_v3 = vmul.f32 %v7958_v50, %v3788_v5  ;;  %v4635_v40 = vadd.f32 %v7985_v32, %v4480_v21  ;;  %v3831_v61 = vrot.slane %v6652_v43, %v7955_v30 }
 0x214   : > { %v8088_v9 = vpop.f32.mrb[22].mxu1  ;;  %v5037_v1 = vcombine.low %v5029_v41, %v5036_v55  ;;  %v4772_v51 = vmax.f32 %v4644_v59, 0.0  ;;  %v8095_v14 = vcombine.low %v4770_v27, %v4771_v39  ;;  %v3838_v15 = vrot.slane %v3824_v29, %v7955_v30 }
 0x215   : > { %v8093_v33 = vpop.f32.mrb[23].mxu1  ;;  %v4482_v58 = vmul.f32 %v7971_v45, %v3789_v46  ;;  %v4636_v8 = vadd.f32 %v7964_v37, %v4481_v3  ;;  %v4763_v42 = vmax.f32 %v4635_v40, 0.0  ;;  %v3839_v18 = vcombine.high %v3831_v61, %v3831_v61  ;;  %v8100_v25 = vpop.f32.mrb[16].mxu0 }
 0x216   : > { %v6100_v22 = vpack.c.bf16 %v5037_v1, %v5037_v1  ;;  %v3840_v4 = vcombine.high %v3838_v15, %v3838_v15  ;;  %v4490_v63 = vmul.f32 %v7971_v45, %v3831_v61  ;;  %v8105_v43 = vpop.f32.mrb[17].mxu0  ;;  %v4492_v59 = vmul.f32 %v7975_v23, %v3838_v15 }
 0x217   : > { %v4637_v41 = vadd.f32 %v7980_v28, %v4482_v58  ;;  %v4764_v27 = vmax.f32 %v4636_v8, 0.0  ;;  %v5056_v5 = vcombine.low %v4762_v6, %v4763_v42  ;;  %v4491_v21 = vmul.f32 %v7961_v47, %v3839_v18  ;;  %v8109_v55 = vpop.f32.mrb[18].mxu0 }
 0x218   : > { %5710 = vst.msk [vmem:[%s8046_s27 + $0x4] sm:$0xf] %vm5708_vm8, %v6100_v22  ;;  %v4493_v39 = vmul.f32 %v7958_v50, %v3840_v4  ;;  %v4645_v29 = vadd.f32 %v7980_v28, %v4490_v63  ;;  %v6653_v46 = vadd.f32 %v8008_v35, %v7923_v17  ;;  %v8118_v3 = vpop.f32.mrb[19].mxu0  ;;  %v6654_v58 = vadd.f32 %v8024_v62, %v7925_v48 }
 0x219   : > { %v4765_v6 = vmax.f32 %v4637_v41, 0.0  ;;  %v5070_v61 = vrot.slane %v5056_v5, %v7955_v30  ;;  %v4646_v1 = vadd.f32 %v7967_v52, %v4491_v21  ;;  %v4647_v8 = vadd.f32 %v7985_v32, %v4492_v59 }
 0x21a   : > { %v8120_v40 = vpop.f32.mrb[24].mxu1  ;;  %v8130_v42 = vadd.f32 %v7964_v37, %v4493_v39  ;;  %v4773_v17 = vmax.f32 %v4645_v29, 0.0  ;;  %v3790_v35 = vcombine.high %v6653_v46, %v6653_v46  ;;  %v3797_v48 = vrot.slane %v6653_v46, %v7955_v30 }
 0x21b   : > { %v8126_v15 = vpop.f32.mrb[25].mxu1  ;;  %v5071_v22 = vcombine.low %v5063_v2, %v5070_v61  ;;  %v8137_v4 = vcombine.low %v4764_v27, %v4765_v6  ;;  %v4774_v63 = vmax.f32 %v4646_v1, 0.0  ;;  %v4775_v41 = vmax.f32 %v4647_v8, 0.0 }
 0x21c   : > { %8689 = vst [vmem:[#allocation2_spill] sm:$0xff] %v8126_v15  ;;  %v8132_v18 = vpop.f32.mrb[26].mxu1  ;;  %v5106_v5 = vcombine.low %v4772_v51, %v4773_v17  ;;  %v3804_v21 = vrot.slane %v3790_v35, %v7955_v30  ;;  %v3874_v59 = vcombine.high %v6654_v58, %v6654_v58  ;;  %v3805_v57 = vcombine.high %v3797_v48, %v3797_v48 }
 0x21d   : > { %8690 = vst [vmem:[#allocation3_spill] sm:$0xff] %v8132_v18  ;;  %v8140_v62 = vpop.f32.mrb[27].mxu1  ;;  %v6102_v29 = vpack.c.bf16 %v5071_v22, %v5071_v22  ;;  %v4483_v20 = vmul.f32 %v7961_v47, %v3797_v48  ;;  %v8146_v2 = vpop.f32.mrb[20].mxu0  ;;  %v5107_v27 = vcombine.low %v4774_v63, %v4775_v41  ;;  %v3881_v17 = vrot.slane %v6654_v58, %v7955_v30 }
 0x21e   : > { %8691 = vst [vmem:[#allocation4_spill] sm:$0xff] %v8140_v62  ;;  %v5114_v46 = vrot.slane %v5106_v5, %v7955_v30  ;;  %v3806_v6 = vcombine.high %v3804_v21, %v3804_v21  ;;  %v4485_v61 = vmul.f32 %v7958_v50, %v3804_v21  ;;  %v8150_v1 = vpop.f32.mrb[21].mxu0  ;;  %v4484_v51 = vmul.f32 %v7975_v23, %v3805_v57 }
 0x21f   : > { %5712 = vst.msk [vmem:[%s8046_s27 + $0xc] sm:$0xf] %vm5708_vm8, %v6102_v29  ;;  %v4638_v8 = vadd.f32 %v7967_v52, %v4483_v20  ;;  %v3888_v35 = vrot.slane %v3874_v59, %v7955_v30  ;;  %v8158_v22 = vpop.f32.mrb[22].mxu0  ;;  %v5121_v63 = vrot.slane %v5107_v27, %v7955_v30  ;;  %v6655_v5 = vadd.f32 %v8028_v11, %v7927_v60 }
 0x220   : > { %v4486_v48 = vmul.f32 %v7971_v45, %v3806_v6  ;;  %v4640_v41 = vadd.f32 %v7964_v37, %v4485_v61  ;;  %v8165_v21 = vpop.f32.mrb[23].mxu0  ;;  %v4639_v29 = vadd.f32 %v7985_v32, %v4484_v51  ;;  %v3889_v20 = vcombine.high %v3881_v17, %v3881_v17 }
 0x221   : > { %v4766_v58 = vmax.f32 %v4638_v8, 0.0  ;;  %v3890_v59 = vcombine.high %v3888_v35, %v3888_v35  ;;  %v5122_v62 = vcombine.low %v5114_v46, %v5121_v63  ;;  %v4501_v61 = vmul.f32 %v7958_v50, %v3881_v17 }
 0x222   : > { %v8167_v57 = vpop.f32.mrb[28].mxu1  ;;  %v4641_v27 = vadd.f32 %v7980_v28, %v4486_v48  ;;  %v4768_v6 = vmax.f32 %v4640_v41, 0.0  ;;  %v4767_v60 = vmax.f32 %v4639_v29, 0.0  ;;  %v4502_v11 = vmul.f32 %v7971_v45, %v3889_v20 }
 0x223   : > { %8692 = vst [vmem:[#allocation5_spill] sm:$0xff] %v8167_v57  ;;  %v8170_v39 = vpop.f32.mrb[29].mxu1  ;;  %v4503_v57 = vmul.f32 %v7961_v47, %v3888_v35  ;;  %v4504_v51 = vmul.f32 %v7975_v23, %v3890_v59  ;;  %v6105_v15 = vpack.c.bf16 %v5122_v62, %v5122_v62  ;;  %v4656_v46 = vadd.f32 %v7964_v37, %v4501_v61 }
 0x224   : > { %8693 = vst [vmem:[#allocation6_spill] sm:$0xff] %v8170_v39  ;;  %v8174_v18 = vpop.f32.mrb[30].mxu1  ;;  %v4769_v39 = vmax.f32 %v4641_v27, 0.0  ;;  %v3841_v63 = vcombine.high %v6655_v5, %v6655_v5  ;;  %v5073_v48 = vcombine.low %v4766_v58, %v4767_v60  ;;  %v4657_v17 = vadd.f32 %v7980_v28, %v4502_v11 }
 0x225   : > { %8694 = vst [vmem:[#allocation7_spill] sm:$0xff] %v8174_v18  ;;  %v8179_v8 = vpop.f32.mrb[31].mxu1  ;;  %v4658_v41 = vadd.f32 %v7967_v52, %v4503_v57  ;;  %v4659_v29 = vadd.f32 %v7985_v32, %v4504_v51  ;;  %v8185_v18 = vpop.f32.mrb[24].mxu0  ;;  %5715 = vst.msk [vmem:[%s8046_s27 + $0x18] sm:$0xf] %vm5708_vm8, %v6105_v15  ;;  %v4784_v20 = vmax.f32 %v4656_v46, 0.0  ;;  %v3848_v59 = vrot.slane %v6655_v5, %v7955_v30 }
 0x226   : > { %8695 = vst [vmem:[#allocation8_spill] sm:$0xff] %v8179_v8  ;;  %v5089_v35 = vcombine.low %v4768_v6, %v4769_v39  ;;  %v3855_v62 = vrot.slane %v3841_v63, %v7955_v30  ;;  %v8191_v27 = vpop.f32.mrb[25].mxu0  ;;  %v5087_v58 = vrot.slane %v5073_v48, %v7955_v30  ;;  %v4785_v61 = vmax.f32 %v4657_v17, 0.0 }
 0x227   : > { %v4786_v60 = vmax.f32 %v4658_v41, 0.0  ;;  %v4787_v11 = vmax.f32 %v4659_v29, 0.0  ;;  %v8194_v57 = vpop.f32.mrb[26].mxu0  ;;  %v3856_v8 = vcombine.high %v3848_v59, %v3848_v59  ;;  %v4494_v15 = vmul.f32 %v7971_v45, %v3848_v59 }
 0x228   : > { %8696 = vst [vmem:[#allocation9_spill] sm:$0xff] %v8194_v57  ;;  %v5097_v51 = vrot.slane %v5089_v35, %v7955_v30  ;;  %v4496_v39 = vmul.f32 %v7975_v23, %v3855_v62  ;;  %v8199_v6 = vpop.f32.mrb[27].mxu0  ;;  %v8699_v46 = vrot.slane %v8137_v4, %v7955_v30  ;;  %v5157_v48 = vcombine.low %v4784_v20, %v4785_v61 }
 0x229   : > { %8697 = vst [vmem:[#allocation10_spill] sm:$0xff] %v8199_v6  ;;  %v5158_v17 = vcombine.low %v4786_v60, %v4787_v11  ;;  %v4776_v41 = vmax.f32 %v8130_v42, 0.0  ;;  %v8700_v35 = vrot.slane %v8095_v14, %v7955_v30  ;;  %v4495_v62 = vmul.f32 %v7961_v47, %v3856_v8 }
 0x22a   : > { %v8201_v5 = vpop.f32.mrb[32].mxu1  ;;  %v5088_v63 = vcombine.low %v8699_v46, %v5087_v58  ;;  %v4649_v6 = vadd.f32 %v7980_v28, %v4494_v15  ;;  %v5165_v20 = vrot.slane %v5157_v48, %v7955_v30  ;;  %v6656_v58 = vadd.f32 %v8033_v10, %v7929_v0 }
 0x22b   : > { %8698 = vst [vmem:[#allocation11_spill] sm:$0xff] %v8201_v5  ;;  %v8207_v29 = vpop.f32.mrb[33].mxu1  ;;  %v5105_v59 = vcombine.low %v5097_v51, %v8700_v35  ;;  %v4651_v5 = vadd.f32 %v7985_v32, %v4496_v39  ;;  %v5172_v42 = vrot.slane %v5158_v17, %v7955_v30  ;;  %v4650_v8 = vadd.f32 %v7967_v52, %v4495_v62 }
 0x22c   : > { %v8215_v57 = vpop.f32.mrb[34].mxu1  ;;  %v6103_v4 = vpack.c.bf16 %v5088_v63, %v5088_v63  ;;  %v4777_v60 = vmax.f32 %v4649_v6, 0.0  ;;  %v3891_v15 = vcombine.high %v6656_v58, %v6656_v58  ;;  %v3898_v39 = vrot.slane %v6656_v58, %v7955_v30 }
 0x22d   : > { %v8221_v61 = vpop.f32.mrb[35].mxu1  ;;  %v6104_v14 = vpack.c.bf16 %v5105_v59, %v5105_v59  ;;  %v4779_v11 = vmax.f32 %v4651_v5, 0.0  ;;  %v5173_v51 = vcombine.low %v5165_v20, %v5172_v42  ;;  %v6657_v46 = vadd.f32 %v8038_v19, %v7931_v24  ;;  %v8229_v63 = vpop.f32.mrb[28].mxu0 }
 0x22e   : > { %8701 = vst [vmem:[#allocation12_spill] sm:$0xff] %v8221_v61  ;;  %5713 = vst.msk [vmem:[%s8046_s27 + $0x10] sm:$0xf] %vm5708_vm8, %v6103_v4  ;;  %v4778_v0 = vmax.f32 %v4650_v8, 0.0  ;;  %v5123_v10 = vcombine.low %v4776_v41, %v4777_v60  ;;  %v6658_v6 = vadd.f32 %v8061_v36, %v7933_v54  ;;  %v6659_v5 = vadd.f32 %v8065_v12, %v7935_v31  ;;  %v8237_v48 = vpop.f32.mrb[29].mxu0 }
 0x22f   : > { %5714 = vst.msk [vmem:[%s8046_s27 + $0x14] sm:$0xf] %vm5708_vm8, %v6104_v14  ;;  %v6108_v17 = vpack.c.bf16 %v5173_v51, %v5173_v51  ;;  %v3905_v35 = vrot.slane %v3891_v15, %v7955_v30  ;;  %v3906_v59 = vcombine.high %v3898_v39, %v3898_v39  ;;  %v3857_v24 = vcombine.high %v6657_v46, %v6657_v46  ;;  %v8240_v19 = vpop.f32.mrb[30].mxu0 }
 0x230   : > { %v5124_v62 = vcombine.low %v4778_v0, %v4779_v11  ;;  %v5131_v4 = vrot.slane %v5123_v10, %v7955_v30  ;;  %v3864_v41 = vrot.slane %v6657_v46, %v7955_v30  ;;  %v3941_v20 = vcombine.high %v6658_v6, %v6658_v6  ;;  %v8244_v42 = vpop.f32.mrb[31].mxu0 }
 0x231   : > { %5718 = vst.msk [vmem:[%s8046_s27 + $0x24] sm:$0xf] %vm5708_vm8, %v6108_v17  ;;  %v3907_v54 = vcombine.high %v3905_v35, %v3905_v35  ;;  %v4505_v31 = vmul.f32 %v7958_v50, %v3906_v59  ;;  %v4506_v36 = vmul.f32 %v7971_v45, %v3905_v35  ;;  %v3871_v12 = vrot.slane %v3857_v24, %v7955_v30 }
 0x232   : > { %v5138_v58 = vrot.slane %v5124_v62, %v7955_v30  ;;  %v3872_v14 = vcombine.high %v3864_v41, %v3864_v41  ;;  %v4497_v8 = vmul.f32 %v7958_v50, %v3864_v41  ;;  %v3948_v60 = vrot.slane %v6658_v6, %v7955_v30 }
 0x233   : > { %v4507_v11 = vmul.f32 %v7961_v47, %v3907_v54  ;;  %v4660_v51 = vadd.f32 %v7964_v37, %v4505_v31  ;;  %v4661_v15 = vadd.f32 %v7980_v28, %v4506_v36  ;;  %v3873_v39 = vcombine.high %v3871_v12, %v3871_v12 }
 0x234   : > { %v5139_v46 = vcombine.low %v5131_v4, %v5138_v58  ;;  %v4498_v0 = vmul.f32 %v7971_v45, %v3872_v14  ;;  %v4499_v10 = vmul.f32 %v7961_v47, %v3871_v12  ;;  %v4652_v17 = vadd.f32 %v7964_v37, %v4497_v8 }
 0x235   : > { %v8261_v35 = vadd.f32 %v7967_v52, %v4507_v11  ;;  %v4788_v59 = vmax.f32 %v4660_v51, 0.0  ;;  %v4789_v6 = vmax.f32 %v4661_v15, 0.0  ;;  %v4500_v24 = vmul.f32 %v7975_v23, %v3873_v39  ;;  %v8264_v62 = vpop.f32.mrb[32].mxu0 }
 0x236   : > { %v6106_v41 = vpack.c.bf16 %v5139_v46, %v5139_v46  ;;  %v4653_v54 = vadd.f32 %v7980_v28, %v4498_v0  ;;  %v4654_v4 = vadd.f32 %v7967_v52, %v4499_v10  ;;  %v4780_v31 = vmax.f32 %v4652_v17, 0.0  ;;  %v8268_v36 = vpop.f32.mrb[33].mxu0 }
 0x237   : > { %v8270_v12 = vcombine.low %v4788_v59, %v4789_v6  ;;  %v4655_v58 = vadd.f32 %v7985_v32, %v4500_v24  ;;  %v3955_v14 = vrot.slane %v3941_v20, %v7955_v30  ;;  %v3956_v8 = vcombine.high %v3948_v60, %v3948_v60  ;;  %v8274_v11 = vpop.f32.mrb[34].mxu0 }
 0x238   : > { %8702 = vst [vmem:[#allocation13_spill] sm:$0xff] %v8274_v11  ;;  %5716 = vst.msk [vmem:[%s8046_s27 + $0x1c] sm:$0xf] %vm5708_vm8, %v6106_v41  ;;  %v4781_v51 = vmax.f32 %v4653_v54, 0.0  ;;  %v4782_v15 = vmax.f32 %v4654_v4, 0.0  ;;  %v4515_v39 = vmul.f32 %v7961_v47, %v3948_v60  ;;  %v3908_v46 = vcombine.high %v6659_v5, %v6659_v5  ;;  %v8279_v0 = vpop.f32.mrb[35].mxu0 }
 0x239   : > { %8703 = vst [vmem:[#allocation14_spill] sm:$0xff] %v8279_v0  ;;  %v5182_v10 = vrot.slane %v8270_v12, %v7955_v30  ;;  %v4783_v17 = vmax.f32 %v4655_v58, 0.0  ;;  %v3957_v59 = vcombine.high %v3955_v14, %v3955_v14  ;;  %v4516_v6 = vmul.f32 %v7975_v23, %v3956_v8 }
 0x23a   : > { %v5140_v20 = vcombine.low %v4780_v31, %v4781_v51  ;;  %v4517_v24 = vmul.f32 %v7958_v50, %v3955_v14  ;;  %v4670_v61 = vadd.f32 %v7967_v52, %v4515_v39  ;;  %v3915_v41 = vrot.slane %v6659_v5, %v7955_v30 }
 0x23b   : > { %v5141_v54 = vcombine.low %v4782_v15, %v4783_v17  ;;  %v4518_v60 = vmul.f32 %v7971_v45, %v3957_v59  ;;  %v4671_v4 = vadd.f32 %v7985_v32, %v4516_v6  ;;  %v3922_v0 = vrot.slane %v3908_v46, %v7955_v30 }
 0x23c   : > { %v5148_v12 = vrot.slane %v5140_v20, %v7955_v30  ;;  %v4672_v58 = vadd.f32 %v7964_v37, %v4517_v24  ;;  %v4798_v11 = vmax.f32 %v4670_v61, 0.0  ;;  %v3923_v8 = vcombine.high %v3915_v41, %v3915_v41 }
 0x23d   : > { %v5155_v31 = vrot.slane %v5141_v54, %v7955_v30  ;;  %v4673_v14 = vadd.f32 %v7980_v28, %v4518_v60  ;;  %v4799_v51 = vmax.f32 %v4671_v4, 0.0  ;;  %v3924_v39 = vcombine.high %v3922_v0, %v3922_v0 }
 0x23e   : > { %v4800_v5 = vmax.f32 %v4672_v58, 0.0  ;;  %v4508_v15 = vmul.f32 %v7975_v23, %v3915_v41  ;;  %v4509_v17 = vmul.f32 %v7958_v50, %v3923_v8  ;;  %v4510_v59 = vmul.f32 %v7971_v45, %v3922_v0 }
 0x23f   : > { %v5156_v46 = vcombine.low %v5148_v12, %v5155_v31  ;;  %v4801_v6 = vmax.f32 %v4673_v14, 0.0  ;;  %v8297_v20 = vcombine.low %v4798_v11, %v4799_v51  ;;  %v4511_v61 = vmul.f32 %v7961_v47, %v3924_v39 }
 0x240   : > { %v4663_v24 = vadd.f32 %v7985_v32, %v4508_v15  ;;  %v4664_v54 = vadd.f32 %v7964_v37, %v4509_v17  ;;  %v4665_v60 = vadd.f32 %v7980_v28, %v4510_v59  ;;  %v4790_v4 = vmax.f32 %v8261_v35, 0.0 }
 0x241   : > { %v6107_v41 = vpack.c.bf16 %v5156_v46, %v5156_v46  ;;  %v5223_v58 = vrot.slane %v8297_v20, %v7955_v30  ;;  %v8306_v0 = vcombine.low %v4800_v5, %v4801_v6  ;;  %v4666_v12 = vadd.f32 %v7967_v52, %v4511_v61 }
 0x242   : > { %v4791_v11 = vmax.f32 %v4663_v24, 0.0  ;;  %v4792_v8 = vmax.f32 %v4664_v54, 0.0  ;;  %v4793_v31 = vmax.f32 %v4665_v60, 0.0  ;;  %v6660_v14 = vadd.f32 %v8071_v53, %v7937_v56 }
 0x243   : > { %5717 = vst.msk [vmem:[%s8046_s27 + $0x20] sm:$0xf] %vm5708_vm8, %v6107_v41  ;;  %v5233_v51 = vrot.slane %v8306_v0, %v7955_v30  ;;  %v6661_v35 = vadd.f32 %v8077_v16, %v7939_v13  ;;  %v4794_v39 = vmax.f32 %v4666_v12, 0.0  ;;  %v6662_v5 = vadd.f32 %v8100_v25, %v7941_v34 }
 0x244   : > { %v5175_v15 = vcombine.low %v4790_v4, %v4791_v11  ;;  %v5191_v17 = vcombine.low %v4792_v8, %v4793_v31  ;;  %v3958_v59 = vcombine.high %v6660_v14, %v6660_v14  ;;  %v3965_v46 = vrot.slane %v6660_v14, %v7955_v30 }
 0x245   : > { %v3925_v6 = vcombine.high %v6661_v35, %v6661_v35  ;;  %v3932_v56 = vrot.slane %v6661_v35, %v7955_v30  ;;  %v4008_v53 = vcombine.high %v6662_v5, %v6662_v5  ;;  %v4015_v61 = vrot.slane %v6662_v5, %v7955_v30 }
 0x246   : > { %v5189_v24 = vrot.slane %v5175_v15, %v7955_v30  ;;  %v5199_v54 = vrot.slane %v5191_v17, %v7955_v30  ;;  %v3972_v13 = vrot.slane %v3958_v59, %v7955_v30  ;;  %v3973_v16 = vcombine.high %v3965_v46, %v3965_v46 }
 0x247   : > { %v4519_v34 = vmul.f32 %v7961_v47, %v3965_v46  ;;  %v3939_v25 = vrot.slane %v3925_v6, %v7955_v30  ;;  %v4512_v60 = vmul.f32 %v7975_v23, %v3932_v56  ;;  %v4022_v4 = vrot.slane %v4008_v53, %v7955_v30 }
 0x248   : > { %v5190_v41 = vcombine.low %v5182_v10, %v5189_v24  ;;  %v3974_v0 = vcombine.high %v3972_v13, %v3972_v13  ;;  %v4520_v12 = vmul.f32 %v7975_v23, %v3973_v16  ;;  %v4023_v11 = vcombine.high %v4015_v61, %v4015_v61 }
 0x249   : > { %v4674_v8 = vadd.f32 %v7967_v52, %v4519_v34  ;;  %v3940_v31 = vcombine.high %v3939_v25, %v3939_v25  ;;  %v4513_v14 = vmul.f32 %v7958_v50, %v3939_v25  ;;  %v4667_v35 = vadd.f32 %v7985_v32, %v4512_v60 }
 0x24a   : > { %v6109_v5 = vpack.c.bf16 %v5190_v41, %v5190_v41  ;;  %v4521_v15 = vmul.f32 %v7958_v50, %v3974_v0  ;;  %v4675_v17 = vadd.f32 %v7985_v32, %v4520_v12  ;;  %v4024_v59 = vcombine.high %v4022_v4, %v4022_v4 }
 0x24b   : > { %v4802_v46 = vmax.f32 %v4674_v8, 0.0  ;;  %v4514_v10 = vmul.f32 %v7971_v45, %v3940_v31  ;;  %v4668_v6 = vadd.f32 %v7964_v37, %v4513_v14  ;;  %v4795_v56 = vmax.f32 %v4667_v35, 0.0 }
 0x24c   : > { %5719 = vst.msk [vmem:[%s8046_s27 + $0x28] sm:$0xf] %vm5708_vm8, %v6109_v5  ;;  %v8340_v53 = vadd.f32 %v7964_v37, %v4521_v15  ;;  %v4803_v24 = vmax.f32 %v4675_v17, 0.0  ;;  %v4529_v13 = vmul.f32 %v7958_v50, %v4015_v61  ;;  %v4530_v16 = vmul.f32 %v7971_v45, %v4023_v11 }
 0x24d   : > { %v4669_v34 = vadd.f32 %v7980_v28, %v4514_v10  ;;  %v4796_v25 = vmax.f32 %v4668_v6, 0.0  ;;  %v5192_v60 = vcombine.low %v4794_v39, %v4795_v56  ;;  %v4531_v41 = vmul.f32 %v7961_v47, %v4022_v4 }
 0x24e   : > { %v4804_v0 = vmax.f32 %v8340_v53, 0.0  ;;  %v5226_v12 = vcombine.low %v4802_v46, %v4803_v24  ;;  %v4532_v8 = vmul.f32 %v7975_v23, %v4024_v59  ;;  %v4684_v31 = vadd.f32 %v7964_v37, %v4529_v13 }
 0x24f   : > { %v4797_v14 = vmax.f32 %v4669_v34, 0.0  ;;  %v5206_v35 = vrot.slane %v5192_v60, %v7955_v30  ;;  %v4685_v61 = vadd.f32 %v7980_v28, %v4530_v16  ;;  %v4686_v11 = vadd.f32 %v7967_v52, %v4531_v41 }
 0x250   : > { %v5240_v5 = vrot.slane %v5226_v12, %v7955_v30  ;;  %v4687_v39 = vadd.f32 %v7985_v32, %v4532_v8  ;;  %v4812_v15 = vmax.f32 %v4684_v31, 0.0  ;;  %v6663_v4 = vadd.f32 %v8105_v43, %v7943_v38 }
 0x251   : > { %v5207_v17 = vcombine.low %v5199_v54, %v5206_v35  ;;  %v5208_v46 = vcombine.low %v4796_v25, %v4797_v14  ;;  %v4813_v59 = vmax.f32 %v4685_v61, 0.0  ;;  %v4814_v10 = vmax.f32 %v4686_v11, 0.0 }
 0x252   : > { %v5241_v6 = vcombine.low %v5233_v51, %v5240_v5  ;;  %v4815_v56 = vmax.f32 %v4687_v39, 0.0  ;;  %v3975_v53 = vcombine.high %v6663_v4, %v6663_v4  ;;  %v3982_v24 = vrot.slane %v6663_v4, %v7955_v30 }
 0x253   : > { %v5216_v13 = vrot.slane %v5208_v46, %v7955_v30  ;;  %v6110_v16 = vpack.c.bf16 %v5207_v17, %v5207_v17  ;;  %v5276_v34 = vcombine.low %v4812_v15, %v4813_v59  ;;  %v6664_v60 = vadd.f32 %v8109_v55, %v7945_v49 }
 0x254   : > { %v6112_v41 = vpack.c.bf16 %v5241_v6, %v5241_v6  ;;  %v5277_v38 = vcombine.low %v4814_v10, %v4815_v56  ;;  %v3989_v43 = vrot.slane %v3975_v53, %v7955_v30  ;;  %v3990_v54 = vcombine.high %v3982_v24, %v3982_v24 }
 0x255   : > { %v5224_v51 = vcombine.low %v5216_v13, %v5223_v58  ;;  %5720 = vst.msk [vmem:[%s8046_s27 + $0x2c] sm:$0xf] %vm5708_vm8, %v6110_v16  ;;  %v5284_v25 = vrot.slane %v5276_v34, %v7955_v30  ;;  %v4522_v12 = vmul.f32 %v7971_v45, %v3982_v24  ;;  %v4025_v8 = vcombine.high %v6664_v60, %v6664_v60 }
 0x256   : > { %5722 = vst.msk [vmem:[%s8046_s27 + $0x34] sm:$0xf] %vm5708_vm8, %v6112_v41  ;;  %v5291_v49 = vrot.slane %v5277_v38, %v7955_v30  ;;  %v3991_v55 = vcombine.high %v3989_v43, %v3989_v43  ;;  %v4523_v31 = vmul.f32 %v7961_v47, %v3990_v54  ;;  %v4524_v14 = vmul.f32 %v7975_v23, %v3989_v43 }
 0x257   : > { %v6111_v35 = vpack.c.bf16 %v5224_v51, %v5224_v51  ;;  %v4677_v20 = vadd.f32 %v7980_v28, %v4522_v12  ;;  %v4032_v58 = vrot.slane %v6664_v60, %v7955_v30  ;;  %v4039_v61 = vrot.slane %v4025_v8, %v7955_v30 }
 0x258   : > { %v5292_v11 = vcombine.low %v5284_v25, %v5291_v49  ;;  %v4525_v5 = vmul.f32 %v7958_v50, %v3991_v55  ;;  %v4678_v39 = vadd.f32 %v7967_v52, %v4523_v31  ;;  %v4679_v15 = vadd.f32 %v7985_v32, %v4524_v14 }
 0x259   : > { %5721 = vst.msk [vmem:[%s8046_s27 + $0x30] sm:$0xf] %vm5708_vm8, %v6111_v35  ;;  %v4805_v4 = vmax.f32 %v4677_v20, 0.0  ;;  %v4040_v17 = vcombine.high %v4032_v58, %v4032_v58  ;;  %v4041_v46 = vcombine.high %v4039_v61, %v4039_v61  ;;  %v4533_v59 = vmul.f32 %v7958_v50, %v4032_v58 }
 0x25a   : > { %v6115_v10 = vpack.c.bf16 %v5292_v11, %v5292_v11  ;;  %v4680_v6 = vadd.f32 %v7964_v37, %v4525_v5  ;;  %v4806_v56 = vmax.f32 %v4678_v39, 0.0  ;;  %v4807_v53 = vmax.f32 %v4679_v15, 0.0 }
 0x25b   : > { %v5242_v24 = vcombine.low %v4804_v0, %v4805_v4  ;;  %v4534_v13 = vmul.f32 %v7971_v45, %v4040_v17  ;;  %v4535_v16 = vmul.f32 %v7961_v47, %v4039_v61  ;;  %v4536_v34 = vmul.f32 %v7975_v23, %v4041_v46 }
 0x25c   : > { %5725 = vst.msk [vmem:[%s8046_s27 + $0x40] sm:$0xf] %vm5708_vm8, %v6115_v10  ;;  %v5243_v60 = vcombine.low %v4806_v56, %v4807_v53  ;;  %v4688_v41 = vadd.f32 %v7964_v37, %v4533_v59  ;;  %v6665_v38 = vadd.f32 %v8118_v3, %v7947_v7  ;;  %v4808_v43 = vmax.f32 %v4680_v6, 0.0 }
 0x25d   : > { %v5250_v54 = vrot.slane %v5242_v24, %v7955_v30  ;;  %v4689_v51 = vadd.f32 %v7980_v28, %v4534_v13  ;;  %v4690_v0 = vadd.f32 %v7967_v52, %v4535_v16  ;;  %v4691_v25 = vadd.f32 %v7985_v32, %v4536_v34 }
 0x25e   : > { %v5257_v12 = vrot.slane %v5243_v60, %v7955_v30  ;;  %v4816_v8 = vmax.f32 %v4688_v41, 0.0  ;;  %v3992_v49 = vcombine.high %v6665_v38, %v6665_v38  ;;  %v3999_v55 = vrot.slane %v6665_v38, %v7955_v30 }
 0x25f   : > { %v4817_v31 = vmax.f32 %v4689_v51, 0.0  ;;  %v4818_v14 = vmax.f32 %v4690_v0, 0.0  ;;  %v4819_v35 = vmax.f32 %v4691_v25, 0.0  ;;  %v6666_v7 = vadd.f32 %v8146_v2, %v8079_v26 }
 0x260   : > { %v5258_v3 = vcombine.low %v5250_v54, %v5257_v12  ;;  %v4006_v20 = vrot.slane %v3992_v49, %v7955_v30  ;;  %v4007_v58 = vcombine.high %v3999_v55, %v3999_v55  ;;  %v4526_v61 = vmul.f32 %v7971_v45, %v3999_v55 }
 0x261   : > { %v5293_v11 = vcombine.low %v4816_v8, %v4817_v31  ;;  %v5294_v5 = vcombine.low %v4818_v14, %v4819_v35  ;;  %v4076_v39 = vcombine.high %v6666_v7, %v6666_v7  ;;  %v4083_v15 = vrot.slane %v6666_v7, %v7955_v30 }
 0x262   : > { %v6113_v4 = vpack.c.bf16 %v5258_v3, %v5258_v3  ;;  %v4527_v17 = vmul.f32 %v7961_v47, %v4007_v58  ;;  %v4528_v46 = vmul.f32 %v7975_v23, %v4006_v20  ;;  %v4681_v59 = vadd.f32 %v7980_v28, %v4526_v61 }
 0x263   : > { %v5301_v26 = vrot.slane %v5293_v11, %v7955_v30  ;;  %v5308_v2 = vrot.slane %v5294_v5, %v7955_v30  ;;  %v4090_v10 = vrot.slane %v4076_v39, %v7955_v30  ;;  %v4544_v6 = vmul.f32 %v7975_v23, %v4083_v15 }
 0x264   : > { %5723 = vst.msk [vmem:[%s8046_s27 + $0x38] sm:$0xf] %vm5708_vm8, %v6113_v4  ;;  %v4682_v56 = vadd.f32 %v7967_v52, %v4527_v17  ;;  %v4683_v53 = vadd.f32 %v7985_v32, %v4528_v46  ;;  %v4809_v24 = vmax.f32 %v4681_v59, 0.0  ;;  %v6667_v13 = vadd.f32 %v8150_v1, %v8084_v44 }
 0x265   : > { %v5309_v16 = vcombine.low %v5301_v26, %v5308_v2  ;;  %v4091_v34 = vcombine.high %v4090_v10, %v4090_v10  ;;  %v4545_v60 = vmul.f32 %v7958_v50, %v4090_v10  ;;  %v8418_v12 = vadd.f32 %v7985_v32, %v4544_v6 }
 0x266   : > { %v4810_v41 = vmax.f32 %v4682_v56, 0.0  ;;  %v4811_v38 = vmax.f32 %v4683_v53, 0.0  ;;  %v5259_v54 = vcombine.low %v4808_v43, %v4809_v24  ;;  %v4042_v51 = vcombine.high %v6667_v13, %v6667_v13 }
 0x267   : > { %v6116_v0 = vpack.c.bf16 %v5309_v16, %v5309_v16  ;;  %v4546_v25 = vmul.f32 %v7971_v45, %v4091_v34  ;;  %v4700_v8 = vadd.f32 %v7964_v37, %v4545_v60  ;;  %v4049_v1 = vrot.slane %v6667_v13, %v7955_v30 }
 0x268   : > { %v5260_v49 = vcombine.low %v4810_v41, %v4811_v38  ;;  %v5267_v44 = vrot.slane %v5259_v54, %v7955_v30  ;;  %v4056_v55 = vrot.slane %v4042_v51, %v7955_v30  ;;  %v6668_v14 = vadd.f32 %v8158_v22, %v8088_v9 }
 0x269   : > { %5726 = vst.msk [vmem:[%s8046_s27 + $0x44] sm:$0xf] %vm5708_vm8, %v6116_v0  ;;  %v4701_v43 = vadd.f32 %v7980_v28, %v4546_v25  ;;  %v4828_v31 = vmax.f32 %v4700_v8, 0.0  ;;  %v6669_v35 = vadd.f32 %v8165_v21, %v8093_v33  ;;  %v4057_v3 = vcombine.high %v4049_v1, %v4049_v1 }
 0x26a   : > { %v5274_v7 = vrot.slane %v5260_v49, %v7955_v30  ;;  %v4058_v20 = vcombine.high %v4056_v55, %v4056_v55  ;;  %v4538_v58 = vmul.f32 %v7971_v45, %v4056_v55  ;;  %v4092_v11 = vcombine.high %v6668_v14, %v6668_v14 }
 0x26b   : > { %v4829_v61 = vmax.f32 %v4701_v43, 0.0  ;;  %v4099_v5 = vrot.slane %v6668_v14, %v7955_v30  ;;  %v4059_v39 = vcombine.high %v6669_v35, %v6669_v35  ;;  %v4537_v4 = vmul.f32 %v7958_v50, %v4057_v3 }
 0x26c   : > { %v5275_v15 = vcombine.low %v5267_v44, %v5274_v7  ;;  %v4539_v9 = vmul.f32 %v7961_v47, %v4058_v20  ;;  %v4693_v22 = vadd.f32 %v7980_v28, %v4538_v58  ;;  %v4106_v21 = vrot.slane %v4092_v11, %v7955_v30 }
 0x26d   : > { %v5344_v33 = vcombine.low %v4828_v31, %v4829_v61  ;;  %v4107_v17 = vcombine.high %v4099_v5, %v4099_v5  ;;  %v4547_v46 = vmul.f32 %v7961_v47, %v4099_v5  ;;  %v4692_v26 = vadd.f32 %v7964_v37, %v4537_v4 }
 0x26e   : > { %v6114_v59 = vpack.c.bf16 %v5275_v15, %v5275_v15  ;;  %v4694_v2 = vadd.f32 %v7967_v52, %v4539_v9  ;;  %v4821_v10 = vmax.f32 %v4693_v22, 0.0  ;;  %v4827_v6 = vmax.f32 %v8418_v12, 0.0 }
 0x26f   : > { %v4108_v56 = vcombine.high %v4106_v21, %v4106_v21  ;;  %v4548_v53 = vmul.f32 %v7975_v23, %v4107_v17  ;;  %v4549_v24 = vmul.f32 %v7958_v50, %v4106_v21  ;;  %v4820_v13 = vmax.f32 %v4692_v26, 0.0 }
 0x270   : > { %5724 = vst.msk [vmem:[%s8046_s27 + $0x3c] sm:$0xf] %vm5708_vm8, %v6114_v59  ;;  %v4702_v16 = vadd.f32 %v7967_v52, %v4547_v46  ;;  %v4066_v34 = vrot.slane %v6669_v35, %v7955_v30  ;;  %v4073_v60 = vrot.slane %v4059_v39, %v7955_v30  ;;  %v5352_v41 = vrot.slane %v5344_v33, %v7955_v30  ;;  %v8704_v39 = vld [vmem:[#allocation2_spill] sm:$0xff] }
 0x271   : > { %v4550_v38 = vmul.f32 %v7971_v45, %v4108_v56  ;;  %v4703_v54 = vadd.f32 %v7985_v32, %v4548_v53  ;;  %v4704_v51 = vadd.f32 %v7964_v37, %v4549_v24  ;;  %v5310_v0 = vcombine.low %v4820_v13, %v4821_v10 }
 0x272   : > { %v4074_v25 = vcombine.high %v4066_v34, %v4066_v34  ;;  %v4075_v12 = vcombine.high %v4073_v60, %v4073_v60  ;;  %v4822_v8 = vmax.f32 %v4694_v2, 0.0  ;;  %v4830_v44 = vmax.f32 %v4702_v16, 0.0 }
 0x273   : > { %v4705_v49 = vadd.f32 %v7980_v28, %v4550_v38  ;;  %v4831_v1 = vmax.f32 %v4703_v54, 0.0  ;;  %v4540_v55 = vmul.f32 %v7975_v23, %v4066_v34  ;;  %v4832_v43 = vmax.f32 %v4704_v51, 0.0 }
 0x274   : > { %v4541_v31 = vmul.f32 %v7958_v50, %v4074_v25  ;;  %v4542_v14 = vmul.f32 %v7971_v45, %v4073_v60  ;;  %v4543_v35 = vmul.f32 %v7961_v47, %v4075_v12  ;;  %v6670_v58 = vadd.f32 %v8185_v18, %v8120_v40 }
 0x275   : > { %v4833_v7 = vmax.f32 %v4705_v49, 0.0  ;;  %v5345_v3 = vcombine.low %v4830_v44, %v4831_v1  ;;  %v4695_v20 = vadd.f32 %v7985_v32, %v4540_v55  ;;  %v6671_v15 = vadd.f32 %v8191_v27, %v8704_v39  ;;  %v8705_v49 = vld [vmem:[#allocation3_spill] sm:$0xff]  ;;  %v8706_v44 = vld [vmem:[#allocation9_spill] sm:$0xff]  ;;  %v8708_v39 = vld [vmem:[#allocation10_spill] sm:$0xff] }
 0x276   : > { %v4696_v61 = vadd.f32 %v7964_v37, %v4541_v31  ;;  %v4697_v11 = vadd.f32 %v7980_v28, %v4542_v14  ;;  %v4698_v5 = vadd.f32 %v7967_v52, %v4543_v35  ;;  %v5318_v4 = vrot.slane %v5310_v0, %v7955_v30 }
 0x277   : > { %v5359_v9 = vrot.slane %v5345_v3, %v7955_v30  ;;  %v4823_v22 = vmax.f32 %v4695_v20, 0.0  ;;  %v4143_v33 = vcombine.high %v6670_v58, %v6670_v58  ;;  %v4150_v40 = vrot.slane %v6670_v58, %v7955_v30 }
 0x278   : > { %v4824_v21 = vmax.f32 %v4696_v61, 0.0  ;;  %v4825_v17 = vmax.f32 %v4697_v11, 0.0  ;;  %v4826_v46 = vmax.f32 %v4698_v5, 0.0  ;;  %v8469_v59 = vcombine.low %v4832_v43, %v4833_v7  ;;  %v8707_v5 = vld [vmem:[#allocation4_spill] sm:$0xff] }
 0x279   : > { %v5360_v18 = vcombine.low %v5352_v41, %v5359_v9  ;;  %v5311_v26 = vcombine.low %v4822_v8, %v4823_v22  ;;  %v4157_v2 = vrot.slane %v4143_v33, %v7955_v30  ;;  %v4158_v56 = vcombine.high %v4150_v40, %v4150_v40  ;;  %v8709_v33 = vld [vmem:[#allocation5_spill] sm:$0xff] }
 0x27a   : > { %v5327_v10 = vcombine.low %v4824_v21, %v4825_v17  ;;  %v5328_v27 = vcombine.low %v4826_v46, %v4827_v6  ;;  %v4558_v53 = vmul.f32 %v7971_v45, %v4150_v40  ;;  %v4109_v34 = vcombine.high %v6671_v15, %v6671_v15 }
 0x27b   : > { %v6119_v24 = vpack.c.bf16 %v5360_v18, %v5360_v18  ;;  %v5325_v13 = vrot.slane %v5311_v26, %v7955_v30  ;;  %v4560_v16 = vmul.f32 %v7975_v23, %v4157_v2  ;;  %v4559_v38 = vmul.f32 %v7961_v47, %v4158_v56 }
 0x27c   : > { %v5335_v60 = vrot.slane %v5327_v10, %v7955_v30  ;;  %v5342_v41 = vrot.slane %v5328_v27, %v7955_v30  ;;  %v8479_v54 = vadd.f32 %v7980_v28, %v4558_v53  ;;  %v4116_v51 = vrot.slane %v6671_v15, %v7955_v30 }
 0x27d   : > { %5729 = vst.msk [vmem:[%s8046_s27 + $0x50] sm:$0xf] %vm5708_vm8, %v6119_v24  ;;  %v5326_v6 = vcombine.low %v5318_v4, %v5325_v13  ;;  %v4123_v0 = vrot.slane %v4109_v34, %v7955_v30  ;;  %v5369_v25 = vrot.slane %v8469_v59, %v7955_v30  ;;  %v8488_v8 = vadd.f32 %v7985_v32, %v4560_v16 }
 0x27e   : > { %v5343_v12 = vcombine.low %v5335_v60, %v5342_v41  ;;  %v6672_v1 = vadd.f32 %v8706_v44, %v8705_v49  ;;  %v8493_v43 = vadd.f32 %v7967_v52, %v4559_v38  ;;  %v4124_v31 = vcombine.high %v4116_v51, %v4116_v51 }
 0x27f   : > { %v6117_v55 = vpack.c.bf16 %v5326_v6, %v5326_v6  ;;  %v4125_v14 = vcombine.high %v4123_v0, %v4123_v0  ;;  %v4841_v7 = vmax.f32 %v8479_v54, 0.0  ;;  %v4551_v3 = vmul.f32 %v7961_v47, %v4116_v51 }
 0x280   : > { %v6118_v35 = vpack.c.bf16 %v5343_v12, %v5343_v12  ;;  %v4159_v20 = vcombine.high %v6672_v1, %v6672_v1  ;;  %v4552_v58 = vmul.f32 %v7975_v23, %v4124_v31  ;;  %v4166_v11 = vrot.slane %v6672_v1, %v7955_v30 }
 0x281   : > { %5727 = vst.msk [vmem:[%s8046_s27 + $0x48] sm:$0xf] %vm5708_vm8, %v6117_v55  ;;  %v4553_v61 = vmul.f32 %v7958_v50, %v4125_v14  ;;  %v6673_v15 = vadd.f32 %v8708_v39, %v8707_v5  ;;  %v4843_v4 = vmax.f32 %v8488_v8, 0.0  ;;  %v4706_v9 = vadd.f32 %v7967_v52, %v4551_v3 }
 0x282   : > { %5728 = vst.msk [vmem:[%s8046_s27 + $0x4c] sm:$0xf] %vm5708_vm8, %v6118_v35  ;;  %v4173_v22 = vrot.slane %v4159_v20, %v7955_v30  ;;  %v6674_v21 = vadd.f32 %v8229_v63, %v8709_v33  ;;  %v4707_v17 = vadd.f32 %v7985_v32, %v4552_v58  ;;  %v4174_v40 = vcombine.high %v4166_v11, %v4166_v11 }
 0x283   : > { %v4708_v46 = vadd.f32 %v7964_v37, %v4553_v61  ;;  %v4561_v18 = vmul.f32 %v7958_v50, %v4166_v11  ;;  %v4842_v59 = vmax.f32 %v8493_v43, 0.0  ;;  %v4834_v26 = vmax.f32 %v4706_v9, 0.0 }
 0x284   : > { %v4175_v2 = vcombine.high %v4173_v22, %v4173_v22  ;;  %v4563_v10 = vmul.f32 %v7961_v47, %v4173_v22  ;;  %v4835_v27 = vmax.f32 %v4707_v17, 0.0  ;;  %v4562_v53 = vmul.f32 %v7971_v45, %v4174_v40 }
 0x285   : > { %v4836_v56 = vmax.f32 %v4708_v46, 0.0  ;;  %v4716_v24 = vadd.f32 %v7964_v37, %v4561_v18  ;;  %v4126_v16 = vcombine.high %v6673_v15, %v6673_v15  ;;  %v4133_v34 = vrot.slane %v6673_v15, %v7955_v30 }
 0x286   : > { %v4564_v63 = vmul.f32 %v7975_v23, %v4175_v2  ;;  %v4718_v13 = vadd.f32 %v7967_v52, %v4563_v10  ;;  %v5362_v60 = vcombine.low %v4834_v26, %v4835_v27  ;;  %v4717_v41 = vadd.f32 %v7980_v28, %v4562_v53 }
 0x287   : > { %v4844_v38 = vmax.f32 %v4716_v24, 0.0  ;;  %v4210_v6 = vcombine.high %v6674_v21, %v6674_v21  ;;  %v4140_v12 = vrot.slane %v4126_v16, %v7955_v30  ;;  %v4141_v8 = vcombine.high %v4133_v34, %v4133_v34 }
 0x288   : > { %v4719_v51 = vadd.f32 %v7985_v32, %v4564_v63  ;;  %v4846_v0 = vmax.f32 %v4718_v13, 0.0  ;;  %v5376_v49 = vrot.slane %v5362_v60, %v7955_v30  ;;  %v4845_v44 = vmax.f32 %v4717_v41, 0.0 }
 0x289   : > { %v4554_v1 = vmul.f32 %v7971_v45, %v4133_v34  ;;  %v4217_v55 = vrot.slane %v6674_v21, %v7955_v30  ;;  %v4142_v31 = vcombine.high %v4140_v12, %v4140_v12  ;;  %v4555_v14 = vmul.f32 %v7961_v47, %v4141_v8 }
 0x28a   : > { %v4847_v43 = vmax.f32 %v4719_v51, 0.0  ;;  %v4556_v35 = vmul.f32 %v7975_v23, %v4140_v12  ;;  %v5377_v3 = vcombine.low %v5369_v25, %v5376_v49  ;;  %v5412_v20 = vcombine.low %v4844_v38, %v4845_v44 }
 0x28b   : > { %v4709_v58 = vadd.f32 %v7980_v28, %v4554_v1  ;;  %v4224_v61 = vrot.slane %v4210_v6, %v7955_v30  ;;  %v4557_v5 = vmul.f32 %v7958_v50, %v4142_v31  ;;  %v4710_v39 = vadd.f32 %v7967_v52, %v4555_v14  ;;  %v8711_v1 = vld [vmem:[#allocation7_spill] sm:$0xff]  ;;  %v8712_v31 = vld [vmem:[#allocation8_spill] sm:$0xff] }
 0x28c   : > { %v5413_v11 = vcombine.low %v4846_v0, %v4847_v43  ;;  %v4711_v15 = vadd.f32 %v7985_v32, %v4556_v35  ;;  %v6120_v9 = vpack.c.bf16 %v5377_v3, %v5377_v3  ;;  %v5420_v22 = vrot.slane %v5412_v20, %v7955_v30  ;;  %v8710_v0 = vld [vmem:[#allocation6_spill] sm:$0xff] }
 0x28d   : > { %v4837_v33 = vmax.f32 %v4709_v58, 0.0  ;;  %v4225_v21 = vcombine.high %v4217_v55, %v4217_v55  ;;  %v4712_v17 = vadd.f32 %v7964_v37, %v4557_v5  ;;  %v4838_v46 = vmax.f32 %v4710_v39, 0.0 }
 0x28e   : > { %v5427_v25 = vrot.slane %v5413_v11, %v7955_v30  ;;  %v4839_v40 = vmax.f32 %v4711_v15, 0.0  ;;  %v5396_v18 = vcombine.low %v4842_v59, %v4843_v4  ;;  %5730 = vst.msk [vmem:[%s8046_s27 + $0x54] sm:$0xf] %vm5708_vm8, %v6120_v9  ;;  %v4226_v2 = vcombine.high %v4224_v61, %v4224_v61 }
 0x28f   : > { %v5378_v26 = vcombine.low %v4836_v56, %v4837_v33  ;;  %v4573_v10 = vmul.f32 %v7958_v50, %v4225_v21  ;;  %v4840_v53 = vmax.f32 %v4712_v17, 0.0  ;;  %v4574_v63 = vmul.f32 %v7971_v45, %v4224_v61 }
 0x290   : > { %v5428_v27 = vcombine.low %v5420_v22, %v5427_v25  ;;  %v5379_v24 = vcombine.low %v4838_v46, %v4839_v40  ;;  %v4572_v16 = vmul.f32 %v7975_v23, %v4217_v55  ;;  %v4575_v34 = vmul.f32 %v7961_v47, %v4226_v2 }
 0x291   : > { %v5386_v13 = vrot.slane %v5378_v26, %v7955_v30  ;;  %v4728_v4 = vadd.f32 %v7964_v37, %v4573_v10  ;;  %v5395_v60 = vcombine.low %v4840_v53, %v4841_v7  ;;  %v4729_v41 = vadd.f32 %v7980_v28, %v4574_v63 }
 0x292   : > { %v6123_v59 = vpack.c.bf16 %v5428_v27, %v5428_v27  ;;  %v5393_v56 = vrot.slane %v5379_v24, %v7955_v30  ;;  %v5410_v38 = vrot.slane %v5396_v18, %v7955_v30  ;;  %v4730_v6 = vadd.f32 %v7967_v52, %v4575_v34 }
 0x293   : > { %v4856_v51 = vmax.f32 %v4728_v4, 0.0  ;;  %v6675_v12 = vadd.f32 %v8237_v48, %v8710_v0  ;;  %v5403_v49 = vrot.slane %v5395_v60, %v7955_v30  ;;  %v4857_v44 = vmax.f32 %v4729_v41, 0.0 }
 0x294   : > { %5733 = vst.msk [vmem:[%s8046_s27 + $0x60] sm:$0xf] %vm5708_vm8, %v6123_v59  ;;  %v5394_v8 = vcombine.low %v5386_v13, %v5393_v56  ;;  %v6676_v54 = vadd.f32 %v8240_v19, %v8711_v1  ;;  %v8559_v7 = vadd.f32 %v7985_v32, %v4572_v16  ;;  %v6677_v14 = vadd.f32 %v8244_v42, %v8712_v31 }
 0x295   : > { %v4176_v55 = vcombine.high %v6675_v12, %v6675_v12  ;;  %v4183_v43 = vrot.slane %v6675_v12, %v7955_v30  ;;  %v5411_v48 = vcombine.low %v5403_v49, %v5410_v38  ;;  %v5463_v3 = vcombine.low %v4856_v51, %v4857_v44  ;;  %v8713_v44 = vld [vmem:[#allocation11_spill] sm:$0xff] }
 0x296   : > { %v6121_v35 = vpack.c.bf16 %v5394_v8, %v5394_v8  ;;  %v4227_v20 = vcombine.high %v6676_v54, %v6676_v54  ;;  %v4234_v19 = vrot.slane %v6676_v54, %v7955_v30  ;;  %v4858_v15 = vmax.f32 %v4730_v6, 0.0 }
 0x297   : > { %v4190_v58 = vrot.slane %v4176_v55, %v7955_v30  ;;  %v4191_v61 = vcombine.high %v4183_v43, %v4183_v43  ;;  %v4565_v11 = vmul.f32 %v7958_v50, %v4183_v43  ;;  %v6122_v5 = vpack.c.bf16 %v5411_v48, %v5411_v48 }
 0x298   : > { %5731 = vst.msk [vmem:[%s8046_s27 + $0x58] sm:$0xf] %vm5708_vm8, %v6121_v35  ;;  %v4241_v39 = vrot.slane %v4227_v20, %v7955_v30  ;;  %v4193_v9 = vcombine.high %v6677_v14, %v6677_v14  ;;  %v4576_v17 = vmul.f32 %v7975_v23, %v4234_v19  ;;  %v4200_v40 = vrot.slane %v6677_v14, %v7955_v30 }
 0x299   : > { %v4192_v42 = vcombine.high %v4190_v58, %v4190_v58  ;;  %v4566_v22 = vmul.f32 %v7971_v45, %v4191_v61  ;;  %v4567_v33 = vmul.f32 %v7961_v47, %v4190_v58  ;;  %v4720_v21 = vadd.f32 %v7964_v37, %v4565_v11  ;;  %5732 = vst.msk [vmem:[%s8046_s27 + $0x5c] sm:$0xf] %vm5708_vm8, %v6122_v5 }
 0x29a   : > { %v4242_v25 = vcombine.high %v4241_v39, %v4241_v39  ;;  %v4577_v46 = vmul.f32 %v7958_v50, %v4241_v39  ;;  %v5471_v18 = vrot.slane %v5463_v3, %v7955_v30  ;;  %v4731_v53 = vadd.f32 %v7985_v32, %v4576_v17 }
 0x29b   : > { %v4568_v26 = vmul.f32 %v7975_v23, %v4192_v42  ;;  %v4721_v2 = vadd.f32 %v7980_v28, %v4566_v22  ;;  %v4722_v10 = vadd.f32 %v7967_v52, %v4567_v33  ;;  %v4207_v63 = vrot.slane %v4193_v9, %v7955_v30 }
 0x29c   : > { %v4578_v27 = vmul.f32 %v7971_v45, %v4242_v25  ;;  %v4732_v24 = vadd.f32 %v7964_v37, %v4577_v46  ;;  %v4848_v16 = vmax.f32 %v4720_v21, 0.0  ;;  %v4208_v4 = vcombine.high %v4200_v40, %v4200_v40 }
 0x29d   : > { %v4723_v13 = vadd.f32 %v7985_v32, %v4568_v26  ;;  %v4849_v34 = vmax.f32 %v4721_v2, 0.0  ;;  %v4850_v59 = vmax.f32 %v4722_v10, 0.0  ;;  %v4859_v60 = vmax.f32 %v4731_v53, 0.0  ;;  %v8714_v53 = vld [vmem:[#allocation13_spill] sm:$0xff] }
 0x29e   : > { %v4733_v56 = vadd.f32 %v7980_v28, %v4578_v27  ;;  %v4209_v41 = vcombine.high %v4207_v63, %v4207_v63  ;;  %v4569_v51 = vmul.f32 %v7958_v50, %v4208_v4  ;;  %v4570_v0 = vmul.f32 %v7971_v45, %v4207_v63  ;;  %v8715_v63 = vld [vmem:[#allocation12_spill] sm:$0xff] }
 0x29f   : > { %v4851_v38 = vmax.f32 %v4723_v13, 0.0  ;;  %v5429_v6 = vcombine.low %v4848_v16, %v4849_v34  ;;  %v4860_v12 = vmax.f32 %v4732_v24, 0.0  ;;  %v5464_v8 = vcombine.low %v4858_v15, %v4859_v60  ;;  %v8716_v13 = vld [vmem:[#allocation14_spill] sm:$0xff] }
 0x2a0   : > { %v4571_v49 = vmul.f32 %v7961_v47, %v4209_v41  ;;  %v6678_v1 = vadd.f32 %v8264_v62, %v8713_v44  ;;  %v4861_v55 = vmax.f32 %v4733_v56, 0.0  ;;  %v4724_v43 = vadd.f32 %v7964_v37, %v4569_v51 }
 0x2a1   : > { %v5430_v54 = vcombine.low %v4850_v59, %v4851_v38  ;;  %v4725_v31 = vadd.f32 %v7980_v28, %v4570_v0  ;;  %v5437_v14 = vrot.slane %v5429_v6, %v7955_v30  ;;  %v5478_v48 = vrot.slane %v5464_v8, %v7955_v30 }
 0x2a2   : > { %v4726_v35 = vadd.f32 %v7967_v52, %v4571_v49  ;;  %v4277_v3 = vcombine.high %v6678_v1, %v6678_v1  ;;  %v4852_v58 = vmax.f32 %v4724_v43, 0.0  ;;  %v4284_v11 = vrot.slane %v6678_v1, %v7955_v30 }
 0x2a3   : > { %v5444_v20 = vrot.slane %v5430_v54, %v7955_v30  ;;  %v4853_v61 = vmax.f32 %v4725_v31, 0.0  ;;  %v4855_v62 = vmax.f32 %v8559_v7, 0.0  ;;  %v5479_v19 = vcombine.low %v5471_v18, %v5478_v48 }
 0x2a4   : > { %v4854_v5 = vmax.f32 %v4726_v35, 0.0  ;;  %v4291_v39 = vrot.slane %v4277_v3, %v7955_v30  ;;  %v8602_v9 = vcombine.low %v4860_v12, %v4861_v55  ;;  %v4292_v22 = vcombine.high %v4284_v11, %v4284_v11 }
 0x2a5   : > { %v5445_v15 = vcombine.low %v5437_v14, %v5444_v20  ;;  %v5446_v42 = vcombine.low %v4852_v58, %v4853_v61  ;;  %v6126_v33 = vpack.c.bf16 %v5479_v19, %v5479_v19  ;;  %v4586_v7 = vmul.f32 %v7971_v45, %v4284_v11 }
 0x2a6   : > { %v5447_v21 = vcombine.low %v4854_v5, %v4855_v62  ;;  %v4293_v25 = vcombine.high %v4291_v39, %v4291_v39  ;;  %v4588_v17 = vmul.f32 %v7975_v23, %v4291_v39  ;;  %v4587_v26 = vmul.f32 %v7961_v47, %v4292_v22 }
 0x2a7   : > { %v6124_v46 = vpack.c.bf16 %v5445_v15, %v5445_v15  ;;  %v5454_v40 = vrot.slane %v5446_v42, %v7955_v30  ;;  %5736 = vst.msk [vmem:[%s8046_s27 + $0x6c] sm:$0xf] %vm5708_vm8, %v6126_v33  ;;  %v6679_v10 = vadd.f32 %v8268_v36, %v8207_v29  ;;  %v6680_v24 = vadd.f32 %v8714_v53, %v8215_v57 }
 0x2a8   : > { %v5461_v18 = vrot.slane %v5447_v21, %v7955_v30  ;;  %v4589_v2 = vmul.f32 %v7958_v50, %v4293_v25  ;;  %v8617_v27 = vadd.f32 %v7985_v32, %v4588_v17  ;;  %v6681_v16 = vadd.f32 %v8716_v13, %v8715_v63 }
 0x2a9   : > { %5734 = vst.msk [vmem:[%s8046_s27 + $0x64] sm:$0xf] %vm5708_vm8, %v6124_v46  ;;  %v5488_v34 = vrot.slane %v8602_v9, %v7955_v30  ;;  %v4243_v59 = vcombine.high %v6679_v10, %v6679_v10  ;;  %v8626_v56 = vadd.f32 %v7980_v28, %v4586_v7  ;;  %v4250_v29 = vrot.slane %v6679_v10, %v7955_v30 }
 0x2aa   : > { %v5462_v4 = vcombine.low %v5454_v40, %v5461_v18  ;;  %v4294_v36 = vcombine.high %v6680_v24, %v6680_v24  ;;  %v4301_v60 = vrot.slane %v6680_v24, %v7955_v30  ;;  %v4742_v57 = vadd.f32 %v7967_v52, %v4587_v26 }
 0x2ab   : > { %v4744_v38 = vadd.f32 %v7964_v37, %v4589_v2  ;;  %v4257_v6 = vrot.slane %v4243_v59, %v7955_v30  ;;  %v4871_v51 = vmax.f32 %v8617_v27, 0.0  ;;  %v4258_v0 = vcombine.high %v4250_v29, %v4250_v29 }
 0x2ac   : > { %v6125_v41 = vpack.c.bf16 %v5462_v4, %v5462_v4  ;;  %v4579_v12 = vmul.f32 %v7961_v47, %v4250_v29  ;;  %v4308_v8 = vrot.slane %v4294_v36, %v7955_v30  ;;  %v4309_v1 = vcombine.high %v4301_v60, %v4301_v60 }
 0x2ad   : > { %v4259_v49 = vcombine.high %v4257_v6, %v4257_v6  ;;  %v4581_v44 = vmul.f32 %v7958_v50, %v4257_v6  ;;  %v4590_v54 = vmul.f32 %v7971_v45, %v4301_v60  ;;  %v4580_v55 = vmul.f32 %v7975_v23, %v4258_v0 }
 0x2ae   : > { %5735 = vst.msk [vmem:[%s8046_s27 + $0x68] sm:$0xf] %vm5708_vm8, %v6125_v41  ;;  %v4734_v43 = vadd.f32 %v7967_v52, %v4579_v12  ;;  %v4592_v31 = vmul.f32 %v7975_v23, %v4308_v8  ;;  %v4260_v14 = vcombine.high %v6681_v16, %v6681_v16  ;;  %v4591_v35 = vmul.f32 %v7961_v47, %v4309_v1 }
 0x2af   : > { %v4582_v48 = vmul.f32 %v7971_v45, %v4259_v49  ;;  %v4745_v3 = vadd.f32 %v7980_v28, %v4590_v54  ;;  %v4872_v20 = vmax.f32 %v4744_v38, 0.0  ;;  %v4735_v58 = vadd.f32 %v7985_v32, %v4580_v55 }
 0x2b0   : > { %v4736_v61 = vadd.f32 %v7964_v37, %v4581_v44  ;;  %v4747_v11 = vadd.f32 %v7985_v32, %v4592_v31  ;;  %v4267_v62 = vrot.slane %v6681_v16, %v7955_v30  ;;  %v4862_v5 = vmax.f32 %v4734_v43, 0.0 }
 0x2b1   : > { %v4737_v19 = vadd.f32 %v7980_v28, %v4582_v48  ;;  %v4746_v39 = vadd.f32 %v7967_v52, %v4591_v35  ;;  %v4873_v15 = vmax.f32 %v4745_v3, 0.0  ;;  %v4863_v45 = vmax.f32 %v4735_v58, 0.0 }
 0x2b2   : > { %v4875_v9 = vmax.f32 %v4747_v11, 0.0  ;;  %v4274_v42 = vrot.slane %v4260_v14, %v7955_v30  ;;  %v4275_v22 = vcombine.high %v4267_v62, %v4267_v62  ;;  %v4583_v17 = vmul.f32 %v7961_v47, %v4267_v62 }
 0x2b3   : > { %v4865_v33 = vmax.f32 %v4737_v19, 0.0  ;;  %v4874_v21 = vmax.f32 %v4746_v39, 0.0  ;;  %v5531_v25 = vcombine.low %v4872_v20, %v4873_v15  ;;  %v4864_v46 = vmax.f32 %v4736_v61, 0.0 }
 0x2b4   : > { %v5481_v40 = vcombine.low %v4862_v5, %v4863_v45  ;;  %v4276_v7 = vcombine.high %v4274_v42, %v4274_v42  ;;  %v4584_v18 = vmul.f32 %v7975_v23, %v4275_v22  ;;  %v4870_v28 = vmax.f32 %v4742_v57, 0.0 }
 0x2b5   : > { %v5532_v26 = vcombine.low %v4874_v21, %v4875_v9  ;;  %v5539_v2 = vrot.slane %v5531_v25, %v7955_v30  ;;  %v4738_v10 = vadd.f32 %v7967_v52, %v4583_v17  ;;  %v5497_v53 = vcombine.low %v4864_v46, %v4865_v33 }
 0x2b6   : > { %v5495_v27 = vrot.slane %v5481_v40, %v7955_v30  ;;  %v4585_v24 = vmul.f32 %v7958_v50, %v4276_v7  ;;  %v4739_v63 = vadd.f32 %v7985_v32, %v4584_v18  ;;  %v4869_v59 = vmax.f32 %v8626_v56, 0.0 }
 0x2b7   : > { %v5546_v47 = vrot.slane %v5532_v26, %v7955_v30  ;;  %v4866_v16 = vmax.f32 %v4738_v10, 0.0  ;;  %v5515_v29 = vcombine.low %v4870_v28, %v4871_v51  ;;  %v5505_v36 = vrot.slane %v5497_v53, %v7955_v30 }
 0x2b8   : > { %v5496_v13 = vcombine.low %v5488_v34, %v5495_v27  ;;  %v4740_v23 = vadd.f32 %v7964_v37, %v4585_v24  ;;  %v4867_v4 = vmax.f32 %v4739_v63, 0.0 }
 0x2b9   : > { %v5547_v52 = vcombine.low %v5539_v2, %v5546_v47  ;;  %v5529_v37 = vrot.slane %v5515_v29, %v7955_v30 }
 0x2ba   : > { %v6127_v60 = vpack.c.bf16 %v5496_v13, %v5496_v13  ;;  %v4868_v50 = vmax.f32 %v4740_v23, 0.0  ;;  %v5498_v41 = vcombine.low %v4866_v16, %v4867_v4 }
 0x2bb   : > { %v6130_v32 = vpack.c.bf16 %v5547_v52, %v5547_v52 }
 0x2bc   : > { %5737 = vst.msk [vmem:[%s8046_s27 + $0x70] sm:$0xf] %vm5708_vm8, %v6127_v60  ;;  %v5512_v34 = vrot.slane %v5498_v41, %v7955_v30  ;;  %v5514_v57 = vcombine.low %v4868_v50, %v4869_v59 }
 0x2bd   : > { %5740 = vst.msk [vmem:[%s8046_s27 + $0x7c] sm:$0xf] %vm5708_vm8, %v6130_v32 }
 0x2be   : > { %v5513_v56 = vcombine.low %v5505_v36, %v5512_v34  ;;  %v5522_v38 = vrot.slane %v5514_v57, %v7955_v30 }
 0x2c0   : > { %v5530_v6 = vcombine.low %v5522_v38, %v5529_v37  ;;  %v6128_v51 = vpack.c.bf16 %v5513_v56, %v5513_v56 }
 0x2c2   : > { %v6129_v0 = vpack.c.bf16 %v5530_v6, %v5530_v6  ;;  %5738 = vst.msk [vmem:[%s8046_s27 + $0x74] sm:$0xf] %vm5708_vm8, %v6128_v51 }
 0x2c4   : > { %5739 = vst.msk [vmem:[%s8046_s27 + $0x78] sm:$0xf] %vm5708_vm8, %v6129_v0 }
 0x2c5 PF: > { %s14_s17 = sadd.s32 1, %s7065_s17   ;;  %s8717_s15 = smov %s7061_s16 }
 0x2c6   : > { %p11_p5 = scmp.ge.s32.totalorder %s14_s17, 4   ;;  %s8718_s16 = smov %s8720_s18 }
 0x2c8   :  { %13 = sbr.rel (!%p11_p5) target bundleno = 2 (0x2), region = 74 }

// kernel: basic_block_forward.5
= control target key start
LH: loop header
LB: loop body
LE: loop exit
PB: predicated region body
PF: predicated region fallthrough
CT: control target
= control target key end

     0   :  { %8 = vsyncpa [#allocation3], 0  ;;  %s4867_s0 = inlined_call_operand.vmem [shape: bf16[2,360,8], index: 0, kind: input, shape index: {}]   ;;  %s4868_s1 = inlined_call_operand.vmem [shape: bf16[3,3,8,8], index: 1, kind: input, shape index: {}]   ;;  %s4869_s2 = inlined_call_operand.vmem [shape: f32[2,64,8], index: 2, kind: input, shape index: {}]   ;;  %s4870_s3 = inlined_call_operand.hbm [shape: f32[2,64,8], index: 3, kind: output, shape index: {}]  }
   0x1   :  { %10 = vsyncpa [#allocation3 + $0x1], 0  ;;  %s3913_s12 = smov 0   ;;  %s3915_s13 = smov 0  }
   0x2   :  { %s3917_s14 = smov 0   ;;  %s3919_s15 = smov 0  }
   0x3   :  { %s3921_s16 = smov 0   ;;  %s3923_s17 = smov 0  }
   0x4 LB: > { %s3196_s18 = sadd.s32 4294967295, %s3885_s17   ;;  %s3197_s19 = sadd.s32 4294967294, %s3885_s17   ;;  %s3885_s17 = sphi %s3923_s17, %s16_s17   ;;  %s3881_s16 = sphi %s3921_s16, %s4903_s16   ;;  %s3877_s15 = sphi %s3919_s15, %s4902_s15   ;;  %s3873_s14 = sphi %s3917_s14, %s4901_s14   ;;  %s3869_s13 = sphi %s3915_s13, %s4900_s13   ;;  %s3865_s12 = sphi %s3913_s12, %s4899_s12  }
   0x5   : > { %s28_s20 = sadd.s32 1, %s3881_s16  ;;  %s112_s21 = sadd.s32 1, %s3873_s14 }
   0x6   : > { %p30_p0 = scmp.ge.s32.totalorder %s28_s20, 2  ;;  %p122_p1 = scmp.ne.s32.totalorder %s3873_s14, %s3869_s13 }
   0x7   : > { %p123_p2 = scmp.eq.s32.totalorder %s3196_s18, 1  ;;  %p128_p3 = scmp.ne.s32.totalorder %s3869_s13, %s3865_s12 }
   0x8   : > { %s4905_s20 = smov (%p30_p0, %s28_s20), 0  ;;  %p129_p5 = scmp.eq.s32.totalorder %s3197_s19, 1 }
   0x9   : > { %p3953_p4 = por %p123_p2, %p122_p1  ;;  %s107_s23 = ssub.s32 %s3881_s16, %s4905_s20 }
   0xa   : > { %p3200_p6 = scmp.ge.s32.totalorder %s3885_s17, 1  ;;  %p110_p7 = scmp.eq.s32.totalorder %s107_s23, 0 }
   0xb   : > { %p3960_p8 = por %p129_p5, %p128_p3  ;;  %p171_p9 = scmp.lt.s32.totalorder %s3885_s17, 3 }
   0xc   : > { %s3966_s25 = scalar_select %p110_p7, %s3873_s14, %s112_s21  }
   0xd   : > { %p172_p10 = pnand %p3200_p6, %p171_p9 }
   0xe   : > { %vm294_vm0 = vcmask (!%p172_p10), 1043456   ;;  %v3248_v0 = vld [vmem:[%s4868_s1 + $0x10] sm:$0xf] (!%p172_p10)  ;;  %v3205_v1 = vld [vmem:[%s4868_s1 + $0x4] sm:$0xf] (!%p172_p10)  ;;  %v3887_v2 = vmov (!%p172_p10), 0.0  }
   0xf   : > { %175 = sbr.rel (%p172_p10) target bundleno = 495 (0x1ef), region = 32  ;;  %3444 = vmatprep.subr.bf16.mxu0 (!%p172_p10), %v3887_v2  ;;  %3356 = vmatprep.subr.bf16.mxu1 (!%p172_p10), %v3887_v2  ;;  %v3977_v3 = vsel (!%p172_p10), %vm294_vm0, %v3248_v0, 0  ;;  %v296_v4 = vsel (!%p172_p10), %vm294_vm0, %v3205_v1, 0  ;;  %p204_p11 = scmp.lt.s32.totalorder (!%p172_p10), %s3877_s15, 1  ;;  %vm3888_vm1 = vmmov (!%p172_p10), 0   ;;  %vm268_vm2 = vcmask (!%p172_p10), 1046528  }
  0x10   : > { %3445 = vmatpush3.bf16.msra.mxu0 (!%p172_p10), %v3977_v3  ;;  %3357 = vmatpush3.bf16.msra.mxu1 (!%p172_p10), %v296_v4  ;;  %vm278_vm3 = vcmask (!%p172_p10), 64512   ;;  %v230_v5 = vld [vmem:[%s4868_s1] sm:$0xf] (!%p172_p10)  ;;  %vm842_vm4 = vcmask (!%p172_p10), 1044480   ;;  %v3259_v8 = vld [vmem:[%s4868_s1 + $0x14] sm:$0xf] (!%p172_p10) }
  0x11   : > { %3358 = vmatprep.mubr.msk.bf16.mxu1 (!%p172_p10), %vm3888_vm1, %v3887_v2  ;;  %3446 = vmatprep.mubr.msk.bf16.mxu0 (!%p172_p10), %vm3888_vm1, %v3887_v2  ;;  %v409_v13 = vsel (!%p172_p10), %vm294_vm0, %v230_v5, 0  ;;  %v1018_v19 = vsel (!%p172_p10), %vm294_vm0, %v3259_v8, 0  ;;  %vm957_vm5 = vsmask.f32 (!%p172_p10), 5376  ;;  %v3266_v49 = vld [vmem:[%s4868_s1 + $0x18] sm:$0xf] (!%p172_p10) }
  0x12   : > { %3466 = vmatprep.subr.bf16.mxu0 (!%p172_p10), %v3887_v2  ;;  %3378 = vmatprep.subr.bf16.mxu1 (!%p172_p10), %v3887_v2  ;;  %v1193_v54 = vsel (!%p172_p10), %vm294_vm0, %v3266_v49, 0  ;;  %vm696_vm6 = vcmask (!%p172_p10), 1045504   ;;  %v3226_v5 = vld [vmem:[%s4868_s1 + $0x8] sm:$0xf] (!%p172_p10)  ;;  %vm520_vm7 = vsmask.f32 (!%p172_p10), 7424 }
  0x13   : > { %vm1313_vm8 = vsmask.f32 (!%p172_p10), 6400  ;;  %s3301_s18 = sshll.u32 (!%p172_p10), %s3877_s15, 10  ;;  %s3890_s28 = smov (!%p172_p10), [#allocation2]  }
  0x14   : > { %s4813_s26 = scalar_lea.hbm (!%p172_p10), %s4870_s3, %s3301_s18  ;;  %s3811_s29 = sshll.u32 (!%p172_p10), %s3890_s28, 4  ;;  %s3812_s29 = int_to_ptr.vmem [resolvable:$false] %s3811_s29 }
  0x16   : > { %s3987_s30 = scalar_select %p204_p11, %s3877_s15, 1 }
  0x18   : > { %s3705_s4 = smul.u32 180, %s3987_s30  ;;  %s3300_s6 = sshll.u32 %s3987_s30, 6 }
  0x19   : > { %s4322_s9 = scalar_lea.vmem %s4869_s2, %s3300_s6  ;;  %s201_s30 = sand.u32 1, %s3869_s13  }
  0x1a   : > { %s3995_s7 = scalar_lea.vmem %s4867_s0, %s3705_s4  ;;  %s4580_s10 = sshll.u32 %s201_s30, 6 }
  0x1b   : > { %v3766_v6 = vld [vmem:[%s3995_s7 + $0x2c] sm:$0xfe]   ;;  %v3767_v7 = vld [vmem:[%s3995_s7 + $0x34] sm:$0xff]   ;;  %v3768_v11 = vld [vmem:[%s3995_s7 + $0x84] sm:$0xf8]   ;;  %s4606_s11 = scalar_lea.vmem [#allocation2], %s4580_s10 }
  0x1c   : > { %v269_v9 = vrot.slane %v3766_v6, 1  ;;  %v270_v10 = vrot.slane %v3767_v7, 1  ;;  %v3769_v12 = vld [vmem:[%s3995_s7 + $0x8c] sm:$0xff]   ;;  %v843_v15 = vrot.slane %v3768_v11, 3  ;;  %v3770_v16 = vld [vmem:[%s3995_s7 + $0x3c] sm:$0xff]   ;;  %v3771_v18 = vld [vmem:[%s3995_s7 + $0x94] sm:$0xff]  }
  0x1d   : > { %v844_v17 = vrot.slane %v3769_v12, 3  ;;  %v272_v20 = vrot.slane %v3770_v16, 1  ;;  %v846_v22 = vrot.slane %v3771_v18, 3  ;;  %v3772_v24 = vld [vmem:[%s3995_s7 + $0x44] sm:$0xff]   ;;  %v4024_v25 = vld [vmem:[%s3995_s7 + $0x9c] sm:$0xff]   ;;  %v3779_v50 = vld [vmem:[%s3995_s7 + $0x70] sm:$0xff]  }
  0x1e   : > { %v271_v14 = vsel %vm268_vm2, %v269_v9, %v270_v10  ;;  %v4027_v26 = vld [vmem:[%s3995_s7 + $0x60] sm:$0xff]   ;;  %v4032_v28 = vld [vmem:[%s3995_s7 + $0x58] sm:$0xfc]   ;;  %v274_v29 = vrot.slane %v3772_v24, 1  ;;  %v848_v30 = vrot.slane %v4024_v25, 3  ;;  %v4050_v38 = vld [vmem:[%s3995_s7 + $0x68] sm:$0xff]  }
  0x1f   : > { %3359 = vmatmul.mubr.msk.bf16.vlgmr.msra.gmra.mrb[0].mxu1 %vm278_vm3, %v271_v14  ;;  %v845_v21 = vsel %vm842_vm4, %v843_v15, %v844_v17  ;;  %v273_v23 = vsel %vm268_vm2, %v270_v10, %v272_v20  ;;  %v847_v27 = vsel %vm842_vm4, %v844_v17, %v846_v22  ;;  %v967_v31 = vshrl.u32 %v4027_v26, 16  ;;  %v3774_v36 = vld [vmem:[%s3995_s7 + $0x4c] sm:$0x1f]   ;;  %v667_v58 = vld [vmem:[%s3995_s7 + $0x78] sm:$0xf]  ;;  %v3778_v7 = vld [vmem:[%s3995_s7] sm:$0xff]  }
  0x20   : > { %3362 = vmatprep.mubr.msk.bf16.mxu1 %vm3888_vm1, %v3887_v2  ;;  %3379 = vmatpush3.bf16.msra.mxu1 %v409_v13  ;;  %v970_v32 = vshll.u32 %v4027_v26, 16  ;;  %v959_v33 = vshrl.u32 %v4032_v28, 16  ;;  %v962_v34 = vshll.u32 %v4032_v28, 16  ;;  %v275_v35 = vsel %vm268_vm2, %v272_v20, %v274_v29  ;;  %v951_v59 = vld [vmem:[%s3995_s7 + $0x7c] sm:$0x7]  ;;  %v4097_v16 = vld [vmem:[%s3995_s7 + $0xc] sm:$0xff]  }
  0x21   : > { %3400 = vmatprep.subr.bf16.mxu1 %v3887_v2  ;;  %3447 = vmatmul.mubr.msk.bf16.vlgmr.msra.gmra.mrb[0].mxu0 %vm278_vm3, %v845_v21  ;;  %v849_v37 = vsel %vm842_vm4, %v846_v22, %v848_v30  ;;  %v969_v41 = vrot.slane %v967_v31, 2  ;;  %v276_v43 = vrot.slane %v3774_v36, 1  ;;  %v976_v46 = vshrl.u32 %v4050_v38, 16  ;;  %v668_v12 = vld [vmem:[%s3995_s7 + $0x7c] sm:$0x3]  ;;  %v4108_v21 = vld [vmem:[%s3995_s7 + $0x14] sm:$0xff]  }
  0x22   : > { %3467 = vmatpush3.bf16.msra.mxu0 %v1018_v19  ;;  %3450 = vmatprep.mubr.msk.bf16.mxu0 %vm3888_vm1, %v3887_v2  ;;  %v961_v39 = vrot.slane %v959_v33, 2  ;;  %v964_v40 = vrot.slane %v962_v34, 3  ;;  %v972_v42 = vrot.slane %v970_v32, 3  ;;  %v979_v47 = vshll.u32 %v4050_v38, 16  ;;  %v1457_v14 = vld [vmem:[%s3995_s7 + $0x4] sm:$0xe] }
  0x23   : > { %3488 = vmatprep.subr.bf16.mxu0 %v3887_v2  ;;  %v277_v48 = vsel %vm268_vm2, %v274_v29, %v276_v43  ;;  %v978_v52 = vrot.slane %v976_v46, 2  ;;  %v985_v55 = vshrl.u32 %v3779_v50, 16  ;;  %v988_v56 = vshll.u32 %v3779_v50, 16  ;;  %v4103_v18 = vld [vmem:[%s3995_s7 + $0xa4] sm:$0x7f]   ;;  %v3782_v46 = vld [vmem:[%s3995_s7 + $0x10] sm:$0xff]  }
  0x24   : > { %v965_v44 = vor.u32 %v964_v40, %v961_v39  ;;  %v973_v45 = vor.u32 %v972_v42, %v969_v41  ;;  %v981_v53 = vrot.slane %v979_v47, 3  ;;  %v3260_v62 = vcombine.low %v667_v58, %v951_v59  ;;  %v1102_v20 = vld [vmem:[%s3995_s7 + $0x8] sm:$0xf]  ;;  %v1101_v25 = vld [vmem:[%s3995_s7 + $0x4] sm:$0xf]  ;;  %s3105_s19 = sshll.u32 %s4606_s11, 4  ;;  %s4815_s19 = int_to_ptr.vmem [resolvable:$true] %s3105_s19 }
  0x25   : > { %v987_v60 = vrot.slane %v985_v55, 2  ;;  %v990_v61 = vrot.slane %v988_v56, 3  ;;  %v697_v0 = vrot.slane %v4032_v28, 2  ;;  %v698_v1 = vrot.slane %v4027_v26, 2  ;;  %v4120_v28 = vld [vmem:[%s3995_s7 + $0x24] sm:$0x1f]   ;;  %p3814_p1 = scmp.lt.s32.totalorder %s4815_s19, %s3812_s29 }
  0x26   : > { %v974_v51 = vsel %vm957_vm5, %v965_v44, %v973_v45  ;;  %v982_v57 = vor.u32 %v981_v53, %v978_v52  ;;  %v994_v6 = vshrl.u32 %v3260_v62, 16  ;;  %v997_v8 = vshll.u32 %v3260_v62, 16  ;;  %v3780_v40 = vld [vmem:[%s3995_s7 + $0x8] sm:$0xff]   ;;  %v3277_v55 = vld [vmem:[%s4868_s1 + $0x1c] sm:$0xf]  ;;  %s4821_s15 = scalar_lea.sflag [#allocation3], %s201_s30 }
  0x27   : > { %3363 = vmatmul.mubr.msk.bf16.gmra.mrb[4].mxu1 %vm278_vm3, %v273_v23  ;;  %v991_v4 = vor.u32 %v990_v61, %v987_v60  ;;  %v4090_v9 = vsel %vm696_vm6, %v697_v0, %v698_v1  ;;  %v700_v10 = vrot.slane %v4050_v38, 2  ;;  %v702_v11 = vrot.slane %v3779_v50, 2  ;;  %v3789_v60 = vld [vmem:[%s3995_s7 + $0x8] sm:$0xff]   ;;  %v3786_v62 = vld [vmem:[%s3995_s7 + $0x20] ss:$0 sps:$4 sm:$0xff]   ;;  %s3807_s27 = scalar_lea.vmem %s4815_s19, 1024 }
  0x28   : > { %3366 = vmatprep.mubr.msk.bf16.mxu1 %vm3888_vm1, %v3887_v2  ;;  %v983_v63 = vsel %vm957_vm5, %v973_v45, %v982_v57  ;;  %v3242_v13 = vcombine.low %v667_v58, %v668_v12  ;;  %v576_v15 = vsel %vm294_vm0, %v3226_v5, 0  ;;  %v996_v24 = vrot.slane %v994_v6, 2  ;;  %v3791_v12 = vld [vmem:[%s3995_s7 + $0x10] sm:$0xff]   ;;  %p3808_p12 = scmp.ne.s32.totalorder %s4815_s19, %s3807_s27  ;;  %s3813_s4 = scalar_lea.vmem %s3812_s29, 2048 }
  0x29   : > { %3451 = vmatmul.mubr.msk.bf16.gmra.mrb[4].mxu0 %vm278_vm3, %v847_v27  ;;  %v4100_v17 = vsel %vm696_vm6, %v698_v1, %v700_v10  ;;  %v992_v19 = vsel %vm957_vm5, %v982_v57, %v991_v4  ;;  %v4111_v22 = vsel %vm696_vm6, %v700_v10, %v702_v11  ;;  %v999_v26 = vrot.slane %v997_v8, 3  ;;  %v4117_v27 = vld [vmem:[%s3995_s7 + $0x1c] sm:$0xff]   ;;  %p3815_p2 = scmp.lt.s32.totalorder %s3813_s4, %s3807_s27 }
  0x2a   : > { %3454 = vmatprep.mubr.msk.bf16.mxu0 %vm3888_vm1, %v3887_v2  ;;  %v4113_v23 = vrot.slane %v3242_v13, 2  ;;  %v3289_v29 = vcombine.low %v1457_v14, %v1102_v20  ;;  %v1464_v31 = vrot.slane %v4097_v16, 1  ;;  %v1466_v33 = vrot.slane %v4108_v21, 1  ;;  %v3237_v13 = vld [vmem:[%s4868_s1 + $0xc] sm:$0xf]  ;;  %p3809_p13 = pnand %p3808_p12, %p3953_p4 }
  0x2b   : > { %v850_v34 = vrot.slane %v4103_v18, 3  ;;  %v1468_v36 = vrot.slane %v4117_v27, 1  ;;  %v1000_v41 = vor.u32 %v999_v26, %v996_v24  ;;  %v3267_v45 = vcombine.low %v1101_v25, %v1102_v20  ;;  %p3816_p3 = por %p3815_p2, %p3814_p1 }
  0x2c   : > { %v4127_v32 = vsel %vm696_vm6, %v702_v11, %v4113_v23  ;;  %v4136_v38 = vsel %vm268_vm2, %v1464_v31, %v1466_v33  ;;  %v1146_v50 = vshll.u32 %v4097_v16, 16  ;;  %v1150_v57 = vshrl.u32 %v4097_v16, 16  ;;  %p3810_p0 = pneg %p3809_p13 }
  0x2d   : > { %v4143_v39 = vsel %vm842_vm4, %v848_v30, %v850_v34  ;;  %v1001_v30 = vsel %vm957_vm5, %v991_v4, %v1000_v41  ;;  %v1141_v47 = vshll.u32 %v3267_v45, 16  ;;  %v1154_v58 = vshll.u32 %v4108_v21, 16 }
  0x2e   : > { %v1148_v53 = vrot.slane %v1146_v50, 1  ;;  %v1374_v59 = vsel %vm294_vm0, %v3277_v55, 0  ;;  %v529_v5 = vshll.u32 %v3789_v60, 16  ;;  %v1162_v8 = vshll.u32 %v4117_v27, 16  ;;  %p3817_p5 = pnand %p3816_p3, %p3810_p0 }
  0x2f   : > { %3367 = vmatmul.mubr.msk.bf16.gmra.mrb[8].mxu1 %vm278_vm3, %v275_v35  ;;  %v1463_v35 = vrot.slane %v3289_v29, 1  ;;  %v1143_v49 = vrot.slane %v1141_v47, 1  ;;  %v1156_v0 = vrot.slane %v1154_v58, 1  ;;  %v537_v20 = vshll.u32 %v3791_v12, 16 }
  0x30   : > { %3370 = vmatprep.mubr.msk.bf16.mxu1 %vm3888_vm1, %v3887_v2  ;;  %v531_v11 = vrot.slane %v529_v5, 1  ;;  %v1166_v26 = vshrl.u32 %v4117_v27, 16  ;;  %v1170_v29 = vshll.u32 %v4120_v28, 16  ;;  %v1174_v50 = vshrl.u32 %v4120_v28, 16 }
  0x31   : > { %3455 = vmatmul.mubr.msk.bf16.gmra.mrb[8].mxu0 %vm278_vm3, %v849_v37  ;;  %v1470_v37 = vrot.slane %v4120_v28, 1  ;;  %v4149_v42 = vsel %vm268_vm2, %v1463_v35, %v1464_v31  ;;  %v3793_v35 = vld [vmem:[%s3995_s7 + $0x18] sm:$0xff]  }
  0x32   : > { %3468 = vmatprep.mubr.msk.bf16.mxu0 %vm3888_vm1, %v3887_v2  ;;  %v545_v25 = vshll.u32 %v3793_v35, 16 }
  0x33   : > { %v4157_v44 = vsel %vm268_vm2, %v1468_v36, %v1470_v37 }
  0x37   : > { %3371 = vmatmul.mubr.msk.bf16.gmra.mrb[12].mxu1 %vm278_vm3, %v277_v48  ;;  %v1139_v48 = vshrl.u32 %v3267_v45, 16  ;;  %v3795_v45 = vld [vmem:[%s3995_s7 + $0x30] sm:$0xfe]  }
  0x38   : > { %3374 = vmatprep.mubr.msk.bf16.mxu1 %vm3888_vm1, %v3887_v2 }
  0x39   : > { %3469 = vmatmul.mubr.msk.bf16.vlgmr.msra.gmra.mrb[0].mxu0 %vm278_vm3, %v974_v51  ;;  %v3783_v51 = vld [vmem:[%s3995_s7 + $0x18] sm:$0xff]   ;;  %v1144_v52 = vor.u32 %v1143_v49, %v1139_v48  ;;  %v547_v48 = vrot.slane %v545_v25, 1  ;;  %v3794_v49 = vld [vmem:[%s3995_s7 + $0x20] sm:$0x1f]  }
  0x3a   : > { %3489 = vmatpush3.bf16.msra.mxu0 %v1193_v54  ;;  %3472 = vmatprep.mubr.msk.bf16.mxu0 %vm3888_vm1, %v3887_v2  ;;  %v3788_v54 = vld [vmem:[%s3995_s7] sm:$0xff]  }
  0x3b   : > { %3510 = vmatprep.subr.bf16.mxu0 %v3887_v2  ;;  %v1149_v56 = vsel %vm520_vm7, %v1144_v52, %v1148_v53  ;;  %v524_v61 = vshll.u32 %v3788_v54, 16  ;;  %v522_v1 = vshrl.u32 %v3788_v54, 16  ;;  %v1318_v52 = vshll.u32 %v3795_v45, 16 }
  0x3d   : > { %v526_v4 = vrot.slane %v524_v61, 1 }
  0x3f   : > { %3375 = vmatmul.mubr.msk.bf16.gmra.mrb[16].mxu1 %vm278_vm3, %v276_v43  ;;  %v4152_v43 = vsel %vm268_vm2, %v1466_v33, %v1468_v36  ;;  %v527_v10 = vor.u32 %v526_v4, %v522_v1  ;;  %v539_v33 = vrot.slane %v537_v20, 1  ;;  %v1172_v36 = vrot.slane %v1170_v29, 1 }
  0x40   : > { %3380 = vmatprep.mubr.msk.bf16.mxu1 %vm3888_vm1, %v3887_v2 }
  0x41   : > { %3473 = vmatmul.mubr.msk.bf16.gmra.mrb[4].mxu0 %vm278_vm3, %v983_v63  ;;  %v1152_v63 = vor.u32 %v1150_v57, %v1148_v53  ;;  %v532_v16 = vsel %vm520_vm7, %v527_v10, %v531_v11  ;;  %v553_v57 = vshll.u32 %v3794_v49, 16  ;;  %v1176_v58 = vor.u32 %v1174_v50, %v1172_v36  ;;  %v3288_v10 = vld [vmem:[%s4868_s1 + $0x20] sm:$0xf] }
  0x42   : > { %3476 = vmatprep.mubr.msk.bf16.mxu0 %vm3888_vm1, %v3887_v2 }
  0x43   : > { %v1157_v6 = vsel %vm520_vm7, %v1152_v63, %v1156_v0  ;;  %v3797_v63 = vld [vmem:[%s3995_s7 + $0x40] sm:$0xff]   ;;  %v555_v1 = vrot.slane %v553_v57, 1 }
  0x47   : > { %3381 = vmatmul.mubr.msk.bf16.vlgmr.msra.gmra.mrb[0].mxu1 %vm278_vm3, %v3778_v7  ;;  %v1158_v7 = vshrl.u32 %v4108_v21, 16  ;;  %v722_v21 = vsel %vm294_vm0, %v3237_v13, 0 }
  0x48   : > { %3384 = vmatprep.mubr.msk.bf16.mxu1 %vm3888_vm1, %v3887_v2  ;;  %3401 = vmatpush3.bf16.msra.mxu1 %v576_v15  ;;  %v1164_v15 = vrot.slane %v1162_v8, 1 }
  0x49   : > { %3422 = vmatprep.subr.bf16.mxu1 %v3887_v2  ;;  %3477 = vmatmul.mubr.msk.bf16.gmra.mrb[8].mxu0 %vm278_vm3, %v992_v19  ;;  %v1160_v14 = vor.u32 %v1158_v7, %v1156_v0  ;;  %v533_v19 = vshrl.u32 %v3789_v60, 16  ;;  %v1320_v60 = vrot.slane %v1318_v52, 2  ;;  %v1335_v7 = vshll.u32 %v3797_v63, 16 }
  0x4a   : > { %3480 = vmatprep.mubr.msk.bf16.mxu0 %vm3888_vm1, %v3887_v2  ;;  %v1168_v27 = vor.u32 %v1166_v26, %v1164_v15 }
  0x4b   : > { %v1165_v24 = vsel %vm520_vm7, %v1160_v14, %v1164_v15  ;;  %v535_v31 = vor.u32 %v533_v19, %v531_v11  ;;  %v1337_v14 = vrot.slane %v1335_v7, 2  ;;  %v3798_v15 = vld [vmem:[%s3995_s7 + $0x48] sm:$0xff]  }
  0x4f   : > { %3385 = vmatmul.mubr.msk.bf16.gmra.mrb[4].mxu1 %vm278_vm3, %v3780_v40  ;;  %v540_v40 = vsel %vm520_vm7, %v535_v31, %v539_v33 }
  0x50   : > { %3388 = vmatprep.mubr.msk.bf16.mxu1 %vm3888_vm1, %v3887_v2 }
  0x51   : > { %3481 = vmatmul.mubr.msk.bf16.gmra.mrb[12].mxu0 %vm278_vm3, %v1001_v30  ;;  %v1173_v30 = vsel %vm520_vm7, %v1168_v27, %v1172_v36 }
  0x52   : > { %3484 = vmatprep.mubr.msk.bf16.mxu0 %vm3888_vm1, %v3887_v2 }
  0x57   : > { %3389 = vmatmul.mubr.msk.bf16.gmra.mrb[8].mxu1 %vm278_vm3, %v3782_v46  ;;  %v3796_v46 = vld [vmem:[%s3995_s7 + $0x38] sm:$0xff]  }
  0x58   : > { %3392 = vmatprep.mubr.msk.bf16.mxu1 %vm3888_vm1, %v3887_v2  ;;  %v1323_v53 = vshrl.u32 %v3796_v46, 16  ;;  %v1326_v54 = vshll.u32 %v3796_v46, 16  ;;  %v2083_v46 = vld [vmem:[%s4322_s9 + $0x10] sm:$0xff] }
  0x59   : > { %3485 = vmatmul.mubr.msk.bf16.gmra.mrb[16].mxu0 %vm278_vm3, %v1000_v41  ;;  %v541_v41 = vshrl.u32 %v3791_v12, 16  ;;  %v557_v12 = vshrl.u32 %v3794_v49, 16 }
  0x5a   : > { %3490 = vmatprep.mubr.msk.bf16.mxu0 %vm3888_vm1, %v3887_v2  ;;  %v1325_v61 = vrot.slane %v1323_v53, 1 }
  0x5b   : > { %v543_v47 = vor.u32 %v541_v41, %v539_v33  ;;  %v559_v19 = vor.u32 %v557_v12, %v555_v1  ;;  %v3799_v33 = vld [vmem:[%s3995_s7 + $0x50] sm:$0x3f]  }
  0x5c   : > { %v1350_v27 = vshrl.u32 %v3799_v33, 16  ;;  %v1353_v36 = vshll.u32 %v3799_v33, 16 }
  0x5d   : > { %v548_v55 = vsel %vm520_vm7, %v543_v47, %v547_v48 }
  0x5e   : > { %v1352_v41 = vrot.slane %v1350_v27, 1  ;;  %v1355_v25 = vrot.slane %v1353_v36, 2  ;;  %v2088_v36 = vld [vmem:[%s4322_s9 + $0x38] sm:$0xff] }
  0x5f   : > { %3393 = vmatmul.mubr.msk.bf16.gmra.mrb[12].mxu1 %vm278_vm3, %v3783_v51  ;;  %v1315_v51 = vshrl.u32 %v3795_v45, 16 }
  0x60   : > { %3396 = vmatprep.mubr.msk.bf16.mxu1 %vm3888_vm1, %v3887_v2 }
  0x61   : > { %3491 = vmatmul.mubr.msk.bf16.vlgmr.msra.gmra.mrb[0].mxu0 %vm278_vm3, %v1149_v56  ;;  %v549_v56 = vshrl.u32 %v3793_v35, 16 }
  0x62   : > { %3511 = vmatpush3.bf16.msra.mxu0 %v1374_v59  ;;  %3494 = vmatprep.mubr.msk.bf16.mxu0 %vm3888_vm1, %v3887_v2  ;;  %v1317_v59 = vrot.slane %v1315_v51, 1  ;;  %v2195_v51 = vcombine.high %v2083_v46, %v2083_v46 }
  0x63   : > { %3532 = vmatprep.subr.bf16.mxu0 %v3887_v2  ;;  %v551_v0 = vor.u32 %v549_v56, %v547_v48  ;;  %v2085_v56 = vld [vmem:[%s4322_s9 + $0x20] sm:$0xff] }
  0x64   : > { %v1321_v4 = vor.u32 %v1320_v60, %v1317_v59  ;;  %v2293_v7 = vcombine.high %v2085_v56, %v2085_v56 }
  0x65   : > { %v556_v8 = vsel %vm520_vm7, %v551_v0, %v555_v1  ;;  %v2086_v1 = vld [vmem:[%s4322_s9 + $0x28] sm:$0xff] }
  0x67   : > { %3397 = vmatmul.mubr.msk.bf16.gmra.mrb[16].mxu1 %vm278_vm3, %v3786_v62  ;;  %v1328_v62 = vrot.slane %v1326_v54, 2 }
  0x68   : > { %3402 = vmatprep.mubr.msk.bf16.mxu1 %vm3888_vm1, %v3887_v2 }
  0x69   : > { %3495 = vmatmul.mubr.msk.bf16.gmra.mrb[4].mxu0 %vm278_vm3, %v1157_v6  ;;  %v1329_v5 = vor.u32 %v1328_v62, %v1325_v61  ;;  %v1332_v6 = vshrl.u32 %v3797_v63, 16 }
  0x6a   : > { %3498 = vmatprep.mubr.msk.bf16.mxu0 %vm3888_vm1, %v3887_v2 }
  0x6b   : > { %v1330_v11 = vsel %vm1313_vm8, %v1321_v4, %v1329_v5  ;;  %v1334_v13 = vrot.slane %v1332_v6, 1 }
  0x6d   : > { %v1338_v20 = vor.u32 %v1337_v14, %v1334_v13 }
  0x6f   : > { %3403 = vmatmul.mubr.msk.bf16.vlgmr.msra.gmra.mrb[0].mxu1 %vm278_vm3, %v532_v16  ;;  %v1488_v16 = vsel %vm294_vm0, %v3288_v10, 0  ;;  %v1339_v26 = vsel %vm1313_vm8, %v1329_v5, %v1338_v20 }
  0x70   : > { %3406 = vmatprep.mubr.msk.bf16.mxu1 %vm3888_vm1, %v3887_v2  ;;  %3423 = vmatpush3.bf16.msra.mxu1 %v722_v21  ;;  %v1341_v21 = vshrl.u32 %v3798_v15, 16 }
  0x71   : > { %3554 = vmatprep.subr.bf16.mxu1 %v3887_v2  ;;  %3499 = vmatmul.mubr.msk.bf16.gmra.mrb[8].mxu0 %vm278_vm3, %v1165_v24  ;;  %v1344_v24 = vshll.u32 %v3798_v15, 16 }
  0x72   : > { %3502 = vmatprep.mubr.msk.bf16.mxu0 %vm3888_vm1, %v3887_v2  ;;  %v1343_v29 = vrot.slane %v1341_v21, 1 }
  0x73   : > { %v1346_v31 = vrot.slane %v1344_v24, 2 }
  0x75   : > { %v1347_v35 = vor.u32 %v1346_v31, %v1343_v29 }
  0x77   : > { %3407 = vmatmul.mubr.msk.bf16.gmra.mrb[4].mxu1 %vm278_vm3, %v540_v40  ;;  %v1348_v40 = vsel %vm1313_vm8, %v1338_v20, %v1347_v35  ;;  %v2342_v20 = vcombine.high %v2086_v1, %v2086_v1 }
  0x78   : > { %3410 = vmatprep.mubr.msk.bf16.mxu1 %vm3888_vm1, %v3887_v2 }
  0x79   : > { %3503 = vmatmul.mubr.msk.bf16.gmra.mrb[12].mxu0 %vm278_vm3, %v1173_v30  ;;  %v1356_v30 = vor.u32 %v1355_v25, %v1352_v41 }
  0x7a   : > { %3506 = vmatprep.mubr.msk.bf16.mxu0 %vm3888_vm1, %v3887_v2 }
  0x7f   : > { %3411 = vmatmul.mubr.msk.bf16.gmra.mrb[8].mxu1 %vm278_vm3, %v548_v55  ;;  %v2084_v55 = vld [vmem:[%s4322_s9 + $0x18] sm:$0xff] }
  0x80   : > { %3414 = vmatprep.mubr.msk.bf16.mxu1 %vm3888_vm1, %v3887_v2  ;;  %v2244_v60 = vcombine.high %v2084_v55, %v2084_v55 }
  0x81   : > { %3507 = vmatmul.mubr.msk.bf16.gmra.mrb[16].mxu0 %vm278_vm3, %v1176_v58 }
  0x82   : > { %3512 = vmatprep.mubr.msk.bf16.mxu0 %vm3888_vm1, %v3887_v2 }
  0x87   : > { %3415 = vmatmul.mubr.msk.bf16.gmra.mrb[12].mxu1 %vm278_vm3, %v556_v8 }
  0x88   : > { %3418 = vmatprep.mubr.msk.bf16.mxu1 %vm3888_vm1, %v3887_v2 }
  0x89   : > { %3513 = vmatmul.mubr.msk.bf16.vlgmr.msra.gmra.mrb[0].mxu0 %vm278_vm3, %v1330_v11 }
  0x8a   : > { %3533 = vmatpush3.bf16.msra.mxu0 %v1488_v16  ;;  %3516 = vmatprep.mubr.msk.bf16.mxu0 %vm3888_vm1, %v3887_v2 }
  0x8f   : > { %3419 = vmatmul.mubr.msk.bf16.gmra.mrb[16].mxu1 %vm278_vm3, %v559_v19  ;;  %v2087_v19 = vld [vmem:[%s4322_s9 + $0x30] sm:$0xff] }
  0x90   : > { %3424 = vmatprep.mubr.msk.bf16.mxu1 %vm3888_vm1, %v3887_v2 }
  0x91   : > { %3517 = vmatmul.mubr.msk.bf16.gmra.mrb[4].mxu0 %vm278_vm3, %v1339_v26 }
  0x92   : > { %3520 = vmatprep.mubr.msk.bf16.mxu0 %vm3888_vm1, %v3887_v2 }
  0x97   : > { %3425 = vmatmul.mubr.msk.bf16.vlgmr.msra.gmra.mrb[0].mxu1 %vm278_vm3, %v4090_v9  ;;  %v1357_v9 = vsel %vm1313_vm8, %v1347_v35, %v1356_v30 }
  0x98   : > { %3428 = vmatprep.mubr.msk.bf16.mxu1 %vm3888_vm1, %v3887_v2  ;;  %3555 = vmatpush3.bf16.msra.mxu1 %v3977_v3  ;;  %v3889_v3 = vmov 1966171168  }
  0x99   : > { %3521 = vmatmul.mubr.msk.bf16.gmra.mrb[8].mxu0 %vm278_vm3, %v1348_v40 }
  0x9a   : > { %3524 = vmatprep.mubr.msk.bf16.mxu0 %vm3888_vm1, %v3887_v2 }
  0x9f   : > { %3429 = vmatmul.mubr.msk.bf16.gmra.mrb[4].mxu1 %vm278_vm3, %v4100_v17  ;;  %v1582_v17 = vunpack.c.l.s4 %v3889_v3 }
  0xa0   : > { %3432 = vmatprep.mubr.msk.bf16.mxu1 %vm3888_vm1, %v3887_v2 }
  0xa1   : > { %3525 = vmatmul.mubr.msk.bf16.gmra.mrb[12].mxu0 %vm278_vm3, %v1357_v9  ;;  %v1583_v18 = vunpack.c.0.s8 %v1582_v17 }
  0xa2   : > { %3528 = vmatprep.mubr.msk.bf16.mxu0 %vm3888_vm1, %v3887_v2 }
  0xa7   : > { %3433 = vmatmul.mubr.msk.bf16.gmra.mrb[8].mxu1 %vm278_vm3, %v4111_v22  ;;  %v1584_v22 = vlaneseq }
  0xa8   : > { %3436 = vmatprep.mubr.msk.bf16.mxu1 %vm3888_vm1, %v3887_v2 }
  0xa9   : > { %3529 = vmatmul.mubr.msk.bf16.gmra.mrb[16].mxu0 %vm278_vm3, %v1356_v30  ;;  %v2391_v30 = vcombine.high %v2087_v19, %v2087_v19 }
  0xaa   : > { %3534 = vmatprep.mubr.msk.bf16.mxu0 %vm3888_vm1, %v3887_v2 }
  0xaf   : > { %3437 = vmatmul.mubr.msk.bf16.gmra.mrb[12].mxu1 %vm278_vm3, %v4127_v32  ;;  %v2081_v32 = vld [vmem:[%s4322_s9] sm:$0xff] }
  0xb0   : > { %3440 = vmatprep.mubr.msk.bf16.mxu1 %vm3888_vm1, %v3887_v2  ;;  %v2097_v28 = vcombine.high %v2081_v32, %v2081_v32 }
  0xb1   : > { %3535 = vmatmul.mubr.msk.bf16.vlgmr.msra.gmra.mrb[0].mxu0 %vm278_vm3, %v4149_v42 }
  0xb2   : > { %3538 = vmatprep.mubr.msk.bf16.mxu0 %vm3888_vm1, %v3887_v2 }
  0xb7   : > { %3441 = vmatmul.mubr.msk.bf16.gmra.mrb[16].mxu1 %vm278_vm3, %v4113_v23  ;;  %v1585_v23 = vshrl.u32 %v1584_v22, 7 }
  0xb8   : > { %3458 = vmatprep.mubr.msk.bf16.mxu1 %vm3888_vm1, %v3887_v2 }
  0xb9   : > { %3539 = vmatmul.mubr.msk.bf16.gmra.mrb[4].mxu0 %vm278_vm3, %v4136_v38 }
  0xba   : > { %3542 = vmatprep.mubr.msk.bf16.mxu0 %vm3888_vm1, %v3887_v2 }
  0xbf   : > { %3459 = vmatmul.mubr.msk.bf16.vlgmr.msra.gmra.mrb[12].mxu1 %vm278_vm3, %v4143_v39 }
  0xc0   : > { %3462 = vmatprep.mubr.msk.bf16.mxu1 %vm3888_vm1, %v3887_v2 }
  0xc1   : > { %3543 = vmatmul.mubr.msk.bf16.gmra.mrb[8].mxu0 %vm278_vm3, %v4152_v43 }
  0xc2   : > { %3546 = vmatprep.mubr.msk.bf16.mxu0 %vm3888_vm1, %v3887_v2 }
  0xc7   : > { %3463 = vmatmul.mubr.msk.bf16.gmra.mrb[16].mxu1 %vm278_vm3, %v850_v34  ;;  %v2082_v34 = vld [vmem:[%s4322_s9 + $0x8] sm:$0xff] }
  0xc8   : > { %v2146_v43 = vcombine.high %v2082_v34, %v2082_v34 }
  0xc9   : > { %3547 = vmatmul.mubr.msk.bf16.gmra.mrb[12].mxu0 %vm278_vm3, %v4157_v44 }
  0xca   : > { %3550 = vmatprep.mubr.msk.bf16.mxu0 %vm3888_vm1, %v3887_v2  ;;  %v4325_v2 = vsub.s32 %v1583_v18, %v1585_v23 }
  0xcc   : > { %v2104_v38 = vrot.slane %v2081_v32, %v4325_v2  ;;  %v2111_v42 = vrot.slane %v2097_v28, %v4325_v2  ;;  %v2153_v45 = vrot.slane %v2082_v34, %v4325_v2  ;;  %v2160_v50 = vrot.slane %v2146_v43, %v4325_v2 }
  0xcd   : > { %v2202_v53 = vrot.slane %v2083_v46, %v4325_v2  ;;  %v2209_v0 = vrot.slane %v2195_v51, %v4325_v2  ;;  %v2251_v13 = vrot.slane %v2084_v55, %v4325_v2  ;;  %v2258_v16 = vrot.slane %v2244_v60, %v4325_v2 }
  0xce   : > { %v2112_v48 = vcombine.high %v2104_v38, %v2104_v38  ;;  %v2113_v49 = vcombine.high %v2111_v42, %v2111_v42  ;;  %v2161_v52 = vcombine.high %v2153_v45, %v2153_v45  ;;  %v4339_v54 = vrot.slane %v2104_v38, %v4325_v2 }
  0xcf   : > { %v4346_v58 = vrot.slane %v2111_v42, %v4325_v2  ;;  %v2162_v63 = vcombine.high %v2160_v50, %v2160_v50  ;;  %v2210_v6 = vcombine.high %v2202_v53, %v2202_v53  ;;  %v4364_v11 = vrot.slane %v2153_v45, %v4325_v2 }
  0xd0   : > { %v4349_v59 = vrot.slane %v2112_v48, %v4325_v2  ;;  %v4352_v62 = vrot.slane %v2113_v49, %v4325_v2  ;;  %v4359_v5 = vrot.slane %v2161_v52, %v4325_v2  ;;  %v2142_v10 = vcombine.high %v4339_v54, %v4339_v54 }
  0xd1   : > { %3551 = vmatmul.mubr.msk.bf16.gmra.mrb[16].mxu0 %vm278_vm3, %v1470_v37  ;;  %v4367_v12 = vrot.slane %v2160_v50, %v4325_v2  ;;  %v2143_v14 = vcombine.high %v4346_v58, %v4346_v58  ;;  %v4379_v24 = vrot.slane %v2162_v63, %v4325_v2  ;;  %v2211_v26 = vcombine.high %v2209_v0, %v2209_v0 }
  0xd2   : > { %v2144_v15 = vcombine.high %v4349_v59, %v4349_v59  ;;  %v2145_v21 = vcombine.high %v4352_v62, %v4352_v62  ;;  %v4382_v29 = vrot.slane %v2202_v53, %v4325_v2  ;;  %v2193_v31 = vcombine.high %v4359_v5, %v4359_v5 }
  0xd3   : > { %v4387_v33 = vrot.slane %v2210_v6, %v4325_v2  ;;  %v2300_v35 = vrot.slane %v2085_v56, %v4325_v2  ;;  %v2307_v27 = vrot.slane %v2293_v7, %v4325_v2  ;;  %v2191_v40 = vcombine.high %v4364_v11, %v4364_v11 }
  0xd4   : > { %v2259_v25 = vcombine.high %v2251_v13, %v2251_v13  ;;  %v4399_v3 = vrot.slane %v2209_v0, %v4325_v2  ;;  %v2260_v17 = vcombine.high %v2258_v16, %v2258_v16  ;;  %v2349_v22 = vrot.slane %v2086_v1, %v4325_v2 }
  0xd5   : > { %v2356_v18 = vrot.slane %v2342_v20, %v4325_v2  ;;  %v4406_v28 = vrot.slane %v2211_v26, %v4325_v2  ;;  %v2440_v38 = vcombine.high %v2088_v36, %v2088_v36  ;;  %v4415_v43 = vrot.slane %v2251_v13, %v4325_v2 }
  0xd6   : > { %v2308_v45 = vcombine.high %v2300_v35, %v2300_v35  ;;  %v2309_v46 = vcombine.high %v2307_v27, %v2307_v27  ;;  %v4418_v48 = vrot.slane %v2259_v25, %v4325_v2  ;;  %v4421_v49 = vrot.slane %v2258_v16, %v4325_v2 }
  0xd7   : > { %v2398_v50 = vrot.slane %v2087_v19, %v4325_v2  ;;  %v2405_v51 = vrot.slane %v2391_v30, %v4325_v2  ;;  %v4428_v53 = vrot.slane %v2260_v17, %v4325_v2  ;;  %v2357_v55 = vcombine.high %v2349_v22, %v2349_v22 }
  0xd8   : > { %v2358_v56 = vcombine.high %v2356_v18, %v2356_v18  ;;  %v2447_v63 = vrot.slane %v2088_v36, %v4325_v2  ;;  %v2454_v0 = vrot.slane %v2440_v38, %v4325_v2  ;;  %v4440_v6 = vrot.slane %v2308_v45, %v4325_v2 }
  0xd9   : > { %v4443_v7 = vrot.slane %v2307_v27, %v4325_v2  ;;  %v2406_v19 = vcombine.high %v2398_v50, %v2398_v50  ;;  %v2407_v20 = vcombine.high %v2405_v51, %v2405_v51  ;;  %v4458_v27 = vrot.slane %v2357_v55, %v4325_v2 }
  0xda   : > { %v4461_v36 = vrot.slane %v2358_v56, %v4325_v2  ;;  %v4466_v30 = vrot.slane %v2356_v18, %v4325_v2  ;;  %v2455_v17 = vcombine.high %v2447_v63, %v2447_v63  ;;  %v4481_v18 = vrot.slane %v2405_v51, %v4325_v2 }
  0xdb   : > { %v4478_v55 = vrot.slane %v2406_v19, %v4325_v2  ;;  %v4484_v56 = vrot.slane %v2407_v20, %v4325_v2  ;;  %v4487_v38 = vrot.slane %v2447_v63, %v4325_v2  ;;  %v4499_v26 = vrot.slane %v2454_v0, %v4325_v2 }
  0xdc   : > { %v4502_v63 = vrot.slane %v2455_v17, %v4325_v2 }
 0x16a   : > { %v4328_v37 = vpop.f32.mrb[0].mxu1 }
 0x16b   : > { %v3426_v39 = vpop.f32.mrb[1].mxu1 }
 0x16c   : > { %v4332_v44 = vpop.f32.mrb[2].mxu1 }
 0x16d   : > { %v3427_v47 = vpop.f32.mrb[3].mxu1 }
 0x172   : > { %v4343_v57 = vpop.f32.mrb[4].mxu1 }
 0x173   : > { %v3430_v61 = vpop.f32.mrb[5].mxu1 }
 0x174   : > { %v4356_v4 = vpop.f32.mrb[6].mxu1  ;;  %v4433_v61 = vrot.slane %v2300_v35, %v4325_v2  ;;  %v4455_v35 = vrot.slane %v2349_v22, %v4325_v2 }
 0x175   : > { %v3431_v8 = vpop.f32.mrb[7].mxu1 }
 0x176   : > { %v4446_v8 = vrot.slane %v2309_v46, %v4325_v2  ;;  %v4475_v46 = vrot.slane %v2398_v50, %v4325_v2 }
 0x17a   : > { %v4396_v9 = vpop.f32.mrb[8].mxu1 }
 0x17b   : > { %v3434_v23 = vpop.f32.mrb[9].mxu1 }
 0x17c   : > { %v4410_v39 = vpop.f32.mrb[10].mxu1  ;;  %v2456_v23 = vcombine.high %v2454_v0, %v2454_v0 }
 0x17d   : > { %v3435_v47 = vpop.f32.mrb[11].mxu1 }
 0x184   : > { %v1524_v47 = vpop.f32.mrb[0].mxu0 }
 0x185   : > { %v3556_v22 = vadd.f32 %v1524_v47, %v4328_v37  ;;  %v3536_v25 = vpop.f32.mrb[1].mxu0  ;;  %v4505_v37 = vrot.slane %v2456_v23, %v4325_v2 }
 0x186   : > { %v1527_v51 = vpop.f32.mrb[2].mxu0 }
 0x187   : > { %v1580_v25 = vcombine.high %v3556_v22, %v3556_v22  ;;  %v1587_v47 = vrot.slane %v3556_v22, %v4325_v2  ;;  %v3557_v45 = vadd.f32 %v1527_v51, %v4332_v44  ;;  %v3537_v50 = vpop.f32.mrb[3].mxu0 }
 0x189   : > { %v1594_v22 = vrot.slane %v1580_v25, %v4325_v2  ;;  %v1595_v16 = vcombine.high %v1587_v47, %v1587_v47  ;;  %v1603_v44 = vrot.slane %v1587_v47, %v4325_v2  ;;  %v1629_v50 = vcombine.high %v3557_v45, %v3557_v45 }
 0x18a   : > { %v1636_v51 = vrot.slane %v3557_v45, %v4325_v2 }
 0x18b   : > { %v1596_v19 = vcombine.high %v1594_v22, %v1594_v22  ;;  %v1610_v23 = vrot.slane %v1594_v22, %v4325_v2  ;;  %v1617_v25 = vrot.slane %v1595_v16, %v4325_v2  ;;  %v1625_v13 = vcombine.high %v1603_v44, %v1603_v44 }
 0x18c   : > { %v2553_v47 = vadd.f32 %v4339_v54, %v1603_v44  ;;  %v1643_v1 = vrot.slane %v1629_v50, %v4325_v2  ;;  %v1644_v45 = vcombine.high %v1636_v51, %v1636_v51  ;;  %v1652_v60 = vrot.slane %v1636_v51, %v4325_v2  ;;  %v1532_v20 = vpop.f32.mrb[4].mxu0 }
 0x18d   : > { %v1624_v52 = vrot.slane %v1596_v19, %v4325_v2  ;;  %v1626_v0 = vcombine.high %v1610_v23, %v1610_v23  ;;  %v1627_v42 = vcombine.high %v1617_v25, %v1617_v25  ;;  %v2554_v17 = vadd.f32 %v4349_v59, %v1617_v25  ;;  %v3540_v34 = vpop.f32.mrb[5].mxu0 }
 0x18e   : > { %v2555_v16 = vadd.f32 %v2142_v10, %v1625_v13  ;;  %v2557_v22 = vadd.f32 %v4346_v58, %v1610_v23  ;;  %v1645_v44 = vcombine.high %v1643_v1, %v1643_v1  ;;  %v1659_v50 = vrot.slane %v1643_v1, %v4325_v2  ;;  %v1535_v32 = vpop.f32.mrb[6].mxu0 }
 0x18f   : > { %v1628_v41 = vcombine.high %v1624_v52, %v1624_v52  ;;  %v2556_v19 = vadd.f32 %v2144_v15, %v1627_v42  ;;  %v2558_v51 = vadd.f32 %v4352_v62, %v1624_v52  ;;  %v2559_v34 = vadd.f32 %v2143_v14, %v1626_v0  ;;  %v3541_v25 = vpop.f32.mrb[7].mxu0 }
 0x190   : > { %v2681_v54 = vcombine.low %v2553_v47, %v2554_v17  ;;  %v1666_v10 = vrot.slane %v1644_v45, %v4325_v2  ;;  %v1673_v13 = vrot.slane %v1645_v44, %v4325_v2  ;;  %v1674_v23 = vcombine.high %v1652_v60, %v1652_v60 }
 0x191   : > { %v2560_v1 = vadd.f32 %v2145_v21, %v1628_v41  ;;  %v2682_v59 = vcombine.low %v2555_v16, %v2556_v19  ;;  %v2683_v15 = vcombine.low %v2557_v22, %v2558_v51  ;;  %v1675_v42 = vcombine.high %v1659_v50, %v1659_v50 }
 0x192   : > { %v4552_v52 = vpop.f32.mrb[12].mxu1  ;;  %v2691_v58 = vrot.slane %v2681_v54, %v4325_v2  ;;  %v1676_v14 = vcombine.high %v1666_v10, %v1666_v10  ;;  %v1677_v0 = vcombine.high %v1673_v13, %v1673_v13  ;;  %v2561_v17 = vadd.f32 %v4364_v11, %v1666_v10 }
 0x193   : > { %v3460_v47 = vpop.f32.mrb[13].mxu1  ;;  %v2684_v45 = vcombine.low %v2559_v34, %v2560_v1  ;;  %v2698_v60 = vrot.slane %v2682_v59, %v4325_v2  ;;  %v2705_v44 = vrot.slane %v2683_v15, %v4325_v2  ;;  %v2562_v62 = vadd.f32 %v4359_v5, %v1674_v23 }
 0x194   : > { %v4559_v21 = vpop.f32.mrb[14].mxu1  ;;  %v2563_v41 = vadd.f32 %v2191_v40, %v1676_v14  ;;  %v2564_v16 = vadd.f32 %v2193_v31, %v1659_v50  ;;  %v2565_v22 = vadd.f32 %v4367_v12, %v1673_v13  ;;  %v2566_v19 = vadd.f32 %v4379_v24, %v1675_v42  ;;  %v1540_v51 = vpop.f32.mrb[8].mxu0 }
 0x195   : > { %v3461_v34 = vpop.f32.mrb[15].mxu1  ;;  %v2712_v25 = vrot.slane %v2684_v45, %v4325_v2  ;;  %v2713_v54 = vcombine.low %v2691_v58, %v2698_v60  ;;  %v2730_v10 = vcombine.low %v2561_v17, %v2562_v62  ;;  %v3558_v23 = vadd.f32 %v1532_v20, %v4343_v57  ;;  %v3544_v1 = vpop.f32.mrb[9].mxu0 }
 0x196   : > { %v2731_v11 = vcombine.low %v2563_v41, %v2564_v16  ;;  %v2732_v40 = vcombine.low %v2565_v22, %v2566_v19  ;;  %v4873_v5 = vcombine.high %v4367_v12, %v4367_v12  ;;  %v3559_v31 = vadd.f32 %v1535_v32, %v4356_v4  ;;  %v4576_v50 = vpop.f32.mrb[10].mxu0 }
 0x197   : > { %v2714_v13 = vcombine.low %v2705_v44, %v2712_v25  ;;  %v2721_v15 = vrot.slane %v2713_v54, %v4325_v2  ;;  %v2740_v42 = vrot.slane %v2730_v10, %v4325_v2  ;;  %v1678_v57 = vcombine.high %v3558_v23, %v3558_v23  ;;  %v3545_v20 = vpop.f32.mrb[11].mxu0 }
 0x198   : > { %v2567_v59 = vadd.f32 %v4873_v5, %v1677_v0  ;;  %v2747_v58 = vrot.slane %v2731_v11, %v4325_v2  ;;  %v1685_v14 = vrot.slane %v3558_v23, %v4325_v2  ;;  %v2754_v12 = vrot.slane %v2732_v40, %v4325_v2 }
 0x199   : > { %v1727_v0 = vcombine.high %v3559_v31, %v3559_v31  ;;  %v2728_v4 = vrot.slane %v2714_v13, %v4325_v2  ;;  %v1692_v32 = vrot.slane %v1678_v57, %v4325_v2  ;;  %v1734_v17 = vrot.slane %v3559_v31, %v4325_v2 }
 0x19a   : > { %v4591_v47 = vadd.f32 %v1540_v51, %v4396_v9  ;;  %v4593_v45 = vpop.f32.mrb[16].mxu1  ;;  %v2762_v60 = vcombine.low %v2740_v42, %v2747_v58  ;;  %v1693_v44 = vcombine.high %v1685_v14, %v1685_v14  ;;  %v1701_v62 = vrot.slane %v1685_v14, %v4325_v2 }
 0x19b   : > { %v1741_v41 = vrot.slane %v1727_v0, %v4325_v2  ;;  %v3464_v16 = vpop.f32.mrb[17].mxu1  ;;  %v2729_v22 = vcombine.low %v2721_v15, %v2728_v4  ;;  %v1694_v19 = vcombine.high %v1692_v32, %v1692_v32  ;;  %v1708_v34 = vrot.slane %v1692_v32, %v4325_v2 }
 0x19c   : > { %v1742_v25 = vcombine.high %v1734_v17, %v1734_v17  ;;  %v939_v54 = vpop.f32.mrb[18].mxu1  ;;  %v2770_v10 = vrot.slane %v2762_v60, %v4325_v2  ;;  %v1715_v9 = vrot.slane %v1693_v44, %v4325_v2  ;;  %v1723_v51 = vcombine.high %v1701_v62, %v1701_v62  ;;  %v4603_v11 = vpop.f32.mrb[12].mxu0 }
 0x19d   : > { %v4874_v23 = vcombine.high %v4379_v24, %v4379_v24  ;;  %v3465_v40 = vpop.f32.mrb[19].mxu1  ;;  %3081 = vst.msk [vmem:[%s4606_s11] sm:$0xff] %vm278_vm3, %v2729_v22  ;;  %v1722_v5 = vrot.slane %v1694_v19, %v4325_v2  ;;  %v1724_v31 = vcombine.high %v1708_v34, %v1708_v34  ;;  %v4875_v13 = vcombine.high %v4382_v29, %v4382_v29  ;;  %v3548_v57 = vpop.f32.mrb[13].mxu0 }
 0x19e   : > { %v1743_v42 = vcombine.high %v1741_v41, %v1741_v41  ;;  %v1725_v20 = vcombine.high %v1715_v9, %v1715_v9  ;;  %v2569_v24 = vadd.f32 %v4382_v29, %v1723_v51  ;;  %v1750_v14 = vrot.slane %v1734_v17, %v4325_v2  ;;  %v4616_v0 = vpop.f32.mrb[14].mxu0 }
 0x19f   : > { %v2568_v1 = vadd.f32 %v4874_v23, %v1701_v62  ;;  %v2571_v15 = vadd.f32 %v4875_v13, %v1708_v34  ;;  %v1726_v4 = vcombine.high %v1722_v5, %v1722_v5  ;;  %v4876_v32 = vcombine.high %v4387_v33, %v4387_v33  ;;  %v3549_v16 = vpop.f32.mrb[15].mxu0 }
 0x1a0   : > { %v2573_v44 = vadd.f32 %v4399_v3, %v1724_v31  ;;  %v1757_v62 = vrot.slane %v1741_v41, %v4325_v2  ;;  %v2570_v22 = vadd.f32 %v4387_v33, %v1725_v20  ;;  %v1764_v29 = vrot.slane %v1742_v25, %v4325_v2 }
 0x1a1   : > { %v2733_v58 = vcombine.low %v2567_v59, %v2568_v1  ;;  %v2572_v60 = vadd.f32 %v4876_v32, %v1722_v5  ;;  %v1771_v59 = vrot.slane %v1743_v42, %v4325_v2  ;;  %v2574_v17 = vadd.f32 %v4406_v28, %v1726_v4 }
 0x1a2   : > { %v1772_v54 = vcombine.high %v1757_v62, %v1757_v62  ;;  %v4877_v9 = vcombine.high %v4399_v3, %v4399_v3  ;;  %v2779_v1 = vcombine.low %v2569_v24, %v2570_v22  ;;  %v1773_v41 = vcombine.high %v1764_v29, %v1764_v29 }
 0x1a3   : > { %v2761_v19 = vrot.slane %v2733_v58, %v4325_v2  ;;  %v2780_v34 = vcombine.low %v2571_v15, %v2572_v60  ;;  %v1774_v40 = vcombine.high %v1771_v59, %v1771_v59  ;;  %v2781_v5 = vcombine.low %v2573_v44, %v2574_v17 }
 0x1a4   : > { %v2575_v51 = vadd.f32 %v4877_v9, %v1750_v14  ;;  %v4878_v25 = vcombine.high %v4406_v28, %v4406_v28  ;;  %v2578_v13 = vadd.f32 %v4418_v48, %v1757_v62  ;;  %v2789_v42 = vrot.slane %v2779_v1, %v4325_v2  ;;  %v1556_v20 = vpop.f32.mrb[16].mxu0 }
 0x1a5   : > { %v2763_v23 = vcombine.low %v2754_v12, %v2761_v19  ;;  %v2796_v33 = vrot.slane %v2780_v34, %v4325_v2  ;;  %v2577_v3 = vadd.f32 %v4415_v43, %v1773_v41  ;;  %v4879_v12 = vcombine.high %v4415_v43, %v4415_v43  ;;  %v3552_v32 = vpop.f32.mrb[17].mxu0 }
 0x1a6   : > { %v2576_v31 = vadd.f32 %v4878_v25, %v1764_v29  ;;  %v4880_v24 = vcombine.high %v4418_v48, %v4418_v48  ;;  %v2803_v14 = vrot.slane %v2781_v5, %v4325_v2  ;;  %v1775_v4 = vcombine.high %v4591_v47, %v4591_v47  ;;  %v1559_v16 = vpop.f32.mrb[18].mxu0 }
 0x1a7   : > { %v2777_v15 = vrot.slane %v2763_v23, %v4325_v2  ;;  %v2579_v57 = vadd.f32 %v4879_v12, %v1771_v59  ;;  %v2811_v44 = vcombine.low %v2789_v42, %v2796_v33  ;;  %v2828_v62 = vcombine.low %v2577_v3, %v2578_v13  ;;  %v3553_v59 = vpop.f32.mrb[19].mxu0 }
 0x1a8   : > { %v2580_v58 = vadd.f32 %v4880_v24, %v1772_v54  ;;  %v2782_v28 = vcombine.low %v2575_v51, %v2576_v31  ;;  %v1782_v43 = vrot.slane %v4591_v47, %v4325_v2  ;;  %v1789_v48 = vrot.slane %v1775_v4, %v4325_v2 }
 0x1a9   : > { %v2778_v60 = vcombine.low %v2770_v10, %v2777_v15  ;;  %v2581_v29 = vadd.f32 %v4421_v49, %v1774_v40  ;;  %v2819_v17 = vrot.slane %v2811_v44, %v4325_v2  ;;  %v2838_v10 = vrot.slane %v2828_v62, %v4325_v2 }
 0x1aa   : > { %v2810_v22 = vrot.slane %v2782_v28, %v4325_v2  ;;  %v2829_v19 = vcombine.low %v2579_v57, %v2580_v58  ;;  %v1790_v34 = vcombine.high %v1782_v43, %v1782_v43  ;;  %v1798_v54 = vrot.slane %v1782_v43, %v4325_v2 }
 0x1ab   : > { %3082 = vst.msk [vmem:[%s4606_s11 + $0x8] sm:$0xff] %vm278_vm3, %v2778_v60  ;;  %v1791_v51 = vcombine.high %v1789_v48, %v1789_v48  ;;  %v1805_v23 = vrot.slane %v1789_v48, %v4325_v2  ;;  %v3561_v5 = vadd.f32 %v4576_v50, %v4410_v39  ;;  %v4881_v15 = vcombine.high %v4421_v49, %v4421_v49 }
 0x1ac   : > { %v2812_v9 = vcombine.low %v2803_v14, %v2810_v22  ;;  %v2845_v47 = vrot.slane %v2829_v19, %v4325_v2  ;;  %v1812_v1 = vrot.slane %v1790_v34, %v4325_v2  ;;  %v1820_v41 = vcombine.high %v1798_v54, %v1798_v54 }
 0x1ad   : > { %v2582_v40 = vadd.f32 %v4428_v53, %v1798_v54  ;;  %v1819_v31 = vrot.slane %v1791_v51, %v4325_v2  ;;  %v1821_v13 = vcombine.high %v1805_v23, %v1805_v23  ;;  %v4882_v3 = vcombine.high %v4428_v53, %v4428_v53 }
 0x1ae   : > { %v2826_v33 = vrot.slane %v2812_v9, %v4325_v2  ;;  %v2860_v25 = vcombine.low %v2838_v10, %v2845_v47  ;;  %v2583_v42 = vadd.f32 %v4881_v15, %v1812_v1  ;;  %v2585_v57 = vadd.f32 %v4433_v61, %v1805_v23 }
 0x1af   : > { %v2584_v12 = vadd.f32 %v4882_v3, %v1820_v41  ;;  %v2830_v24 = vcombine.low %v2581_v29, %v2582_v40  ;;  %v1822_v50 = vcombine.high %v1819_v31, %v1819_v31  ;;  %v2586_v28 = vadd.f32 %v4440_v6, %v1819_v31 }
 0x1b0   : > { %v2827_v58 = vcombine.low %v2819_v17, %v2826_v33  ;;  %v2868_v39 = vrot.slane %v2860_v25, %v4325_v2  ;;  %v4883_v14 = vcombine.high %v4433_v61, %v4433_v61  ;;  %v1823_v60 = vcombine.high %v3561_v5, %v3561_v5 }
 0x1b1   : > { %v2831_v32 = vcombine.low %v2583_v42, %v2584_v12  ;;  %v2852_v49 = vrot.slane %v2830_v24, %v4325_v2  ;;  %v4884_v53 = vcombine.high %v4440_v6, %v4440_v6  ;;  %v2877_v62 = vcombine.low %v2585_v57, %v2586_v28 }
 0x1b2   : > { %v2587_v4 = vadd.f32 %v4883_v14, %v1821_v13  ;;  %3083 = vst.msk [vmem:[%s4606_s11 + $0x10] sm:$0xff] %vm278_vm3, %v2827_v58  ;;  %v1830_v43 = vrot.slane %v3561_v5, %v4325_v2  ;;  %v3562_v16 = vadd.f32 %v4603_v11, %v4552_v52  ;;  %v1837_v61 = vrot.slane %v1823_v60, %v4325_v2 }
 0x1b3   : > { %v2588_v44 = vadd.f32 %v4884_v53, %v1822_v50  ;;  %v2859_v22 = vrot.slane %v2831_v32, %v4325_v2  ;;  %v3563_v19 = vadd.f32 %v4616_v0, %v4559_v21  ;;  %v4692_v48 = vadd.f32 %v1556_v20, %v4593_v45 }
 0x1b4   : > { %v2887_v6 = vrot.slane %v2877_v62, %v4325_v2  ;;  %v1838_v59 = vcombine.high %v1830_v43, %v1830_v43  ;;  %v1846_v17 = vrot.slane %v1830_v43, %v4325_v2  ;;  %v1839_v34 = vcombine.high %v1837_v61, %v1837_v61 }
 0x1b5   : > { %v2878_v29 = vcombine.low %v2587_v4, %v2588_v44  ;;  %v2861_v10 = vcombine.low %v2852_v49, %v2859_v22  ;;  %v1853_v52 = vrot.slane %v1837_v61, %v4325_v2  ;;  %v1872_v11 = vcombine.high %v3562_v16, %v3562_v16 }
 0x1b6   : > { %v1860_v9 = vrot.slane %v1838_v59, %v4325_v2  ;;  %v1868_v47 = vcombine.high %v1846_v17, %v1846_v17  ;;  %v2589_v21 = vadd.f32 %v4443_v7, %v1846_v17  ;;  %v1867_v0 = vrot.slane %v1839_v34, %v4325_v2 }
 0x1b7   : > { %v2894_v54 = vrot.slane %v2878_v29, %v4325_v2  ;;  %v2875_v45 = vrot.slane %v2861_v10, %v4325_v2  ;;  %v1869_v20 = vcombine.high %v1853_v52, %v1853_v52  ;;  %v1879_v51 = vrot.slane %v3562_v16, %v4325_v2 }
 0x1b8   : > { %v1870_v1 = vcombine.high %v1860_v9, %v1860_v9  ;;  %v2590_v41 = vadd.f32 %v4446_v8, %v1860_v9  ;;  %v4885_v40 = vcombine.high %v4443_v7, %v4443_v7  ;;  %v1871_v25 = vcombine.high %v1867_v0, %v1867_v0 }
 0x1b9   : > { %v2909_v23 = vcombine.low %v2887_v6, %v2894_v54  ;;  %v2876_v33 = vcombine.low %v2868_v39, %v2875_v45  ;;  %v2593_v31 = vadd.f32 %v4455_v35, %v1867_v0  ;;  %v2594_v13 = vadd.f32 %v4458_v27, %v1869_v20 }
 0x1ba   : > { %v2591_v5 = vadd.f32 %v4885_v40, %v1868_v47  ;;  %v4886_v42 = vcombine.high %v4446_v8, %v4446_v8  ;;  %v2879_v12 = vcombine.low %v2589_v21, %v2590_v41  ;;  %v1886_v57 = vrot.slane %v1872_v11, %v4325_v2 }
 0x1bb   : > { %v2917_v15 = vrot.slane %v2909_v23, %v4325_v2  ;;  %3084 = vst.msk [vmem:[%s4606_s11 + $0x18] sm:$0xff] %vm278_vm3, %v2876_v33  ;;  %v2926_v24 = vcombine.low %v2593_v31, %v2594_v13  ;;  %v1887_v7 = vcombine.high %v1879_v51, %v1879_v51  ;;  %v1895_v58 = vrot.slane %v1879_v51, %v4325_v2 }
 0x1bc   : > { %v2592_v3 = vadd.f32 %v4886_v42, %v1870_v1  ;;  %v4887_v39 = vcombine.high %v4455_v35, %v4455_v35  ;;  %v2901_v14 = vrot.slane %v2879_v12, %v4325_v2  ;;  %v1888_v4 = vcombine.high %v1886_v57, %v1886_v57 }
 0x1bd   : > { %v1902_v8 = vrot.slane %v1886_v57, %v4325_v2  ;;  %v2936_v32 = vrot.slane %v2926_v24, %v4325_v2  ;;  %v1909_v49 = vrot.slane %v1887_v7, %v4325_v2  ;;  %v1917_v60 = vcombine.high %v1895_v58, %v1895_v58 }
 0x1be   : > { %v2595_v50 = vadd.f32 %v4887_v39, %v1871_v25  ;;  %v2880_v28 = vcombine.low %v2591_v5, %v2592_v3  ;;  %v4888_v53 = vcombine.high %v4458_v27, %v4458_v27  ;;  %v1916_v35 = vrot.slane %v1888_v4, %v4325_v2 }
 0x1bf   : > { %v1918_v43 = vcombine.high %v1902_v8, %v1902_v8  ;;  %v4889_v16 = vcombine.high %v4461_v36, %v4461_v36  ;;  %v1919_v61 = vcombine.high %v1909_v49, %v1909_v49  ;;  %v2597_v29 = vadd.f32 %v4466_v30, %v1909_v49 }
 0x1c0   : > { %v2596_v44 = vadd.f32 %v4888_v53, %v1895_v58  ;;  %v2908_v62 = vrot.slane %v2880_v28, %v4325_v2  ;;  %v2598_v6 = vadd.f32 %v4461_v36, %v1917_v60  ;;  %v1920_v10 = vcombine.high %v1916_v35, %v1916_v35 }
 0x1c1   : > { %v2600_v22 = vadd.f32 %v4889_v16, %v1902_v8  ;;  %v2601_v27 = vadd.f32 %v4475_v46, %v1918_v43  ;;  %v1921_v34 = vcombine.high %v3563_v19, %v3563_v19  ;;  %v4890_v52 = vcombine.high %v4466_v30, %v4466_v30 }
 0x1c2   : > { %v2927_v59 = vcombine.low %v2595_v50, %v2596_v44  ;;  %v2910_v17 = vcombine.low %v2901_v14, %v2908_v62  ;;  %v2928_v54 = vcombine.low %v2597_v29, %v2598_v6  ;;  %v1928_v47 = vrot.slane %v3563_v19, %v4325_v2 }
 0x1c3   : > { %v2599_v11 = vadd.f32 %v4890_v52, %v1919_v61  ;;  %v2602_v36 = vadd.f32 %v4478_v55, %v1920_v10  ;;  %v1935_v45 = vrot.slane %v1921_v34, %v4325_v2  ;;  %v1969_v0 = vcombine.high %v4692_v48, %v4692_v48 }
 0x1c4   : > { %v2943_v9 = vrot.slane %v2927_v59, %v4325_v2  ;;  %v2924_v21 = vrot.slane %v2910_v17, %v4325_v2  ;;  %v2950_v51 = vrot.slane %v2928_v54, %v4325_v2  ;;  %v1936_v23 = vcombine.high %v1928_v47, %v1928_v47 }
 0x1c5   : > { %v2929_v20 = vcombine.low %v2599_v11, %v2600_v22  ;;  %v2975_v41 = vcombine.low %v2601_v27, %v2602_v36  ;;  %v1937_v40 = vcombine.high %v1935_v45, %v1935_v45  ;;  %v1944_v19 = vrot.slane %v1928_v47, %v4325_v2 }
 0x1c6   : > { %v2958_v30 = vcombine.low %v2936_v32, %v2943_v9  ;;  %v2925_v1 = vcombine.low %v2917_v15, %v2924_v21  ;;  %v1951_v25 = vrot.slane %v1935_v45, %v4325_v2  ;;  %v1958_v31 = vrot.slane %v1936_v23, %v4325_v2 }
 0x1c7   : > { %v2957_v5 = vrot.slane %v2929_v20, %v4325_v2  ;;  %v1965_v13 = vrot.slane %v1937_v40, %v4325_v2  ;;  %v1966_v42 = vcombine.high %v1944_v19, %v1944_v19  ;;  %v4891_v15 = vcombine.high %v4475_v46, %v4475_v46 }
 0x1c8   : > { %v2966_v33 = vrot.slane %v2958_v30, %v4325_v2  ;;  %3085 = vst.msk [vmem:[%s4606_s11 + $0x20] sm:$0xff] %vm278_vm3, %v2925_v1  ;;  %v2985_v12 = vrot.slane %v2975_v41, %v4325_v2  ;;  %v1967_v24 = vcombine.high %v1958_v31, %v1958_v31  ;;  %v4892_v7 = vcombine.high %v4478_v55, %v4478_v55 }
 0x1c9   : > { %v2603_v3 = vadd.f32 %v4891_v15, %v1944_v19  ;;  %v2959_v57 = vcombine.low %v2950_v51, %v2957_v5  ;;  %v4893_v39 = vcombine.high %v4481_v18, %v4481_v18  ;;  %v1968_v28 = vcombine.high %v1965_v13, %v1965_v13 }
 0x1ca   : > { %v2604_v58 = vadd.f32 %v4892_v7, %v1958_v31  ;;  %v2605_v14 = vadd.f32 %v4481_v18, %v1966_v42  ;;  %v4894_v4 = vcombine.high %v4484_v56, %v4484_v56  ;;  %v1976_v8 = vrot.slane %v4692_v48, %v4325_v2 }
 0x1cb   : > { %v2607_v50 = vadd.f32 %v4893_v39, %v1951_v25  ;;  %v2973_v32 = vrot.slane %v2959_v57, %v4325_v2  ;;  %v2606_v55 = vadd.f32 %v4484_v56, %v1967_v24  ;;  %v1983_v60 = vrot.slane %v1969_v0, %v4325_v2 }
 0x1cc   : > { %v2608_v46 = vadd.f32 %v4894_v4, %v1965_v13  ;;  %v2976_v49 = vcombine.low %v2603_v3, %v2604_v58  ;;  %v1984_v44 = vcombine.high %v1976_v8, %v1976_v8  ;;  %v1992_v62 = vrot.slane %v1976_v8, %v4325_v2 }
 0x1cd   : > { %v2609_v18 = vadd.f32 %v4487_v38, %v1968_v28  ;;  %v2974_v35 = vcombine.low %v2966_v33, %v2973_v32  ;;  %v2977_v43 = vcombine.low %v2605_v14, %v2606_v55  ;;  %v1985_v22 = vcombine.high %v1983_v60, %v1983_v60 }
 0x1ce   : > { %v2978_v53 = vcombine.low %v2607_v50, %v2608_v46  ;;  %v2992_v16 = vrot.slane %v2976_v49, %v4325_v2  ;;  %v1999_v61 = vrot.slane %v1983_v60, %v4325_v2  ;;  %v2006_v56 = vrot.slane %v1984_v44, %v4325_v2 }
 0x1cf   : > { %v2014_v29 = vcombine.high %v1992_v62, %v1992_v62  ;;  %3086 = vst.msk [vmem:[%s4606_s11 + $0x28] sm:$0xff] %vm278_vm3, %v2974_v35  ;;  %v2999_v6 = vrot.slane %v2977_v43, %v4325_v2  ;;  %v2013_v17 = vrot.slane %v1985_v22, %v4325_v2  ;;  %v2610_v10 = vadd.f32 %v4502_v63, %v1992_v62 }
 0x1d0   : > { %v3006_v48 = vrot.slane %v2978_v53, %v4325_v2  ;;  %v3007_v59 = vcombine.low %v2985_v12, %v2992_v16  ;;  %v2015_v27 = vcombine.high %v1999_v61, %v1999_v61  ;;  %v2016_v34 = vcombine.high %v2006_v56, %v2006_v56 }
 0x1d1   : > { %v4895_v52 = vcombine.high %v4487_v38, %v4487_v38  ;;  %v4896_v54 = vcombine.high %v4502_v63, %v4502_v63  ;;  %v2614_v36 = vadd.f32 %v4505_v37, %v1999_v61  ;;  %v4897_v45 = vcombine.high %v4499_v26, %v4499_v26 }
 0x1d2   : > { %v3008_v47 = vcombine.low %v2999_v6, %v3006_v48  ;;  %v3015_v21 = vrot.slane %v3007_v59, %v4325_v2  ;;  %v2613_v20 = vadd.f32 %v4499_v26, %v2016_v34  ;;  %v4898_v38 = vcombine.high %v4505_v37, %v4505_v37 }
 0x1d3   : > { %v2611_v11 = vadd.f32 %v4895_v52, %v2006_v56  ;;  %v2612_v9 = vadd.f32 %v4896_v54, %v2014_v29  ;;  %v2615_v0 = vadd.f32 %v4897_v45, %v2013_v17  ;;  %v3024_v63 = vcombine.low %v2609_v18, %v2610_v10 }
 0x1d4   : > { %v2616_v51 = vadd.f32 %v4898_v38, %v2015_v27  ;;  %v3022_v23 = vrot.slane %v3008_v47, %v4325_v2  ;;  %v3026_v1 = vcombine.low %v2613_v20, %v2614_v36 }
 0x1d5   : > { %v3025_v30 = vcombine.low %v2611_v11, %v2612_v9  ;;  %v3034_v40 = vrot.slane %v3024_v63, %v4325_v2 }
 0x1d6   : > { %v3027_v41 = vcombine.low %v2615_v0, %v2616_v51  ;;  %v3023_v5 = vcombine.low %v3015_v21, %v3022_v23  ;;  %v3048_v26 = vrot.slane %v3026_v1, %v4325_v2 }
 0x1d7   : > { %v3041_v19 = vrot.slane %v3025_v30, %v4325_v2 }
 0x1d8   : > { %v3055_v37 = vrot.slane %v3027_v41, %v4325_v2  ;;  %3087 = vst.msk [vmem:[%s4606_s11 + $0x30] sm:$0xff] %vm278_vm3, %v3023_v5 }
 0x1d9   : > { %v3056_v33 = vcombine.low %v3034_v40, %v3041_v19 }
 0x1da   : > { %v3057_v25 = vcombine.low %v3048_v26, %v3055_v37 }
 0x1db   : > { %v3064_v31 = vrot.slane %v3056_v33, %v4325_v2 }
 0x1dc   : > { %v3071_v13 = vrot.slane %v3057_v25, %v4325_v2 }
 0x1de   : > { %v3072_v42 = vcombine.low %v3064_v31, %v3071_v13 }
 0x1e0   : > { %3088 = vst.msk [vmem:[%s4606_s11 + $0x38] sm:$0xff] %vm278_vm3, %v3072_v42 }
 0x1e1   : > { %3820 = shalt.err (!%p3817_p5)
}
 0x1e2   : > { %s3821_s5 = scalar_lea.hbm %s4813_s26, 1024  ;;  %s3825_s8 = scalar_lea.hbm %s4870_s3, 2048 }
 0x1e3   : > { %p3822_p6 = scmp.ne.s32.totalorder %s4813_s26, %s3821_s5  ;;  %p3826_p10 = scmp.lt.u32.totalorder %s4813_s26, %s4870_s3 }
 0x1e4   : > { %p3827_p11 = scmp.lt.u32.totalorder %s3825_s8, %s3821_s5  ;;  %p3829_p13 = scmp.lt.u32.totalorder %s3821_s5, %s4813_s26 }
 0x1e5   : > { %p3823_p7 = pnand %p3822_p6, %p3953_p4 }
 0x1e6   : > { %p3828_p12 = por %p3827_p11, %p3826_p10 }
 0x1e7   : > { %p3824_p9 = pneg %p3823_p7 }
 0x1e8   : > { %p3830_p0 = por %p3829_p13, %p3828_p12 }
 0x1ea   : > { %p3831_p1 = pnand %p3830_p0, %p3824_p9 }
 0x1ec   : > { %3834 = shalt.err (!%p3831_p1)
}
 0x1ed   : > { %s3891_s10 = smov 128   ;;  %s3892_s11 = smov 8  }
 0x1ee   : > { %3706 = dma.vmem_to_hbm [thread:$0]  (%p3953_p4), %s4815_s19, 1024, %s4813_s26, %s4821_s15, %s3891_s10, %s3891_s10, %s3892_s11  }
 0x1ef PF: > { %p3712_p2 = scmp.ge.s32.totalorder %s3885_s17, 2  ;;  %s3120_s18 = sand.u32 1, %s3865_s12  }
 0x1f0   : > { %s3121_s21 = scalar_lea.sflag [#allocation3], %s3120_s18 }
 0x1f1   : > { %p3709_p3 = pnand %p3712_p2, %p3960_p8 }
 0x1f3   : > { %3860 = dma.done.wait (!%p3709_p3), %s3121_s21, 1024  }
 0x1f4   : > { %3862 = vsyncadd (!%p3709_p3), %s3121_s21, 4294966272  ;;  %s16_s17 = sadd.s32 1, %s3885_s17   ;;  %s4899_s12 = smov %s3869_s13 }
 0x1f5   : > { %p13_p5 = scmp.ge.s32.totalorder %s16_s17, 4   ;;  %s4900_s13 = smov %s3873_s14 }
 0x1f6   : > { %s4901_s14 = smov %s3966_s25  ;;  %s4902_s15 = smov %s3881_s16 }
 0x1f7   : > { %s4903_s16 = smov %s4905_s20  ;;  %15 = sbr.rel (!%p13_p5) target bundleno = 4 (0x4), region = 78 }
 0x1fe   :  { %3126 = vsyncpa [#allocation3], 1 }
 0x1ff   :  { %3128 = vsyncpa [#allocation3 + $0x1], 1 }

</bundles_post_ra>
